<compile_context>
chip_gen: v7x
topology: tpu7x:2x2x1
jax: 0.10.0
libtpu: 0.0.40
codegen_flags: <defaults>
</compile_context>

<pallas_src>
import functools
import math

import jax
import jax.numpy as jnp
from jax.experimental import pallas as pl
from jax.experimental.pallas import tpu as pltpu

GELU_C = math.sqrt(2.0 / math.pi)


def _round_up(x, m):
    return ((x + m - 1) // m) * m


def _tpu_defaults():
    """Generation-aware (vmem_limit_bytes, default row tile)."""
    vmem_cap = 128 * 1024 * 1024
    try:
        info = pltpu.get_tpu_info()
        vmem_cap = int(getattr(info, "vmem_capacity_bytes", vmem_cap))
    except Exception:
        pass
    if vmem_cap >= 96 * 1024 * 1024:      # v5e / v6e: 128 MiB physical VMEM
        return 96 * 1024 * 1024, 512
    return 48 * 1024 * 1024, 256          # v7x: 64 MiB per TensorCore


_VMEM_LIMIT, _DEFAULT_TILE_N = _tpu_defaults()


# --------------------------------------------------------------------------------------
# Fused Linear (+activation) (+residual) (+LayerNorm) kernel
# --------------------------------------------------------------------------------------
def _make_fused_linear_kernel(activation, has_res, has_ln, eps):
    def kernel(*refs):
        x_ref, w_ref, b_ref = refs[0], refs[1], refs[2]
        idx = 3
        res_ref = gamma_ref = beta_ref = None
        if has_res:
            res_ref = refs[idx]
            idx += 1
        if has_ln:
            gamma_ref, beta_ref = refs[idx], refs[idx + 1]
            idx += 2
        o_ref = refs[idx]

        # Native-dtype (bf16) operands into the MXU; f32 accumulation + f32 epilogue.
        h = jnp.dot(x_ref[...], w_ref[...], preferred_element_type=jnp.float32)
        h = h + b_ref[...].astype(jnp.float32)

        if activation in ("gelu", "gelu_new"):
            h = 0.5 * h * (1.0 + jnp.tanh(GELU_C * (h + 0.044715 * (h * h * h))))
        elif activation == "relu":
            h = jnp.maximum(h, 0.0)
        elif activation == "swish":
            h = h * jax.nn.sigmoid(h)
        elif activation == "tanh":
            h = jnp.tanh(h)

        if has_res:
            h = h + res_ref[...].astype(jnp.float32)

        if has_ln:
            # one-pass stats; clamp var >= 0 against f32 rounding (E[x^2] - mean^2)
            mean = jnp.mean(h, axis=-1, keepdims=True)
            var = jnp.mean(h * h, axis=-1, keepdims=True) - mean * mean
            var = jnp.maximum(var, 0.0)
            h = (h - mean) * jax.lax.rsqrt(var + eps)
            h = h * gamma_ref[...].astype(jnp.float32) + beta_ref[...].astype(jnp.float32)

        o_ref[...] = h.astype(o_ref.dtype)

    return kernel


def fused_linear(x, w_t, b, *, residual=None, gamma=None, beta=None,
                 activation=None, eps=1e-12, tile_n=None):
    """y = [LN]( act(x @ w_t + b) [+ residual] ).

    x: (n, k).  w_t is pre-transposed & pre-padded (k_pad, m) at param-prep time;
    b / gamma / beta are pre-shaped (1, m).  Only the activation is padded per call.
    """
    if tile_n is None:
        tile_n = _DEFAULT_TILE_N        # sweep {256, 512, 1024} at real shapes
    n, k = x.shape
    k_pad, m = w_t.shape
    has_res = residual is not None
    has_ln = gamma is not None

    if x.dtype != w_t.dtype:
        x = x.astype(w_t.dtype)

    tile = min(tile_n, _round_up(n, 8))
    n_pad = _round_up(n, tile)
    if n_pad != n or k_pad != k:
        x = jnp.pad(x, ((0, n_pad - n), (0, k_pad - k)))
    if has_res and n_pad != n:
        residual = jnp.pad(residual, ((0, n_pad - n), (0, 0)))

    in_specs = [
        pl.BlockSpec((tile, k_pad), lambda i: (i, 0)),   # activations: row-tiled
        pl.BlockSpec((k_pad, m), lambda i: (0, 0)),      # weight: VMEM-resident
        pl.BlockSpec((1, m), lambda i: (0, 0)),          # bias: VMEM-resident
    ]
    args = [x, w_t, b]
    if has_res:
        in_specs.append(pl.BlockSpec((tile, m), lambda i: (i, 0)))
        args.append(residual)
    if has_ln:
        in_specs.append(pl.BlockSpec((1, m), lambda i: (0, 0)))
        in_specs.append(pl.BlockSpec((1, m), lambda i: (0, 0)))
        args.append(gamma)
        args.append(beta)

    out = pl.pallas_call(
        _make_fused_linear_kernel(activation, has_res, has_ln, eps),
        out_shape=jax.ShapeDtypeStruct((n_pad, m), x.dtype),
        grid=(n_pad // tile,),
        in_specs=in_specs,
        out_specs=pl.BlockSpec((tile, m), lambda i: (i, 0)),
        compiler_params=pltpu.CompilerParams(
            dimension_semantics=("parallel",),
            vmem_limit_bytes=_VMEM_LIMIT,
        ),
    )(*args)
    return out[:n] if n_pad != n else out


# --------------------------------------------------------------------------------------
# LayerNorm kernel (embedding output)
# --------------------------------------------------------------------------------------
def _layernorm_kernel(x_ref, g_ref, b_ref, o_ref, *, eps):
    x = x_ref[...].astype(jnp.float32)
    mean = jnp.mean(x, axis=-1, keepdims=True)
    var = jnp.maximum(jnp.mean(x * x, axis=-1, keepdims=True) - mean * mean, 0.0)
    y = (x - mean) * jax.lax.rsqrt(var + eps)
    o_ref[...] = (y * g_ref[...].astype(jnp.float32)
                  + b_ref[...].astype(jnp.float32)).astype(o_ref.dtype)


def layernorm(x, gamma, beta, *, eps=1e-12, tile_n=None):
    if tile_n is None:
        tile_n = _DEFAULT_TILE_N
    n, d = x.shape
    tile = min(tile_n, _round_up(n, 8))
    n_pad = _round_up(n, tile)
    if n_pad != n:
        x = jnp.pad(x, ((0, n_pad - n), (0, 0)))
    out = pl.pallas_call(
        functools.partial(_layernorm_kernel, eps=eps),
        out_shape=jax.ShapeDtypeStruct((n_pad, d), x.dtype),
        grid=(n_pad // tile,),
        in_specs=[
            pl.BlockSpec((tile, d), lambda i: (i, 0)),
            pl.BlockSpec((1, d), lambda i: (0, 0)),
            pl.BlockSpec((1, d), lambda i: (0, 0)),
        ],
        out_specs=pl.BlockSpec((tile, d), lambda i: (i, 0)),
        compiler_params=pltpu.CompilerParams(
            dimension_semantics=("parallel",),
            vmem_limit_bytes=_VMEM_LIMIT,
        ),
    )(x, gamma, beta)
    return out[:n] if n_pad != n else out


# --------------------------------------------------------------------------------------
# Self-attention kernel: one batch element per grid step, heads sliced from packed QKV
# --------------------------------------------------------------------------------------
def _attention_kernel(qkv_ref, mask_ref, o_ref, *, n_head, d_head, d_model):
    qkv = qkv_ref[...]                               # (S, 3D), Q already pre-scaled
    mask = mask_ref[...].astype(jnp.float32)         # (1, S) additive (-1e30 on pad keys)
    ctxs = []
    for h in range(n_head):                          # static unroll over heads
        q = qkv[:, h * d_head:(h + 1) * d_head]
        k = qkv[:, d_model + h * d_head:d_model + (h + 1) * d_head]
        v = qkv[:, 2 * d_model + h * d_head:2 * d_model + (h + 1) * d_head]
        # scores = (q * scale) @ k^T  (scale folded into Q weights at init)
        s = jax.lax.dot_general(q, k, (((1,), (1,)), ((), ())),
                                preferred_element_type=jnp.float32)
        s = s + mask
        s = s - jnp.max(s, axis=-1, keepdims=True)   # fully-masked row -> uniform, no NaN
        p = jnp.exp(s)
        p = p * pl.reciprocal(jnp.sum(p, axis=-1, keepdims=True), approx=True)
        ctxs.append(jnp.dot(p.astype(v.dtype), v, preferred_element_type=jnp.float32))
    # Single lane-dense (S, D) store instead of 4 masked 32-lane partial stores.
    o_ref[...] = jnp.concatenate(ctxs, axis=-1).astype(o_ref.dtype)


def multihead_attention(qkv2d, mask_add, batch, seq, n_head, d_model):
    # TODO(synk): for v7x with batch==1, grid over (batch, query-row tiles) instead so
    # both TensorCores are occupied; at these shapes a per-batch grid is sufficient.
    d_head = d_model // n_head
    qkv = qkv2d.reshape(batch, seq, 3 * d_model)     # layout-free reshape, no transpose
    out = pl.pallas_call(
        functools.partial(_attention_kernel, n_head=n_head, d_head=d_head,
                          d_model=d_model),
        out_shape=jax.ShapeDtypeStruct((batch, seq, d_model), qkv2d.dtype),
        grid=(batch,),
        in_specs=[
            pl.BlockSpec((None, seq, 3 * d_model), lambda b: (b, 0, 0)),
            pl.BlockSpec((None, 1, seq), lambda b: (b, 0, 0)),
        ],
        out_specs=pl.BlockSpec((None, seq, d_model), lambda b: (b, 0, 0)),
        compiler_params=pltpu.CompilerParams(
            dimension_semantics=("parallel",),
            vmem_limit_bytes=_VMEM_LIMIT,
        ),
    )(qkv, mask_add)
    return out.reshape(batch * seq, d_model)         # layout-free reshape


# --------------------------------------------------------------------------------------
# Config / parameters
# --------------------------------------------------------------------------------------
class Config:
    d_model = 128                 # lane-aligned (multiple of 128)
    n_head = 4
    n_layer = 2
    intermediate_size = 256       # lane-aligned
    vocab_size = 100
    pos_num = 20
    max_position_embeddings = 64
    type_vocab_size = 2
    v_feature_size = 64
    v_hidden_size = 128           # must equal d_model for the concat
    layer_norm_eps = 1e-12
    dropout = 0.0
    ff_activation = "gelu"        # ACT2FN['gelu'] == gelu_new
    output_attentions = False
    output_hidden_states = False


def init_params(key, cfg):
    """Reference-layout parameters (f32; Linear weights stored (in, out))."""
    d = cfg.d_model
    keys = iter(jax.random.split(key, 64))

    def w(shape, scale=0.02):
        return scale * jax.random.normal(next(keys), shape, dtype=jnp.float32)

    def ln_params():
        return (1.0 + 0.05 * jax.random.normal(next(keys), (d,), dtype=jnp.float32),
                0.05 * jax.random.normal(next(keys), (d,), dtype=jnp.float32))

    emb_g, emb_b = ln_params()
    params = {
        "word_emb": w((cfg.vocab_size, d)),
        "pos_tag_emb": w((cfg.pos_num, d)),
        "position_emb": w((cfg.max_position_embeddings, d)),
        "token_type_emb": w((cfg.type_vocab_size, d)),
        "img_w": w((cfg.v_feature_size, cfg.v_hidden_size)), "img_b": w((cfg.v_hidden_size,)),
        "img_loc_w": w((5, cfg.v_hidden_size)), "img_loc_b": w((cfg.v_hidden_size,)),
        "emb_ln_g": emb_g, "emb_ln_b": emb_b,
        "pooler_w": w((d, d)), "pooler_b": w((d,)),
        "layers": [],
    }
    for _ in range(cfg.n_layer):
        a_g, a_b = ln_params()
        o_g, o_b = ln_params()
        params["layers"].append({
            "q_w": w((d, d)), "q_b": w((d,)),
            "k_w": w((d, d)), "k_b": w((d,)),
            "v_w": w((d, d)), "v_b": w((d,)),
            "attn_out_w": w((d, d)), "attn_out_b": w((d,)),
            "attn_ln_g": a_g, "attn_ln_b": a_b,
            "inter_w": w((d, cfg.intermediate_size)), "inter_b": w((cfg.intermediate_size,)),
            "out_w": w((cfg.intermediate_size, d)), "out_b": w((d,)),
            "out_ln_g": o_g, "out_ln_b": o_b,
        })
    return params


def prepare_pallas_params(params, cfg, dtype=jnp.bfloat16):
    """One-time kernel-ready parameter prep (hoisted out of the forward path):
       - Q/K/V packed into one (d, 3d) weight with 1/sqrt(d_head) folded into Q,
       - img + img_loc weights stacked along the contraction dim and zero-padded to 128,
       - matmul weights & embedding tables cast to `dtype` (bf16 for MXU / HBM traffic),
       - biases and LayerNorm params kept in f32 and pre-shaped (1, m)."""
    d = cfg.d_model
    scale = 1.0 / math.sqrt(d // cfg.n_head)

    def w(a):
        return a.astype(dtype)

    def vec(a):
        return a.reshape(1, -1).astype(jnp.float32)

    k_img = cfg.v_feature_size + 5
    k_img_pad = _round_up(k_img, 128)
    img_cat_w = jnp.concatenate([params["img_w"], params["img_loc_w"]], axis=0)
    img_cat_w = jnp.pad(img_cat_w, ((0, k_img_pad - k_img), (0, 0)))

    pp = {
        "word_emb": w(params["word_emb"]),
        "pos_tag_emb": w(params["pos_tag_emb"]),
        "position_emb": w(params["position_emb"]),
        "token_type_emb": w(params["token_type_emb"]),
        "img_cat_w": w(img_cat_w),
        "img_cat_b": vec(params["img_b"] + params["img_loc_b"]),
        "emb_ln_g": vec(params["emb_ln_g"]), "emb_ln_b": vec(params["emb_ln_b"]),
        "pooler_w": w(params["pooler_w"]), "pooler_b": vec(params["pooler_b"]),
        "layers": [],
    }
    for lp in params["layers"]:
        qkv_w = jnp.concatenate([lp["q_w"] * scale, lp["k_w"], lp["v_w"]], axis=1)
        qkv_b = jnp.concatenate([lp["q_b"] * scale, lp["k_b"], lp["v_b"]])
        pp["layers"].append({
            "qkv_w": w(qkv_w), "qkv_b": vec(qkv_b),
            "attn_out_w": w(lp["attn_out_w"]), "attn_out_b": vec(lp["attn_out_b"]),
            "attn_ln_g": vec(lp["attn_ln_g"]), "attn_ln_b": vec(lp["attn_ln_b"]),
            "inter_w": w(lp["inter_w"]), "inter_b": vec(lp["inter_b"]),
            "out_w": w(lp["out_w"]), "out_b": vec(lp["out_b"]),
            "out_ln_g": vec(lp["out_ln_g"]), "out_ln_b": vec(lp["out_ln_b"]),
        })
    return pp


# --------------------------------------------------------------------------------------
# VDNet forward (inference: dropout = identity)
# --------------------------------------------------------------------------------------
def vdnet_forward(pp, input_txt, input_pos, input_imgs, img_loc, token_type_ids,
                  padding_mask=None, *, config, tile_n=None):
    d = config.d_model
    batch, seq_txt = input_txt.shape
    n_regions = input_imgs.shape[1]
    seq = seq_txt + n_regions
    eps = config.layer_norm_eps

    # ---- VDNetEmbedding --------------------------------------------------------------
    # TODO(synk): embedding-table gathers (word / pos-tag / position / token-type) stay
    # in JAX glue; a Pallas gather buys nothing at these vocab sizes.
    position_ids = jnp.arange(seq_txt, dtype=jnp.int32)[None, :]
    c_txt = (pp["word_emb"][input_txt]
             + pp["position_emb"][position_ids]
             + pp["pos_tag_emb"][input_pos]
             + pp["token_type_emb"][token_type_ids])                       # (B, St, D)

    # img + img_loc embedding in ONE matmul: features concatenated (64+5 -> pad 128).
    img_cat = jnp.concatenate(
        [input_imgs.reshape(batch * n_regions, config.v_feature_size),
         img_loc.reshape(batch * n_regions, 5)], axis=-1)
    img_e = fused_linear(img_cat, pp["img_cat_w"], pp["img_cat_b"], tile_n=tile_n)
    img_e = img_e.reshape(batch, n_regions, d)

    h = jnp.concatenate([c_txt, img_e.astype(c_txt.dtype)], axis=1)         # (B, S, D)
    h2d = layernorm(h.reshape(batch * seq, d), pp["emb_ln_g"], pp["emb_ln_b"],
                    eps=eps, tile_n=tile_n)

    # Additive key mask computed once (f32: -1e30 must not be expressed in bf16).
    if padding_mask is None:
        mask_add = jnp.zeros((batch, 1, seq), dtype=jnp.float32)
    else:
        mask_add = (-1e30 * padding_mask.astype(jnp.float32)).reshape(batch, 1, seq)

    # ---- VDLayer stack ---------------------------------------------------------------
    for lp in pp["layers"]:
        qkv = fused_linear(h2d, lp["qkv_w"], lp["qkv_b"], tile_n=tile_n)     # packed QKV
        attn_vec = multihead_attention(qkv, mask_add, batch, seq, config.n_head, d)
        attn_out = fused_linear(attn_vec, lp["attn_out_w"], lp["attn_out_b"],
                                residual=h2d, gamma=lp["attn_ln_g"], beta=lp["attn_ln_b"],
                                eps=eps, tile_n=tile_n)                      # VDSelfOutput
        inter = fused_linear(attn_out, lp["inter_w"], lp["inter_b"],
                             activation=config.ff_activation, tile_n=tile_n) # VDIntermediate
        h2d = fused_linear(inter, lp["out_w"], lp["out_b"],
                           residual=attn_out, gamma=lp["out_ln_g"], beta=lp["out_ln_b"],
                           eps=eps, tile_n=tile_n)                           # VDOutput

    # ---- VDPooler ----------------------------------------------------------------------
    pooled = fused_linear(h2d, pp["pooler_w"], pp["pooler_b"],
                          activation="tanh", tile_n=tile_n)
    return pooled.reshape(batch, seq, d)


# --------------------------------------------------------------------------------------
# Pure-JAX reference (mirrors the PyTorch module, highest-precision matmuls, f32)
# --------------------------------------------------------------------------------------
def _gelu_new(x):
    return 0.5 * x * (1.0 + jnp.tanh(GELU_C * (x + 0.044715 * x ** 3)))


def reference_vdnet(params, input_txt, input_pos, input_imgs, img_loc, token_type_ids,
                    padding_mask, config):
    high = jax.lax.Precision.HIGHEST
    d, n_head = config.d_model, config.n_head
    d_head = d // n_head
    batch, seq_txt = input_txt.shape
    n_regions = input_imgs.shape[1]
    seq = seq_txt + n_regions
    eps = config.layer_norm_eps

    def linear(x, w, b):
        return jnp.matmul(x, w, precision=high) + b

    def ln(x, g, b):
        mean = jnp.mean(x, -1, keepdims=True)
        var = jnp.mean((x - mean) ** 2, -1, keepdims=True)
        return (x - mean) / jnp.sqrt(var + eps) * g + b

    pos_ids = jnp.arange(seq_txt, dtype=jnp.int32)[None, :]
    emb = (params["word_emb"][input_txt] + params["position_emb"][pos_ids]
           + params["pos_tag_emb"][input_pos] + params["token_type_emb"][token_type_ids])
    img = (linear(input_imgs, params["img_w"], params["img_b"])
           + linear(img_loc, params["img_loc_w"], params["img_loc_b"]))
    h = ln(jnp.concatenate([emb, img], axis=1), params["emb_ln_g"], params["emb_ln_b"])

    def split(x):
        return x.reshape(batch, seq, n_head, d_head).transpose(0, 2, 1, 3)

    for lp in params["layers"]:
        q, k, v = (linear(h, lp["q_w"], lp["q_b"]), linear(h, lp["k_w"], lp["k_b"]),
                   linear(h, lp["v_w"], lp["v_b"]))
        s = jnp.einsum("bhqd,bhkd->bhqk", split(q), split(k), precision=high) / math.sqrt(d_head)
        if padding_mask is not None:
            s = s - 1e30 * padding_mask[:, None, None, :]
        p = jax.nn.softmax(s, axis=-1)
        av = jnp.einsum("bhqk,bhkd->bhqd", p, split(v), precision=high)
        av = av.transpose(0, 2, 1, 3).reshape(batch, seq, d)
        attn_out = ln(linear(av, lp["attn_out_w"], lp["attn_out_b"]) + h,
                      lp["attn_ln_g"], lp["attn_ln_b"])
        inter = _gelu_new(linear(attn_out, lp["inter_w"], lp["inter_b"]))
        h = ln(linear(inter, lp["out_w"], lp["out_b"]) + attn_out,
               lp["out_ln_g"], lp["out_ln_b"])

    return jnp.tanh(linear(h, params["pooler_w"], params["pooler_b"]))


# --------------------------------------------------------------------------------------
if __name__ == "__main__":
    cfg = Config()
    key = jax.random.PRNGKey(0)
    kp, k1, k2, k3, k4 = jax.random.split(key, 5)
    params = init_params(kp, cfg)
    pparams = prepare_pallas_params(params, cfg, dtype=jnp.bfloat16)

    batch, seq_txt, n_regions = 2, 8, 8
    seq = seq_txt + n_regions
    input_txt = jax.random.randint(k1, (batch, seq_txt), 0, cfg.vocab_size, dtype=jnp.int32)
    input_pos = jax.random.randint(k2, (batch, seq_txt), 0, cfg.pos_num, dtype=jnp.int32)
    token_type_ids = jnp.zeros((batch, seq_txt), dtype=jnp.int32)
    input_imgs = jax.random.normal(k3, (batch, n_regions, cfg.v_feature_size), dtype=jnp.float32)
    img_loc = jax.random.uniform(k4, (batch, n_regions, 5), dtype=jnp.float32)
    padding_mask = jnp.zeros((batch, seq), dtype=jnp.float32).at[1, 6:8].set(1.0)

    fwd = jax.jit(functools.partial(vdnet_forward, config=cfg))
    out = fwd(pparams, input_txt, input_pos, input_imgs, img_loc, token_type_ids, padding_mask)
    out = jax.block_until_ready(out)

    ref = reference_vdnet(params, input_txt, input_pos, input_imgs, img_loc,
                          token_type_ids, padding_mask, cfg)
    assert out.shape == (batch, seq, cfg.d_model)
    max_err = float(jnp.max(jnp.abs(out.astype(jnp.float32) - ref)))
    # bf16 matmul operands with f32 accumulation / f32 LN+softmax epilogue.
    assert max_err < 3e-2, max_err

    print("KERNEL_OK")
</pallas_src>

<mosaic_0001>
module attributes {stable_mosaic.version = 11 : i64} {
  func.func @kernel(%arg0: i32, %arg1: memref<16x128xbf16, #tpu.memory_space<vmem>>, %arg2: memref<128x128xbf16, #tpu.memory_space<vmem>>, %arg3: memref<1x128xf32, #tpu.memory_space<vmem>>, %arg4: memref<16x128xbf16, #tpu.memory_space<vmem>>) attributes {dimension_semantics = [#tpu.dimension_semantics<parallel>], iteration_bounds = array<i64: 1>, scalar_prefetch = 0 : i64, scratch_operands = 0 : i64, tpu.core_type = #tpu.core_type<tc>, window_params = [{transform_indices = @transform_0, window_bounds = array<i64: 16, 128>}, {pipeline_mode = #tpu.pipeline_mode<synchronous>, transform_indices = @transform_1, window_bounds = array<i64: 128, 128>}, {pipeline_mode = #tpu.pipeline_mode<synchronous>, transform_indices = @transform_2, window_bounds = array<i64: 1, 128>}, {transform_indices = @transform_3, window_bounds = array<i64: 16, 128>}]} {
    %c0 = arith.constant 0 : index
    %c0_0 = arith.constant 0 : index
    %0 = vector.load %arg1[%c0, %c0_0] : memref<16x128xbf16, #tpu.memory_space<vmem>>, vector<16x128xbf16>
    %c0_1 = arith.constant 0 : index
    %c0_2 = arith.constant 0 : index
    %1 = vector.load %arg2[%c0_1, %c0_2] : memref<128x128xbf16, #tpu.memory_space<vmem>>, vector<128x128xbf16>
    %cst = arith.constant dense<0.000000e+00> : vector<16x128xf32>
    %2 = tpu.matmul %0, %1, %cst {dimension_numbers = #tpu.dot_dimension_numbers<[1], [0], [0], [1], [0, 0, 1, 1], [], []>} : vector<16x128xbf16>, vector<128x128xbf16>, vector<16x128xf32> -> vector<16x128xf32>
    %c0_3 = arith.constant 0 : index
    %c0_4 = arith.constant 0 : index
    %3 = vector.load %arg3[%c0_3, %c0_4] : memref<1x128xf32, #tpu.memory_space<vmem>>, vector<1x128xf32>
    %4 = vector.broadcast %3 : vector<1x128xf32> to vector<16x128xf32>
    %5 = arith.addf %2, %4 : vector<16x128xf32>
    %6 = arith.truncf %5 : vector<16x128xf32> to vector<16x128xbf16>
    %c0_5 = arith.constant 0 : index
    %c0_6 = arith.constant 0 : index
    %7 = vector.load %arg4[%c0_5, %c0_6] : memref<16x128xbf16, #tpu.memory_space<vmem>>, vector<16x128xbf16>
    tpu.vector_store %arg4[%c0_5, %c0_6], %6 {strides = array<i32>} : memref<16x128xbf16, #tpu.memory_space<vmem>>, vector<16x128xbf16>,
    return
  }
  func.func @transform_0(%arg0: i32) -> (i32, i32) {
    %c0_i32 = arith.constant 0 : i32
    %c0_i32_0 = arith.constant 0 : i32
    return %arg0, %c0_i32 : i32, i32
  }
  func.func @transform_1(%arg0: i32) -> (i32, i32) {
    %c0_i32 = arith.constant 0 : i32
    %c0_i32_0 = arith.constant 0 : i32
    %c0_i32_1 = arith.constant 0 : i32
    return %c0_i32, %c0_i32_0 : i32, i32
  }
  func.func @transform_2(%arg0: i32) -> (i32, i32) {
    %c0_i32 = arith.constant 0 : i32
    %c0_i32_0 = arith.constant 0 : i32
    %c0_i32_1 = arith.constant 0 : i32
    return %c0_i32, %c0_i32_0 : i32, i32
  }
  func.func @transform_3(%arg0: i32) -> (i32, i32) {
    %c0_i32 = arith.constant 0 : i32
    %c0_i32_0 = arith.constant 0 : i32
    return %arg0, %c0_i32 : i32, i32
  }
}

module attributes {stable_mosaic.version = 11 : i64} {
  func.func @_layernorm_kernel(%arg0: i32, %arg1: memref<32x128xbf16, #tpu.memory_space<vmem>>, %arg2: memref<1x128xf32, #tpu.memory_space<vmem>>, %arg3: memref<1x128xf32, #tpu.memory_space<vmem>>, %arg4: memref<32x128xbf16, #tpu.memory_space<vmem>>) attributes {dimension_semantics = [#tpu.dimension_semantics<parallel>], iteration_bounds = array<i64: 1>, scalar_prefetch = 0 : i64, scratch_operands = 0 : i64, tpu.core_type = #tpu.core_type<tc>, window_params = [{transform_indices = @transform_0, window_bounds = array<i64: 32, 128>}, {pipeline_mode = #tpu.pipeline_mode<synchronous>, transform_indices = @transform_1, window_bounds = array<i64: 1, 128>}, {pipeline_mode = #tpu.pipeline_mode<synchronous>, transform_indices = @transform_2, window_bounds = array<i64: 1, 128>}, {transform_indices = @transform_3, window_bounds = array<i64: 32, 128>}]} {
    %c0 = arith.constant 0 : index
    %c0_0 = arith.constant 0 : index
    %0 = vector.load %arg1[%c0, %c0_0] : memref<32x128xbf16, #tpu.memory_space<vmem>>, vector<32x128xbf16>
    %1 = arith.extf %0 : vector<32x128xbf16> to vector<32x128xf32>
    %cst = arith.constant dense<0.000000e+00> : vector<32xf32>
    %2 = vector.multi_reduction <add>, %1, %cst [1] : vector<32x128xf32> to vector<32xf32>
    %3 = vector.shape_cast %2 : vector<32xf32> to vector<32x1xf32>
    %cst_1 = arith.constant 1.280000e+02 : f32
    %4 = vector.broadcast %cst_1 : f32 to vector<32x1xf32>
    %5 = arith.divf %3, %4 : vector<32x1xf32>
    %6 = arith.mulf %1, %1 : vector<32x128xf32>
    %cst_2 = arith.constant dense<0.000000e+00> : vector<32xf32>
    %7 = vector.multi_reduction <add>, %6, %cst_2 [1] : vector<32x128xf32> to vector<32xf32>
    %8 = vector.shape_cast %7 : vector<32xf32> to vector<32x1xf32>
    %cst_3 = arith.constant 1.280000e+02 : f32
    %9 = vector.broadcast %cst_3 : f32 to vector<32x1xf32>
    %10 = arith.divf %8, %9 : vector<32x1xf32>
    %11 = arith.mulf %5, %5 : vector<32x1xf32>
    %12 = arith.subf %10, %11 : vector<32x1xf32>
    %cst_4 = arith.constant 0.000000e+00 : f32
    %13 = vector.broadcast %cst_4 : f32 to vector<32x1xf32>
    %14 = arith.maximumf %12, %13 : vector<32x1xf32>
    %15 = vector.broadcast %5 : vector<32x1xf32> to vector<32x128xf32>
    %16 = arith.subf %1, %15 : vector<32x128xf32>
    %cst_5 = arith.constant 9.99999996E-13 : f32
    %17 = vector.broadcast %cst_5 : f32 to vector<32x1xf32>
    %18 = arith.addf %14, %17 : vector<32x1xf32>
    %19 = math.rsqrt %18 : vector<32x1xf32>
    %20 = vector.broadcast %19 : vector<32x1xf32> to vector<32x128xf32>
    %21 = arith.mulf %16, %20 : vector<32x128xf32>
    %c0_6 = arith.constant 0 : index
    %c0_7 = arith.constant 0 : index
    %22 = vector.load %arg2[%c0_6, %c0_7] : memref<1x128xf32, #tpu.memory_space<vmem>>, vector<1x128xf32>
    %23 = vector.broadcast %22 : vector<1x128xf32> to vector<32x128xf32>
    %24 = arith.mulf %21, %23 : vector<32x128xf32>
    %c0_8 = arith.constant 0 : index
    %c0_9 = arith.constant 0 : index
    %25 = vector.load %arg3[%c0_8, %c0_9] : memref<1x128xf32, #tpu.memory_space<vmem>>, vector<1x128xf32>
    %26 = vector.broadcast %25 : vector<1x128xf32> to vector<32x128xf32>
    %27 = arith.addf %24, %26 : vector<32x128xf32>
    %28 = arith.truncf %27 : vector<32x128xf32> to vector<32x128xbf16>
    %c0_10 = arith.constant 0 : index
    %c0_11 = arith.constant 0 : index
    %29 = vector.load %arg4[%c0_10, %c0_11] : memref<32x128xbf16, #tpu.memory_space<vmem>>, vector<32x128xbf16>
    tpu.vector_store %arg4[%c0_10, %c0_11], %28 {strides = array<i32>} : memref<32x128xbf16, #tpu.memory_space<vmem>>, vector<32x128xbf16>,
    return
  }
  func.func @transform_0(%arg0: i32) -> (i32, i32) {
    %c0_i32 = arith.constant 0 : i32
    %c0_i32_0 = arith.constant 0 : i32
    return %arg0, %c0_i32 : i32, i32
  }
  func.func @transform_1(%arg0: i32) -> (i32, i32) {
    %c0_i32 = arith.constant 0 : i32
    %c0_i32_0 = arith.constant 0 : i32
    %c0_i32_1 = arith.constant 0 : i32
    return %c0_i32, %c0_i32_0 : i32, i32
  }
  func.func @transform_2(%arg0: i32) -> (i32, i32) {
    %c0_i32 = arith.constant 0 : i32
    %c0_i32_0 = arith.constant 0 : i32
    %c0_i32_1 = arith.constant 0 : i32
    return %c0_i32, %c0_i32_0 : i32, i32
  }
  func.func @transform_3(%arg0: i32) -> (i32, i32) {
    %c0_i32 = arith.constant 0 : i32
    %c0_i32_0 = arith.constant 0 : i32
    return %arg0, %c0_i32 : i32, i32
  }
}

module attributes {stable_mosaic.version = 11 : i64} {
  func.func @kernel(%arg0: i32, %arg1: memref<32x128xbf16, #tpu.memory_space<vmem>>, %arg2: memref<128x384xbf16, #tpu.memory_space<vmem>>, %arg3: memref<1x384xf32, #tpu.memory_space<vmem>>, %arg4: memref<32x384xbf16, #tpu.memory_space<vmem>>) attributes {dimension_semantics = [#tpu.dimension_semantics<parallel>], iteration_bounds = array<i64: 1>, scalar_prefetch = 0 : i64, scratch_operands = 0 : i64, tpu.core_type = #tpu.core_type<tc>, window_params = [{transform_indices = @transform_0, window_bounds = array<i64: 32, 128>}, {pipeline_mode = #tpu.pipeline_mode<synchronous>, transform_indices = @transform_1, window_bounds = array<i64: 128, 384>}, {pipeline_mode = #tpu.pipeline_mode<synchronous>, transform_indices = @transform_2, window_bounds = array<i64: 1, 384>}, {transform_indices = @transform_3, window_bounds = array<i64: 32, 384>}]} {
    %c0 = arith.constant 0 : index
    %c0_0 = arith.constant 0 : index
    %0 = vector.load %arg1[%c0, %c0_0] : memref<32x128xbf16, #tpu.memory_space<vmem>>, vector<32x128xbf16>
    %c0_1 = arith.constant 0 : index
    %c0_2 = arith.constant 0 : index
    %1 = vector.load %arg2[%c0_1, %c0_2] : memref<128x384xbf16, #tpu.memory_space<vmem>>, vector<128x384xbf16>
    %cst = arith.constant dense<0.000000e+00> : vector<32x384xf32>
    %2 = tpu.matmul %0, %1, %cst {dimension_numbers = #tpu.dot_dimension_numbers<[1], [0], [0], [1], [0, 0, 1, 1], [], []>} : vector<32x128xbf16>, vector<128x384xbf16>, vector<32x384xf32> -> vector<32x384xf32>
    %c0_3 = arith.constant 0 : index
    %c0_4 = arith.constant 0 : index
    %3 = vector.load %arg3[%c0_3, %c0_4] : memref<1x384xf32, #tpu.memory_space<vmem>>, vector<1x384xf32>
    %4 = vector.broadcast %3 : vector<1x384xf32> to vector<32x384xf32>
    %5 = arith.addf %2, %4 : vector<32x384xf32>
    %6 = arith.truncf %5 : vector<32x384xf32> to vector<32x384xbf16>
    %c0_5 = arith.constant 0 : index
    %c0_6 = arith.constant 0 : index
    %7 = vector.load %arg4[%c0_5, %c0_6] : memref<32x384xbf16, #tpu.memory_space<vmem>>, vector<32x384xbf16>
    tpu.vector_store %arg4[%c0_5, %c0_6], %6 {strides = array<i32>} : memref<32x384xbf16, #tpu.memory_space<vmem>>, vector<32x384xbf16>,
    return
  }
  func.func @transform_0(%arg0: i32) -> (i32, i32) {
    %c0_i32 = arith.constant 0 : i32
    %c0_i32_0 = arith.constant 0 : i32
    return %arg0, %c0_i32 : i32, i32
  }
  func.func @transform_1(%arg0: i32) -> (i32, i32) {
    %c0_i32 = arith.constant 0 : i32
    %c0_i32_0 = arith.constant 0 : i32
    %c0_i32_1 = arith.constant 0 : i32
    return %c0_i32, %c0_i32_0 : i32, i32
  }
  func.func @transform_2(%arg0: i32) -> (i32, i32) {
    %c0_i32 = arith.constant 0 : i32
    %c0_i32_0 = arith.constant 0 : i32
    %c0_i32_1 = arith.constant 0 : i32
    return %c0_i32, %c0_i32_0 : i32, i32
  }
  func.func @transform_3(%arg0: i32) -> (i32, i32) {
    %c0_i32 = arith.constant 0 : i32
    %c0_i32_0 = arith.constant 0 : i32
    return %arg0, %c0_i32 : i32, i32
  }
}

module attributes {stable_mosaic.version = 11 : i64} {
  func.func @_attention_kernel(%arg0: i32, %arg1: memref<1x16x384xbf16, #tpu.memory_space<vmem>>, %arg2: memref<1x1x16xf32, #tpu.memory_space<vmem>>, %arg3: memref<1x16x128xbf16, #tpu.memory_space<vmem>>) attributes {dimension_semantics = [#tpu.dimension_semantics<parallel>], iteration_bounds = array<i64: 2>, scalar_prefetch = 0 : i64, scratch_operands = 0 : i64, tpu.core_type = #tpu.core_type<tc>, window_params = [{transform_indices = @transform_0, window_bounds = array<i64: 1, 16, 384>}, {transform_indices = @transform_1, window_bounds = array<i64: 1, 1, 16>}, {transform_indices = @transform_2, window_bounds = array<i64: 1, 16, 128>}]} {
    %c0 = arith.constant 0 : index
    %c0_0 = arith.constant 0 : index
    %c0_1 = arith.constant 0 : index
    %0 = vector.load %arg1[%c0, %c0_0, %c0_1] : memref<1x16x384xbf16, #tpu.memory_space<vmem>>, vector<1x16x384xbf16>
    %1 = vector.shape_cast %0 : vector<1x16x384xbf16> to vector<16x384xbf16>
    %c0_2 = arith.constant 0 : index
    %c0_3 = arith.constant 0 : index
    %c0_4 = arith.constant 0 : index
    %2 = vector.load %arg2[%c0_2, %c0_3, %c0_4] : memref<1x1x16xf32, #tpu.memory_space<vmem>>, vector<1x1x16xf32>
    %3 = vector.shape_cast %2 : vector<1x1x16xf32> to vector<1x16xf32>
    %4 = vector.extract_strided_slice %1 {offsets = [0, 0], sizes = [16, 32], strides = [1, 1]} : vector<16x384xbf16> to vector<16x32xbf16>
    %5 = vector.extract_strided_slice %1 {offsets = [0, 128], sizes = [16, 32], strides = [1, 1]} : vector<16x384xbf16> to vector<16x32xbf16>
    %6 = vector.extract_strided_slice %1 {offsets = [0, 256], sizes = [16, 32], strides = [1, 1]} : vector<16x384xbf16> to vector<16x32xbf16>
    %cst = arith.constant dense<0.000000e+00> : vector<16x16xf32>
    %7 = tpu.matmul %4, %5, %cst {dimension_numbers = #tpu.dot_dimension_numbers<[1], [1], [0], [0], [0, 0, 1, 0], [], []>} : vector<16x32xbf16>, vector<16x32xbf16>, vector<16x16xf32> -> vector<16x16xf32>
    %8 = vector.broadcast %3 : vector<1x16xf32> to vector<16x16xf32>
    %9 = arith.addf %7, %8 : vector<16x16xf32>
    %cst_5 = arith.constant dense<0xFF800000> : vector<16xf32>
    %10 = vector.multi_reduction <maximumf>, %9, %cst_5 [1] : vector<16x16xf32> to vector<16xf32>
    %11 = vector.shape_cast %10 : vector<16xf32> to vector<16x1xf32>
    %12 = vector.broadcast %11 : vector<16x1xf32> to vector<16x16xf32>
    %13 = arith.subf %9, %12 : vector<16x16xf32>
    %14 = math.exp %13 : vector<16x16xf32>
    %cst_6 = arith.constant dense<0.000000e+00> : vector<16xf32>
    %15 = vector.multi_reduction <add>, %14, %cst_6 [1] : vector<16x16xf32> to vector<16xf32>
    %16 = vector.shape_cast %15 : vector<16xf32> to vector<16x1xf32>
    %17 = tpu.reciprocal %16 {approx = true} : vector<16x1xf32> -> vector<16x1xf32>
    %18 = vector.broadcast %17 : vector<16x1xf32> to vector<16x16xf32>
    %19 = arith.mulf %14, %18 : vector<16x16xf32>
    %20 = arith.truncf %19 : vector<16x16xf32> to vector<16x16xbf16>
    %cst_7 = arith.constant dense<0.000000e+00> : vector<16x32xf32>
    %21 = tpu.matmul %20, %6, %cst_7 {dimension_numbers = #tpu.dot_dimension_numbers<[1], [0], [0], [1], [0, 0, 1, 1], [], []>} : vector<16x16xbf16>, vector<16x32xbf16>, vector<16x32xf32> -> vector<16x32xf32>
    %22 = vector.extract_strided_slice %1 {offsets = [0, 32], sizes = [16, 32], strides = [1, 1]} : vector<16x384xbf16> to vector<16x32xbf16>
    %23 = vector.extract_strided_slice %1 {offsets = [0, 160], sizes = [16, 32], strides = [1, 1]} : vector<16x384xbf16> to vector<16x32xbf16>
    %24 = vector.extract_strided_slice %1 {offsets = [0, 288], sizes = [16, 32], strides = [1, 1]} : vector<16x384xbf16> to vector<16x32xbf16>
    %cst_8 = arith.constant dense<0.000000e+00> : vector<16x16xf32>
    %25 = tpu.matmul %22, %23, %cst_8 {dimension_numbers = #tpu.dot_dimension_numbers<[1], [1], [0], [0], [0, 0, 1, 0], [], []>} : vector<16x32xbf16>, vector<16x32xbf16>, vector<16x16xf32> -> vector<16x16xf32>
    %26 = vector.broadcast %3 : vector<1x16xf32> to vector<16x16xf32>
    %27 = arith.addf %25, %26 : vector<16x16xf32>
    %cst_9 = arith.constant dense<0xFF800000> : vector<16xf32>
    %28 = vector.multi_reduction <maximumf>, %27, %cst_9 [1] : vector<16x16xf32> to vector<16xf32>
    %29 = vector.shape_cast %28 : vector<16xf32> to vector<16x1xf32>
    %30 = vector.broadcast %29 : vector<16x1xf32> to vector<16x16xf32>
    %31 = arith.subf %27, %30 : vector<16x16xf32>
    %32 = math.exp %31 : vector<16x16xf32>
    %cst_10 = arith.constant dense<0.000000e+00> : vector<16xf32>
    %33 = vector.multi_reduction <add>, %32, %cst_10 [1] : vector<16x16xf32> to vector<16xf32>
    %34 = vector.shape_cast %33 : vector<16xf32> to vector<16x1xf32>
    %35 = tpu.reciprocal %34 {approx = true} : vector<16x1xf32> -> vector<16x1xf32>
    %36 = vector.broadcast %35 : vector<16x1xf32> to vector<16x16xf32>
    %37 = arith.mulf %32, %36 : vector<16x16xf32>
    %38 = arith.truncf %37 : vector<16x16xf32> to vector<16x16xbf16>
    %cst_11 = arith.constant dense<0.000000e+00> : vector<16x32xf32>
    %39 = tpu.matmul %38, %24, %cst_11 {dimension_numbers = #tpu.dot_dimension_numbers<[1], [0], [0], [1], [0, 0, 1, 1], [], []>} : vector<16x16xbf16>, vector<16x32xbf16>, vector<16x32xf32> -> vector<16x32xf32>
    %40 = vector.extract_strided_slice %1 {offsets = [0, 64], sizes = [16, 32], strides = [1, 1]} : vector<16x384xbf16> to vector<16x32xbf16>
    %41 = vector.extract_strided_slice %1 {offsets = [0, 192], sizes = [16, 32], strides = [1, 1]} : vector<16x384xbf16> to vector<16x32xbf16>
    %42 = vector.extract_strided_slice %1 {offsets = [0, 320], sizes = [16, 32], strides = [1, 1]} : vector<16x384xbf16> to vector<16x32xbf16>
    %cst_12 = arith.constant dense<0.000000e+00> : vector<16x16xf32>
    %43 = tpu.matmul %40, %41, %cst_12 {dimension_numbers = #tpu.dot_dimension_numbers<[1], [1], [0], [0], [0, 0, 1, 0], [], []>} : vector<16x32xbf16>, vector<16x32xbf16>, vector<16x16xf32> -> vector<16x16xf32>
    %44 = vector.broadcast %3 : vector<1x16xf32> to vector<16x16xf32>
    %45 = arith.addf %43, %44 : vector<16x16xf32>
    %cst_13 = arith.constant dense<0xFF800000> : vector<16xf32>
    %46 = vector.multi_reduction <maximumf>, %45, %cst_13 [1] : vector<16x16xf32> to vector<16xf32>
    %47 = vector.shape_cast %46 : vector<16xf32> to vector<16x1xf32>
    %48 = vector.broadcast %47 : vector<16x1xf32> to vector<16x16xf32>
    %49 = arith.subf %45, %48 : vector<16x16xf32>
    %50 = math.exp %49 : vector<16x16xf32>
    %cst_14 = arith.constant dense<0.000000e+00> : vector<16xf32>
    %51 = vector.multi_reduction <add>, %50, %cst_14 [1] : vector<16x16xf32> to vector<16xf32>
    %52 = vector.shape_cast %51 : vector<16xf32> to vector<16x1xf32>
    %53 = tpu.reciprocal %52 {approx = true} : vector<16x1xf32> -> vector<16x1xf32>
    %54 = vector.broadcast %53 : vector<16x1xf32> to vector<16x16xf32>
    %55 = arith.mulf %50, %54 : vector<16x16xf32>
    %56 = arith.truncf %55 : vector<16x16xf32> to vector<16x16xbf16>
    %cst_15 = arith.constant dense<0.000000e+00> : vector<16x32xf32>
    %57 = tpu.matmul %56, %42, %cst_15 {dimension_numbers = #tpu.dot_dimension_numbers<[1], [0], [0], [1], [0, 0, 1, 1], [], []>} : vector<16x16xbf16>, vector<16x32xbf16>, vector<16x32xf32> -> vector<16x32xf32>
    %58 = vector.extract_strided_slice %1 {offsets = [0, 96], sizes = [16, 32], strides = [1, 1]} : vector<16x384xbf16> to vector<16x32xbf16>
    %59 = vector.extract_strided_slice %1 {offsets = [0, 224], sizes = [16, 32], strides = [1, 1]} : vector<16x384xbf16> to vector<16x32xbf16>
    %60 = vector.extract_strided_slice %1 {offsets = [0, 352], sizes = [16, 32], strides = [1, 1]} : vector<16x384xbf16> to vector<16x32xbf16>
    %cst_16 = arith.constant dense<0.000000e+00> : vector<16x16xf32>
    %61 = tpu.matmul %58, %59, %cst_16 {dimension_numbers = #tpu.dot_dimension_numbers<[1], [1], [0], [0], [0, 0, 1, 0], [], []>} : vector<16x32xbf16>, vector<16x32xbf16>, vector<16x16xf32> -> vector<16x16xf32>
    %62 = vector.broadcast %3 : vector<1x16xf32> to vector<16x16xf32>
    %63 = arith.addf %61, %62 : vector<16x16xf32>
    %cst_17 = arith.constant dense<0xFF800000> : vector<16xf32>
    %64 = vector.multi_reduction <maximumf>, %63, %cst_17 [1] : vector<16x16xf32> to vector<16xf32>
    %65 = vector.shape_cast %64 : vector<16xf32> to vector<16x1xf32>
    %66 = vector.broadcast %65 : vector<16x1xf32> to vector<16x16xf32>
    %67 = arith.subf %63, %66 : vector<16x16xf32>
    %68 = math.exp %67 : vector<16x16xf32>
    %cst_18 = arith.constant dense<0.000000e+00> : vector<16xf32>
    %69 = vector.multi_reduction <add>, %68, %cst_18 [1] : vector<16x16xf32> to vector<16xf32>
    %70 = vector.shape_cast %69 : vector<16xf32> to vector<16x1xf32>
    %71 = tpu.reciprocal %70 {approx = true} : vector<16x1xf32> -> vector<16x1xf32>
    %72 = vector.broadcast %71 : vector<16x1xf32> to vector<16x16xf32>
    %73 = arith.mulf %68, %72 : vector<16x16xf32>
    %74 = arith.truncf %73 : vector<16x16xf32> to vector<16x16xbf16>
    %cst_19 = arith.constant dense<0.000000e+00> : vector<16x32xf32>
    %75 = tpu.matmul %74, %60, %cst_19 {dimension_numbers = #tpu.dot_dimension_numbers<[1], [0], [0], [1], [0, 0, 1, 1], [], []>} : vector<16x16xbf16>, vector<16x32xbf16>, vector<16x32xf32> -> vector<16x32xf32>
    %76 = tpu.concatenate %21, %39, %57, %75 in 1 : vector<16x32xf32>, vector<16x32xf32>, vector<16x32xf32>, vector<16x32xf32> -> vector<16x128xf32>
    %77 = arith.truncf %76 : vector<16x128xf32> to vector<16x128xbf16>
    %c0_20 = arith.constant 0 : index
    %c0_21 = arith.constant 0 : index
    %c0_22 = arith.constant 0 : index
    %78 = vector.load %arg3[%c0_20, %c0_21, %c0_22] : memref<1x16x128xbf16, #tpu.memory_space<vmem>>, vector<1x16x128xbf16>
    %79 = vector.shape_cast %78 : vector<1x16x128xbf16> to vector<16x128xbf16>
    %80 = vector.shape_cast %77 : vector<16x128xbf16> to vector<1x16x128xbf16>
    tpu.vector_store %arg3[%c0_20, %c0_21, %c0_22], %80 {strides = array<i32>} : memref<1x16x128xbf16, #tpu.memory_space<vmem>>, vector<1x16x128xbf16>,
    return
  }
  func.func @transform_0(%arg0: i32) -> (i32, i32, i32) {
    %c0_i32 = arith.constant 0 : i32
    %c0_i32_0 = arith.constant 0 : i32
    %c0_i32_1 = arith.constant 0 : i32
    return %arg0, %c0_i32, %c0_i32_0 : i32, i32, i32
  }
  func.func @transform_1(%arg0: i32) -> (i32, i32, i32) {
    %c0_i32 = arith.constant 0 : i32
    %c0_i32_0 = arith.constant 0 : i32
    %c0_i32_1 = arith.constant 0 : i32
    return %arg0, %c0_i32, %c0_i32_0 : i32, i32, i32
  }
  func.func @transform_2(%arg0: i32) -> (i32, i32, i32) {
    %c0_i32 = arith.constant 0 : i32
    %c0_i32_0 = arith.constant 0 : i32
    %c0_i32_1 = arith.constant 0 : i32
    return %arg0, %c0_i32, %c0_i32_0 : i32, i32, i32
  }
}

module attributes {stable_mosaic.version = 11 : i64} {
  func.func @kernel(%arg0: i32, %arg1: memref<32x128xbf16, #tpu.memory_space<vmem>>, %arg2: memref<128x256xbf16, #tpu.memory_space<vmem>>, %arg3: memref<1x256xf32, #tpu.memory_space<vmem>>, %arg4: memref<32x256xbf16, #tpu.memory_space<vmem>>) attributes {dimension_semantics = [#tpu.dimension_semantics<parallel>], iteration_bounds = array<i64: 1>, scalar_prefetch = 0 : i64, scratch_operands = 0 : i64, tpu.core_type = #tpu.core_type<tc>, window_params = [{transform_indices = @transform_0, window_bounds = array<i64: 32, 128>}, {pipeline_mode = #tpu.pipeline_mode<synchronous>, transform_indices = @transform_1, window_bounds = array<i64: 128, 256>}, {pipeline_mode = #tpu.pipeline_mode<synchronous>, transform_indices = @transform_2, window_bounds = array<i64: 1, 256>}, {transform_indices = @transform_3, window_bounds = array<i64: 32, 256>}]} {
    %c0 = arith.constant 0 : index
    %c0_0 = arith.constant 0 : index
    %0 = vector.load %arg1[%c0, %c0_0] : memref<32x128xbf16, #tpu.memory_space<vmem>>, vector<32x128xbf16>
    %c0_1 = arith.constant 0 : index
    %c0_2 = arith.constant 0 : index
    %1 = vector.load %arg2[%c0_1, %c0_2] : memref<128x256xbf16, #tpu.memory_space<vmem>>, vector<128x256xbf16>
    %cst = arith.constant dense<0.000000e+00> : vector<32x256xf32>
    %2 = tpu.matmul %0, %1, %cst {dimension_numbers = #tpu.dot_dimension_numbers<[1], [0], [0], [1], [0, 0, 1, 1], [], []>} : vector<32x128xbf16>, vector<128x256xbf16>, vector<32x256xf32> -> vector<32x256xf32>
    %c0_3 = arith.constant 0 : index
    %c0_4 = arith.constant 0 : index
    %3 = vector.load %arg3[%c0_3, %c0_4] : memref<1x256xf32, #tpu.memory_space<vmem>>, vector<1x256xf32>
    %4 = vector.broadcast %3 : vector<1x256xf32> to vector<32x256xf32>
    %5 = arith.addf %2, %4 : vector<32x256xf32>
    %cst_5 = arith.constant 5.000000e-01 : f32
    %6 = vector.broadcast %cst_5 : f32 to vector<32x256xf32>
    %7 = arith.mulf %6, %5 : vector<32x256xf32>
    %8 = arith.mulf %5, %5 : vector<32x256xf32>
    %9 = arith.mulf %8, %5 : vector<32x256xf32>
    %cst_6 = arith.constant 4.471500e-02 : f32
    %10 = vector.broadcast %cst_6 : f32 to vector<32x256xf32>
    %11 = arith.mulf %10, %9 : vector<32x256xf32>
    %12 = arith.addf %5, %11 : vector<32x256xf32>
    %cst_7 = arith.constant 0.797884583 : f32
    %13 = vector.broadcast %cst_7 : f32 to vector<32x256xf32>
    %14 = arith.mulf %13, %12 : vector<32x256xf32>
    %15 = math.tanh %14 : vector<32x256xf32>
    %cst_8 = arith.constant 1.000000e+00 : f32
    %16 = vector.broadcast %cst_8 : f32 to vector<32x256xf32>
    %17 = arith.addf %16, %15 : vector<32x256xf32>
    %18 = arith.mulf %7, %17 : vector<32x256xf32>
    %19 = arith.truncf %18 : vector<32x256xf32> to vector<32x256xbf16>
    %c0_9 = arith.constant 0 : index
    %c0_10 = arith.constant 0 : index
    %20 = vector.load %arg4[%c0_9, %c0_10] : memref<32x256xbf16, #tpu.memory_space<vmem>>, vector<32x256xbf16>
    tpu.vector_store %arg4[%c0_9, %c0_10], %19 {strides = array<i32>} : memref<32x256xbf16, #tpu.memory_space<vmem>>, vector<32x256xbf16>,
    return
  }
  func.func @transform_0(%arg0: i32) -> (i32, i32) {
    %c0_i32 = arith.constant 0 : i32
    %c0_i32_0 = arith.constant 0 : i32
    return %arg0, %c0_i32 : i32, i32
  }
  func.func @transform_1(%arg0: i32) -> (i32, i32) {
    %c0_i32 = arith.constant 0 : i32
    %c0_i32_0 = arith.constant 0 : i32
    %c0_i32_1 = arith.constant 0 : i32
    return %c0_i32, %c0_i32_0 : i32, i32
  }
  func.func @transform_2(%arg0: i32) -> (i32, i32) {
    %c0_i32 = arith.constant 0 : i32
    %c0_i32_0 = arith.constant 0 : i32
    %c0_i32_1 = arith.constant 0 : i32
    return %c0_i32, %c0_i32_0 : i32, i32
  }
  func.func @transform_3(%arg0: i32) -> (i32, i32) {
    %c0_i32 = arith.constant 0 : i32
    %c0_i32_0 = arith.constant 0 : i32
    return %arg0, %c0_i32 : i32, i32
  }
}

module attributes {stable_mosaic.version = 11 : i64} {
  func.func @kernel(%arg0: i32, %arg1: memref<32x128xbf16, #tpu.memory_space<vmem>>, %arg2: memref<128x128xbf16, #tpu.memory_space<vmem>>, %arg3: memref<1x128xf32, #tpu.memory_space<vmem>>, %arg4: memref<32x128xbf16, #tpu.memory_space<vmem>>, %arg5: memref<1x128xf32, #tpu.memory_space<vmem>>, %arg6: memref<1x128xf32, #tpu.memory_space<vmem>>, %arg7: memref<32x128xbf16, #tpu.memory_space<vmem>>) attributes {dimension_semantics = [#tpu.dimension_semantics<parallel>], iteration_bounds = array<i64: 1>, scalar_prefetch = 0 : i64, scratch_operands = 0 : i64, tpu.core_type = #tpu.core_type<tc>, window_params = [{transform_indices = @transform_0, window_bounds = array<i64: 32, 128>}, {pipeline_mode = #tpu.pipeline_mode<synchronous>, transform_indices = @transform_1, window_bounds = array<i64: 128, 128>}, {pipeline_mode = #tpu.pipeline_mode<synchronous>, transform_indices = @transform_2, window_bounds = array<i64: 1, 128>}, {transform_indices = @transform_3, window_bounds = array<i64: 32, 128>}, {pipeline_mode = #tpu.pipeline_mode<synchronous>, transform_indices = @transform_4, window_bounds = array<i64: 1, 128>}, {pipeline_mode = #tpu.pipeline_mode<synchronous>, transform_indices = @transform_5, window_bounds = array<i64: 1, 128>}, {transform_indices = @transform_6, window_bounds = array<i64: 32, 128>}]} {
    %c0 = arith.constant 0 : index
    %c0_0 = arith.constant 0 : index
    %0 = vector.load %arg1[%c0, %c0_0] : memref<32x128xbf16, #tpu.memory_space<vmem>>, vector<32x128xbf16>
    %c0_1 = arith.constant 0 : index
    %c0_2 = arith.constant 0 : index
    %1 = vector.load %arg2[%c0_1, %c0_2] : memref<128x128xbf16, #tpu.memory_space<vmem>>, vector<128x128xbf16>
    %cst = arith.constant dense<0.000000e+00> : vector<32x128xf32>
    %2 = tpu.matmul %0, %1, %cst {dimension_numbers = #tpu.dot_dimension_numbers<[1], [0], [0], [1], [0, 0, 1, 1], [], []>} : vector<32x128xbf16>, vector<128x128xbf16>, vector<32x128xf32> -> vector<32x128xf32>
    %c0_3 = arith.constant 0 : index
    %c0_4 = arith.constant 0 : index
    %3 = vector.load %arg3[%c0_3, %c0_4] : memref<1x128xf32, #tpu.memory_space<vmem>>, vector<1x128xf32>
    %4 = vector.broadcast %3 : vector<1x128xf32> to vector<32x128xf32>
    %5 = arith.addf %2, %4 : vector<32x128xf32>
    %c0_5 = arith.constant 0 : index
    %c0_6 = arith.constant 0 : index
    %6 = vector.load %arg4[%c0_5, %c0_6] : memref<32x128xbf16, #tpu.memory_space<vmem>>, vector<32x128xbf16>
    %7 = arith.extf %6 : vector<32x128xbf16> to vector<32x128xf32>
    %8 = arith.addf %5, %7 : vector<32x128xf32>
    %cst_7 = arith.constant dense<0.000000e+00> : vector<32xf32>
    %9 = vector.multi_reduction <add>, %8, %cst_7 [1] : vector<32x128xf32> to vector<32xf32>
    %10 = vector.shape_cast %9 : vector<32xf32> to vector<32x1xf32>
    %cst_8 = arith.constant 1.280000e+02 : f32
    %11 = vector.broadcast %cst_8 : f32 to vector<32x1xf32>
    %12 = arith.divf %10, %11 : vector<32x1xf32>
    %13 = arith.mulf %8, %8 : vector<32x128xf32>
    %cst_9 = arith.constant dense<0.000000e+00> : vector<32xf32>
    %14 = vector.multi_reduction <add>, %13, %cst_9 [1] : vector<32x128xf32> to vector<32xf32>
    %15 = vector.shape_cast %14 : vector<32xf32> to vector<32x1xf32>
    %cst_10 = arith.constant 1.280000e+02 : f32
    %16 = vector.broadcast %cst_10 : f32 to vector<32x1xf32>
    %17 = arith.divf %15, %16 : vector<32x1xf32>
    %18 = arith.mulf %12, %12 : vector<32x1xf32>
    %19 = arith.subf %17, %18 : vector<32x1xf32>
    %cst_11 = arith.constant 0.000000e+00 : f32
    %20 = vector.broadcast %cst_11 : f32 to vector<32x1xf32>
    %21 = arith.maximumf %19, %20 : vector<32x1xf32>
    %22 = vector.broadcast %12 : vector<32x1xf32> to vector<32x128xf32>
    %23 = arith.subf %8, %22 : vector<32x128xf32>
    %cst_12 = arith.constant 9.99999996E-13 : f32
    %24 = vector.broadcast %cst_12 : f32 to vector<32x1xf32>
    %25 = arith.addf %21, %24 : vector<32x1xf32>
    %26 = math.rsqrt %25 : vector<32x1xf32>
    %27 = vector.broadcast %26 : vector<32x1xf32> to vector<32x128xf32>
    %28 = arith.mulf %23, %27 : vector<32x128xf32>
    %c0_13 = arith.constant 0 : index
    %c0_14 = arith.constant 0 : index
    %29 = vector.load %arg5[%c0_13, %c0_14] : memref<1x128xf32, #tpu.memory_space<vmem>>, vector<1x128xf32>
    %30 = vector.broadcast %29 : vector<1x128xf32> to vector<32x128xf32>
    %31 = arith.mulf %28, %30 : vector<32x128xf32>
    %c0_15 = arith.constant 0 : index
    %c0_16 = arith.constant 0 : index
    %32 = vector.load %arg6[%c0_15, %c0_16] : memref<1x128xf32, #tpu.memory_space<vmem>>, vector<1x128xf32>
    %33 = vector.broadcast %32 : vector<1x128xf32> to vector<32x128xf32>
    %34 = arith.addf %31, %33 : vector<32x128xf32>
    %35 = arith.truncf %34 : vector<32x128xf32> to vector<32x128xbf16>
    %c0_17 = arith.constant 0 : index
    %c0_18 = arith.constant 0 : index
    %36 = vector.load %arg7[%c0_17, %c0_18] : memref<32x128xbf16, #tpu.memory_space<vmem>>, vector<32x128xbf16>
    tpu.vector_store %arg7[%c0_17, %c0_18], %35 {strides = array<i32>} : memref<32x128xbf16, #tpu.memory_space<vmem>>, vector<32x128xbf16>,
    return
  }
  func.func @transform_0(%arg0: i32) -> (i32, i32) {
    %c0_i32 = arith.constant 0 : i32
    %c0_i32_0 = arith.constant 0 : i32
    return %arg0, %c0_i32 : i32, i32
  }
  func.func @transform_1(%arg0: i32) -> (i32, i32) {
    %c0_i32 = arith.constant 0 : i32
    %c0_i32_0 = arith.constant 0 : i32
    %c0_i32_1 = arith.constant 0 : i32
    return %c0_i32, %c0_i32_0 : i32, i32
  }
  func.func @transform_2(%arg0: i32) -> (i32, i32) {
    %c0_i32 = arith.constant 0 : i32
    %c0_i32_0 = arith.constant 0 : i32
    %c0_i32_1 = arith.constant 0 : i32
    return %c0_i32, %c0_i32_0 : i32, i32
  }
  func.func @transform_3(%arg0: i32) -> (i32, i32) {
    %c0_i32 = arith.constant 0 : i32
    %c0_i32_0 = arith.constant 0 : i32
    return %arg0, %c0_i32 : i32, i32
  }
  func.func @transform_4(%arg0: i32) -> (i32, i32) {
    %c0_i32 = arith.constant 0 : i32
    %c0_i32_0 = arith.constant 0 : i32
    %c0_i32_1 = arith.constant 0 : i32
    return %c0_i32, %c0_i32_0 : i32, i32
  }
  func.func @transform_5(%arg0: i32) -> (i32, i32) {
    %c0_i32 = arith.constant 0 : i32
    %c0_i32_0 = arith.constant 0 : i32
    %c0_i32_1 = arith.constant 0 : i32
    return %c0_i32, %c0_i32_0 : i32, i32
  }
  func.func @transform_6(%arg0: i32) -> (i32, i32) {
    %c0_i32 = arith.constant 0 : i32
    %c0_i32_0 = arith.constant 0 : i32
    return %arg0, %c0_i32 : i32, i32
  }
}

module attributes {stable_mosaic.version = 11 : i64} {
  func.func @kernel(%arg0: i32, %arg1: memref<32x256xbf16, #tpu.memory_space<vmem>>, %arg2: memref<256x128xbf16, #tpu.memory_space<vmem>>, %arg3: memref<1x128xf32, #tpu.memory_space<vmem>>, %arg4: memref<32x128xbf16, #tpu.memory_space<vmem>>, %arg5: memref<1x128xf32, #tpu.memory_space<vmem>>, %arg6: memref<1x128xf32, #tpu.memory_space<vmem>>, %arg7: memref<32x128xbf16, #tpu.memory_space<vmem>>) attributes {dimension_semantics = [#tpu.dimension_semantics<parallel>], iteration_bounds = array<i64: 1>, scalar_prefetch = 0 : i64, scratch_operands = 0 : i64, tpu.core_type = #tpu.core_type<tc>, window_params = [{transform_indices = @transform_0, window_bounds = array<i64: 32, 256>}, {pipeline_mode = #tpu.pipeline_mode<synchronous>, transform_indices = @transform_1, window_bounds = array<i64: 256, 128>}, {pipeline_mode = #tpu.pipeline_mode<synchronous>, transform_indices = @transform_2, window_bounds = array<i64: 1, 128>}, {transform_indices = @transform_3, window_bounds = array<i64: 32, 128>}, {pipeline_mode = #tpu.pipeline_mode<synchronous>, transform_indices = @transform_4, window_bounds = array<i64: 1, 128>}, {pipeline_mode = #tpu.pipeline_mode<synchronous>, transform_indices = @transform_5, window_bounds = array<i64: 1, 128>}, {transform_indices = @transform_6, window_bounds = array<i64: 32, 128>}]} {
    %c0 = arith.constant 0 : index
    %c0_0 = arith.constant 0 : index
    %0 = vector.load %arg1[%c0, %c0_0] : memref<32x256xbf16, #tpu.memory_space<vmem>>, vector<32x256xbf16>
    %c0_1 = arith.constant 0 : index
    %c0_2 = arith.constant 0 : index
    %1 = vector.load %arg2[%c0_1, %c0_2] : memref<256x128xbf16, #tpu.memory_space<vmem>>, vector<256x128xbf16>
    %cst = arith.constant dense<0.000000e+00> : vector<32x128xf32>
    %2 = tpu.matmul %0, %1, %cst {dimension_numbers = #tpu.dot_dimension_numbers<[1], [0], [0], [1], [0, 0, 1, 1], [], []>} : vector<32x256xbf16>, vector<256x128xbf16>, vector<32x128xf32> -> vector<32x128xf32>
    %c0_3 = arith.constant 0 : index
    %c0_4 = arith.constant 0 : index
    %3 = vector.load %arg3[%c0_3, %c0_4] : memref<1x128xf32, #tpu.memory_space<vmem>>, vector<1x128xf32>
    %4 = vector.broadcast %3 : vector<1x128xf32> to vector<32x128xf32>
    %5 = arith.addf %2, %4 : vector<32x128xf32>
    %c0_5 = arith.constant 0 : index
    %c0_6 = arith.constant 0 : index
    %6 = vector.load %arg4[%c0_5, %c0_6] : memref<32x128xbf16, #tpu.memory_space<vmem>>, vector<32x128xbf16>
    %7 = arith.extf %6 : vector<32x128xbf16> to vector<32x128xf32>
    %8 = arith.addf %5, %7 : vector<32x128xf32>
    %cst_7 = arith.constant dense<0.000000e+00> : vector<32xf32>
    %9 = vector.multi_reduction <add>, %8, %cst_7 [1] : vector<32x128xf32> to vector<32xf32>
    %10 = vector.shape_cast %9 : vector<32xf32> to vector<32x1xf32>
    %cst_8 = arith.constant 1.280000e+02 : f32
    %11 = vector.broadcast %cst_8 : f32 to vector<32x1xf32>
    %12 = arith.divf %10, %11 : vector<32x1xf32>
    %13 = arith.mulf %8, %8 : vector<32x128xf32>
    %cst_9 = arith.constant dense<0.000000e+00> : vector<32xf32>
    %14 = vector.multi_reduction <add>, %13, %cst_9 [1] : vector<32x128xf32> to vector<32xf32>
    %15 = vector.shape_cast %14 : vector<32xf32> to vector<32x1xf32>
    %cst_10 = arith.constant 1.280000e+02 : f32
    %16 = vector.broadcast %cst_10 : f32 to vector<32x1xf32>
    %17 = arith.divf %15, %16 : vector<32x1xf32>
    %18 = arith.mulf %12, %12 : vector<32x1xf32>
    %19 = arith.subf %17, %18 : vector<32x1xf32>
    %cst_11 = arith.constant 0.000000e+00 : f32
    %20 = vector.broadcast %cst_11 : f32 to vector<32x1xf32>
    %21 = arith.maximumf %19, %20 : vector<32x1xf32>
    %22 = vector.broadcast %12 : vector<32x1xf32> to vector<32x128xf32>
    %23 = arith.subf %8, %22 : vector<32x128xf32>
    %cst_12 = arith.constant 9.99999996E-13 : f32
    %24 = vector.broadcast %cst_12 : f32 to vector<32x1xf32>
    %25 = arith.addf %21, %24 : vector<32x1xf32>
    %26 = math.rsqrt %25 : vector<32x1xf32>
    %27 = vector.broadcast %26 : vector<32x1xf32> to vector<32x128xf32>
    %28 = arith.mulf %23, %27 : vector<32x128xf32>
    %c0_13 = arith.constant 0 : index
    %c0_14 = arith.constant 0 : index
    %29 = vector.load %arg5[%c0_13, %c0_14] : memref<1x128xf32, #tpu.memory_space<vmem>>, vector<1x128xf32>
    %30 = vector.broadcast %29 : vector<1x128xf32> to vector<32x128xf32>
    %31 = arith.mulf %28, %30 : vector<32x128xf32>
    %c0_15 = arith.constant 0 : index
    %c0_16 = arith.constant 0 : index
    %32 = vector.load %arg6[%c0_15, %c0_16] : memref<1x128xf32, #tpu.memory_space<vmem>>, vector<1x128xf32>
    %33 = vector.broadcast %32 : vector<1x128xf32> to vector<32x128xf32>
    %34 = arith.addf %31, %33 : vector<32x128xf32>
    %35 = arith.truncf %34 : vector<32x128xf32> to vector<32x128xbf16>
    %c0_17 = arith.constant 0 : index
    %c0_18 = arith.constant 0 : index
    %36 = vector.load %arg7[%c0_17, %c0_18] : memref<32x128xbf16, #tpu.memory_space<vmem>>, vector<32x128xbf16>
    tpu.vector_store %arg7[%c0_17, %c0_18], %35 {strides = array<i32>} : memref<32x128xbf16, #tpu.memory_space<vmem>>, vector<32x128xbf16>,
    return
  }
  func.func @transform_0(%arg0: i32) -> (i32, i32) {
    %c0_i32 = arith.constant 0 : i32
    %c0_i32_0 = arith.constant 0 : i32
    return %arg0, %c0_i32 : i32, i32
  }
  func.func @transform_1(%arg0: i32) -> (i32, i32) {
    %c0_i32 = arith.constant 0 : i32
    %c0_i32_0 = arith.constant 0 : i32
    %c0_i32_1 = arith.constant 0 : i32
    return %c0_i32, %c0_i32_0 : i32, i32
  }
  func.func @transform_2(%arg0: i32) -> (i32, i32) {
    %c0_i32 = arith.constant 0 : i32
    %c0_i32_0 = arith.constant 0 : i32
    %c0_i32_1 = arith.constant 0 : i32
    return %c0_i32, %c0_i32_0 : i32, i32
  }
  func.func @transform_3(%arg0: i32) -> (i32, i32) {
    %c0_i32 = arith.constant 0 : i32
    %c0_i32_0 = arith.constant 0 : i32
    return %arg0, %c0_i32 : i32, i32
  }
  func.func @transform_4(%arg0: i32) -> (i32, i32) {
    %c0_i32 = arith.constant 0 : i32
    %c0_i32_0 = arith.constant 0 : i32
    %c0_i32_1 = arith.constant 0 : i32
    return %c0_i32, %c0_i32_0 : i32, i32
  }
  func.func @transform_5(%arg0: i32) -> (i32, i32) {
    %c0_i32 = arith.constant 0 : i32
    %c0_i32_0 = arith.constant 0 : i32
    %c0_i32_1 = arith.constant 0 : i32
    return %c0_i32, %c0_i32_0 : i32, i32
  }
  func.func @transform_6(%arg0: i32) -> (i32, i32) {
    %c0_i32 = arith.constant 0 : i32
    %c0_i32_0 = arith.constant 0 : i32
    return %arg0, %c0_i32 : i32, i32
  }
}

module attributes {stable_mosaic.version = 11 : i64} {
  func.func @kernel(%arg0: i32, %arg1: memref<32x128xbf16, #tpu.memory_space<vmem>>, %arg2: memref<128x128xbf16, #tpu.memory_space<vmem>>, %arg3: memref<1x128xf32, #tpu.memory_space<vmem>>, %arg4: memref<32x128xbf16, #tpu.memory_space<vmem>>) attributes {dimension_semantics = [#tpu.dimension_semantics<parallel>], iteration_bounds = array<i64: 1>, scalar_prefetch = 0 : i64, scratch_operands = 0 : i64, tpu.core_type = #tpu.core_type<tc>, window_params = [{transform_indices = @transform_0, window_bounds = array<i64: 32, 128>}, {pipeline_mode = #tpu.pipeline_mode<synchronous>, transform_indices = @transform_1, window_bounds = array<i64: 128, 128>}, {pipeline_mode = #tpu.pipeline_mode<synchronous>, transform_indices = @transform_2, window_bounds = array<i64: 1, 128>}, {transform_indices = @transform_3, window_bounds = array<i64: 32, 128>}]} {
    %c0 = arith.constant 0 : index
    %c0_0 = arith.constant 0 : index
    %0 = vector.load %arg1[%c0, %c0_0] : memref<32x128xbf16, #tpu.memory_space<vmem>>, vector<32x128xbf16>
    %c0_1 = arith.constant 0 : index
    %c0_2 = arith.constant 0 : index
    %1 = vector.load %arg2[%c0_1, %c0_2] : memref<128x128xbf16, #tpu.memory_space<vmem>>, vector<128x128xbf16>
    %cst = arith.constant dense<0.000000e+00> : vector<32x128xf32>
    %2 = tpu.matmul %0, %1, %cst {dimension_numbers = #tpu.dot_dimension_numbers<[1], [0], [0], [1], [0, 0, 1, 1], [], []>} : vector<32x128xbf16>, vector<128x128xbf16>, vector<32x128xf32> -> vector<32x128xf32>
    %c0_3 = arith.constant 0 : index
    %c0_4 = arith.constant 0 : index
    %3 = vector.load %arg3[%c0_3, %c0_4] : memref<1x128xf32, #tpu.memory_space<vmem>>, vector<1x128xf32>
    %4 = vector.broadcast %3 : vector<1x128xf32> to vector<32x128xf32>
    %5 = arith.addf %2, %4 : vector<32x128xf32>
    %6 = math.tanh %5 : vector<32x128xf32>
    %7 = arith.truncf %6 : vector<32x128xf32> to vector<32x128xbf16>
    %c0_5 = arith.constant 0 : index
    %c0_6 = arith.constant 0 : index
    %8 = vector.load %arg4[%c0_5, %c0_6] : memref<32x128xbf16, #tpu.memory_space<vmem>>, vector<32x128xbf16>
    tpu.vector_store %arg4[%c0_5, %c0_6], %7 {strides = array<i32>} : memref<32x128xbf16, #tpu.memory_space<vmem>>, vector<32x128xbf16>,
    return
  }
  func.func @transform_0(%arg0: i32) -> (i32, i32) {
    %c0_i32 = arith.constant 0 : i32
    %c0_i32_0 = arith.constant 0 : i32
    return %arg0, %c0_i32 : i32, i32
  }
  func.func @transform_1(%arg0: i32) -> (i32, i32) {
    %c0_i32 = arith.constant 0 : i32
    %c0_i32_0 = arith.constant 0 : i32
    %c0_i32_1 = arith.constant 0 : i32
    return %c0_i32, %c0_i32_0 : i32, i32
  }
  func.func @transform_2(%arg0: i32) -> (i32, i32) {
    %c0_i32 = arith.constant 0 : i32
    %c0_i32_0 = arith.constant 0 : i32
    %c0_i32_1 = arith.constant 0 : i32
    return %c0_i32, %c0_i32_0 : i32, i32
  }
  func.func @transform_3(%arg0: i32) -> (i32, i32) {
    %c0_i32 = arith.constant 0 : i32
    %c0_i32_0 = arith.constant 0 : i32
    return %arg0, %c0_i32 : i32, i32
  }
}

</mosaic_0001>

<bundles_post_ra>
// kernel: vdnet_forward.14
= control target key start
LH: loop header
LB: loop body
LE: loop exit
PB: predicated region body
PF: predicated region fallthrough
CT: control target
= control target key end

     0   :  { %8 = vsyncpa [#allocation3], 0  ;;  %s414_s0 = inlined_call_operand.hbm [shape: bf16[32,128], index: 0, kind: input, shape index: {}]   ;;  %s415_s1 = inlined_call_operand.hbm [shape: f32[1,128], index: 1, kind: input, shape index: {}]   ;;  %s416_s2 = inlined_call_operand.hbm [shape: f32[1,128], index: 2, kind: input, shape index: {}]   ;;  %s417_s3 = inlined_call_operand.hbm [shape: bf16[32,128], index: 3, kind: output, shape index: {}]  }
   0x1   :  { %9 = vsyncpa [#allocation6], 0 }
   0x2   :  { %10 = vsyncpa [#allocation4], 0  ;;  %s315_s12 = smov [#allocation5]   ;;  %s316_s14 = smov [#allocation2]  }
   0x3   :  { %s29_s13 = sshll.u32 %s315_s12, 4  ;;  %s16_s15 = sshll.u32 %s316_s14, 4  ;;  %s30_s13 = int_to_ptr.vmem [resolvable:$true] %s29_s13  ;;  %s341_s15 = int_to_ptr.vmem [resolvable:$true] %s16_s15 }
   0x4   :  { %s221_s18 = scalar_lea.hbm %s415_s1, 16 }
   0x5   :  { %p222_p0 = scmp.ne.s32.totalorder %s415_s1, %s221_s18  ;;  %p225_p1 = scmp.lt.u32.totalorder %s221_s18, %s415_s1 }
   0x7   :  { %p227_p2 = pnand %p225_p1, %p222_p0 }
   0x9   :  { %230 = shalt.err (!%p227_p2)
}
   0xa   :  { %s231_s23 = scalar_lea.vmem %s30_s13, 16  ;;  %s235_s24 = scalar_lea.vmem %s30_s13, 32 }
   0xb   :  { %p232_p3 = scmp.ne.s32.totalorder %s30_s13, %s231_s23  ;;  %p236_p4 = scmp.lt.s32.totalorder %s30_s13, %s30_s13 }
   0xc   :  { %p237_p5 = scmp.lt.s32.totalorder %s235_s24, %s231_s23 }
   0xe   :  { %p238_p6 = por %p237_p5, %p236_p4 }
  0x10   :  { %p239_p7 = pnand %p238_p6, %p232_p3 }
  0x12   :  { %242 = shalt.err (!%p239_p7)
}
  0x13   :  { %32 = dma.hbm_to_vmem [thread:$0]  %s415_s1, 16, %s30_s13, [#allocation6]  }
  0x14   :  { %s243_s29 = scalar_lea.hbm %s414_s0, 256 }
  0x15   :  { %p244_p8 = scmp.ne.s32.totalorder %s414_s0, %s243_s29  ;;  %p247_p9 = scmp.lt.u32.totalorder %s243_s29, %s414_s0 }
  0x17   :  { %p249_p10 = pnand %p247_p9, %p244_p8 }
  0x19   :  { %252 = shalt.err (!%p249_p10)
}
  0x1a   :  { %s253_s7 = scalar_lea.vmem %s341_s15, 256  ;;  %p258_p12 = scmp.lt.s32.totalorder %s341_s15, %s341_s15 }
  0x1b   :  { %p254_p11 = scmp.ne.s32.totalorder %s341_s15, %s253_s7  ;;  %p259_p13 = scmp.lt.s32.totalorder %s253_s7, %s253_s7 }
  0x1d   :  { %p260_p0 = por %p259_p13, %p258_p12 }
  0x1f   :  { %p261_p1 = pnand %p260_p0, %p254_p11 }
  0x21   :  { %264 = shalt.err (!%p261_p1)
}
  0x22   :  { %s317_s1 = smov 64   ;;  %s318_s8 = smov 4  }
  0x23   :  { %22 = dma.hbm_to_vmem [thread:$0]  %s414_s0, 256, %s341_s15, [#allocation3], %s317_s1, %s317_s1, %s318_s8  }
  0x24   :  { %s319_s11 = smov [#allocation7]   ;;  %s265_s16 = scalar_lea.hbm %s416_s2, 16 }
  0x25   :  { %s39_s12 = sshll.u32 %s319_s11, 4  ;;  %p266_p2 = scmp.ne.s32.totalorder %s416_s2, %s265_s16  ;;  %s40_s12 = int_to_ptr.vmem [resolvable:$true] %s39_s12 }
  0x26   :  { %p269_p3 = scmp.lt.u32.totalorder %s265_s16, %s416_s2 }
  0x28   :  { %p271_p4 = pnand %p269_p3, %p266_p2 }
  0x2a   :  { %274 = shalt.err (!%p271_p4)
}
  0x2b   :  { %s275_s21 = scalar_lea.vmem %s40_s12, 16  ;;  %s279_s0 = scalar_lea.vmem %s40_s12, 32 }
  0x2c   :  { %p276_p5 = scmp.ne.s32.totalorder %s40_s12, %s275_s21  ;;  %p280_p6 = scmp.lt.s32.totalorder %s40_s12, %s40_s12 }
  0x2d   :  { %p281_p7 = scmp.lt.s32.totalorder %s279_s0, %s275_s21 }
  0x2f   :  { %p282_p8 = por %p281_p7, %p280_p6 }
  0x31   :  { %p283_p9 = pnand %p282_p8, %p276_p5 }
  0x33   :  { %286 = shalt.err (!%p283_p9)
}
  0x34   :  { %42 = dma.hbm_to_vmem [thread:$0]  %s416_s2, 16, %s40_s12, [#allocation6]  }
  0x35   :  { %309 = dma.done.wait [#allocation3], 256  }
  0x36   :  { %310 = vsyncadd [#allocation3], 4294967040 }
  0x37   :  { %311 = dma.done.wait [#allocation6], 32  }
  0x38   :  { %312 = vsyncadd [#allocation6], 4294967264  ;;  %v205_v0 = vld [vmem:[#allocation2 + $0x8] sm:$0xff]   ;;  %v188_v1 = vld [vmem:[#allocation2] sm:$0xff]   ;;  %s320_s2 = smov [#allocation8]  }
  0x39   :  { %v387_v2 = vunpack.c.l.bf16 %v205_v0  ;;  %v189_v3 = vunpack.c.l.bf16 %v188_v1  ;;  %v390_v4 = vunpack.c.h.bf16 %v205_v0  ;;  %v190_v5 = vunpack.c.h.bf16 %v188_v1  ;;  %v177_v45 = vld [vmem:[#allocation5] ss:$0 sm:$0xff]  ;;  %v178_v49 = vld [vmem:[#allocation7] ss:$0 sm:$0xff]  ;;  %s164_s23 = sshll.u32 %s320_s2, 4  ;;  %s165_s23 = int_to_ptr.vmem [resolvable:$true] %s164_s23 }
  0x3a   :  { %s287_s24 = scalar_lea.vmem %s165_s23, 256  ;;  %p292_p11 = scmp.lt.s32.totalorder %s165_s23, %s165_s23 }
  0x3b   :  { %64 = vadd.xlane.f32.xlu1 %v387_v2  ;;  %60 = vadd.xlane.f32.xlu0 %v189_v3  ;;  %v74_v6 = vmul.f32 %v190_v5, %v190_v5  ;;  %v73_v7 = vmul.f32 %v189_v3, %v189_v3  ;;  %v76_v8 = vmul.f32 %v390_v4, %v390_v4  ;;  %p288_p10 = scmp.ne.s32.totalorder %s165_s23, %s287_s24  ;;  %p293_p12 = scmp.lt.s32.totalorder %s287_s24, %s287_s24 }
  0x3c   :  { %v75_v9 = vmul.f32 %v387_v2, %v387_v2 }
  0x3d   :  { %p294_p13 = por %p293_p12, %p292_p11 }
  0x3f   :  { %66 = vadd.xlane.f32.xlu1 %v390_v4  ;;  %62 = vadd.xlane.f32.xlu0 %v190_v5  ;;  %p295_p0 = pnand %p294_p13, %p288_p10 }
  0x43   :  { %79 = vadd.xlane.f32.xlu1 %v74_v6  ;;  %77 = vadd.xlane.f32.xlu0 %v73_v7 }
  0x47   :  { %83 = vadd.xlane.f32.xlu1 %v76_v8  ;;  %81 = vadd.xlane.f32.xlu0 %v75_v9 }
  0xc8   :  { %v65_v10 = vpop.xlane.xlu1 %64  ;;  %v61_v11 = vpop.xlane.xlu0 %60 }
  0xc9   :  { %v69_v14 = vmul.f32 0.0078125, %v61_v11  ;;  %v71_v16 = vmul.f32 0.0078125, %v65_v10 }
  0xcb   :  { %v89_v20 = vmul.f32 %v69_v14, %v69_v14  ;;  %v91_v26 = vmul.f32 %v71_v16, %v71_v16  ;;  %v101_v44 = vsub.f32 %v189_v3, %v69_v14  ;;  %v103_v53 = vsub.f32 %v387_v2, %v71_v16 }
  0xcc   :  { %v67_v12 = vpop.xlane.xlu1 %66  ;;  %v63_v13 = vpop.xlane.xlu0 %62 }
  0xcd   :  { %v70_v15 = vmul.f32 0.0078125, %v63_v13  ;;  %v72_v17 = vmul.f32 0.0078125, %v67_v12 }
  0xcf   :  { %v90_v21 = vmul.f32 %v70_v15, %v70_v15  ;;  %v92_v27 = vmul.f32 %v72_v17, %v72_v17  ;;  %v102_v42 = vsub.f32 %v190_v5, %v70_v15  ;;  %v104_v50 = vsub.f32 %v390_v4, %v72_v17 }
  0xd0   :  { %v80_v18 = vpop.xlane.xlu1 %79  ;;  %v78_v19 = vpop.xlane.xlu0 %77 }
  0xd1   :  { %v86_v22 = vmul.f32 0.0078125, %v80_v18  ;;  %v85_v23 = vmul.f32 0.0078125, %v78_v19 }
  0xd3   :  { %v94_v24 = vsub.f32 %v86_v22, %v90_v21  ;;  %v93_v25 = vsub.f32 %v85_v23, %v89_v20 }
  0xd4   :  { %v84_v28 = vpop.xlane.xlu1 %83  ;;  %v82_v29 = vpop.xlane.xlu0 %81 }
  0xd5   :  { %v98_v30 = vmax.f32 %v94_v24, 0.0  ;;  %v97_v31 = vmax.f32 %v93_v25, 0.0  ;;  %v88_v32 = vmul.f32 0.0078125, %v84_v28  ;;  %v87_v33 = vmul.f32 0.0078125, %v82_v29 }
  0xd7   :  { %v106_v34 = vadd.f32 1e-12, %v98_v30  ;;  %v105_v35 = vadd.f32 1e-12, %v97_v31  ;;  %v96_v36 = vsub.f32 %v88_v32, %v92_v27  ;;  %v95_v37 = vsub.f32 %v87_v33, %v91_v26 }
  0xd9   :  { %213 = vrsqrt.f32 %v106_v34  ;;  %v100_v38 = vmax.f32 %v96_v36, 0.0  ;;  %v99_v39 = vmax.f32 %v95_v37, 0.0 }
  0xda   :  { %215 = vrsqrt.f32 %v105_v35 }
  0xdb   :  { %v108_v40 = vadd.f32 1e-12, %v100_v38  ;;  %v107_v41 = vadd.f32 1e-12, %v99_v39 }
  0xdd   :  { %217 = vrsqrt.f32 %v108_v40 }
  0xde   :  { %219 = vrsqrt.f32 %v107_v41 }
  0xe3   :  { %v214_v43 = vpop.eup %213 }
  0xe4   :  { %v216_v46 = vpop.eup %215  ;;  %v114_v47 = vmul.f32 %v214_v43, %v102_v42 }
  0xe5   :  { %v113_v48 = vmul.f32 %v216_v46, %v101_v44 }
  0xe6   :  { %v125_v51 = vmul.f32 %v177_v45, %v114_v47 }
  0xe7   :  { %v218_v52 = vpop.eup %217  ;;  %v124_v54 = vmul.f32 %v177_v45, %v113_v48 }
  0xe8   :  { %v220_v55 = vpop.eup %219  ;;  %v116_v56 = vmul.f32 %v218_v52, %v104_v50  ;;  %v136_v57 = vadd.f32 %v178_v49, %v125_v51 }
  0xe9   :  { %v115_v58 = vmul.f32 %v220_v55, %v103_v53  ;;  %v135_v59 = vadd.f32 %v178_v49, %v124_v54 }
  0xea   :  { %v127_v60 = vmul.f32 %v177_v45, %v116_v56 }
  0xeb   :  { %v126_v61 = vmul.f32 %v177_v45, %v115_v58  ;;  %v198_v62 = vpack.c.bf16 %v136_v57, %v135_v59 }
  0xec   :  { %v138_v63 = vadd.f32 %v178_v49, %v127_v60 }
  0xed   :  { %v137_v0 = vadd.f32 %v178_v49, %v126_v61  ;;  %199 = vst [vmem:[#allocation8] sm:$0xff] %v198_v62  }
  0xef   :  { %v203_v1 = vpack.c.bf16 %v138_v63, %v137_v0 }
  0xf1   :  { %206 = vst [vmem:[#allocation8 + $0x8] sm:$0xff] %v203_v1  }
  0xf2   :  { %298 = shalt.err (!%p295_p0)
}
  0xf3   :  { %s299_s27 = scalar_lea.hbm %s417_s3, 256 }
  0xf4   :  { %p300_p1 = scmp.ne.s32.totalorder %s417_s3, %s299_s27  ;;  %p303_p2 = scmp.lt.u32.totalorder %s299_s27, %s417_s3 }
  0xf6   :  { %p305_p3 = pnand %p303_p2, %p300_p1 }
  0xf8   :  { %308 = shalt.err (!%p305_p3)
}
  0xf9   :  { %170 = dma.vmem_to_hbm [thread:$0]  %s165_s23, 256, %s417_s3, [#allocation4], %s317_s1, %s317_s1, %s318_s8  }
  0xfa   :  { %313 = dma.done.wait [#allocation4], 256  }
  0xfb   :  { %314 = vsyncadd [#allocation4], 4294967040 }
  0xfc   :  { %174 = vsyncpa [#allocation3], 1 }
  0xfd   :  { %175 = vsyncpa [#allocation6], 1 }
  0xfe   :  { %176 = vsyncpa [#allocation4], 1 }

// kernel: vdnet_forward.13
= control target key start
LH: loop header
LB: loop body
LE: loop exit
PB: predicated region body
PF: predicated region fallthrough
CT: control target
= control target key end

     0   :  { %8 = vsyncpa [#allocation3], 0  ;;  %s454_s0 = inlined_call_operand.hbm [shape: bf16[16,128], index: 0, kind: input, shape index: {}]   ;;  %s455_s1 = inlined_call_operand.hbm [shape: bf16[128,128], index: 1, kind: input, shape index: {}]   ;;  %s456_s2 = inlined_call_operand.hbm [shape: f32[1,128], index: 2, kind: input, shape index: {}]   ;;  %s457_s3 = inlined_call_operand.hbm [shape: bf16[16,128], index: 3, kind: output, shape index: {}]  }
   0x1   :  { %9 = vsyncpa [#allocation6], 0 }
   0x2   :  { %10 = vsyncpa [#allocation4], 0  ;;  %s362_s12 = smov [#allocation5]   ;;  %s363_s14 = smov [#allocation2]  }
   0x3   :  { %s28_s13 = sshll.u32 %s362_s12, 4  ;;  %s16_s15 = sshll.u32 %s363_s14, 4  ;;  %s29_s13 = int_to_ptr.vmem [resolvable:$true] %s28_s13  ;;  %s390_s15 = int_to_ptr.vmem [resolvable:$true] %s16_s15 }
   0x4   :  { %s268_s18 = scalar_lea.hbm %s455_s1, 1024 }
   0x5   :  { %p269_p0 = scmp.ne.s32.totalorder %s455_s1, %s268_s18  ;;  %p272_p1 = scmp.lt.u32.totalorder %s268_s18, %s455_s1 }
   0x7   :  { %p274_p2 = pnand %p272_p1, %p269_p0 }
   0x9   :  { %277 = shalt.err (!%p274_p2)
}
   0xa   :  { %s278_s23 = scalar_lea.vmem %s29_s13, 1024  ;;  %p283_p4 = scmp.lt.s32.totalorder %s29_s13, %s29_s13 }
   0xb   :  { %p279_p3 = scmp.ne.s32.totalorder %s29_s13, %s278_s23  ;;  %p284_p5 = scmp.lt.s32.totalorder %s278_s23, %s278_s23 }
   0xd   :  { %p285_p6 = por %p284_p5, %p283_p4 }
   0xf   :  { %p286_p7 = pnand %p285_p6, %p279_p3 }
  0x11   :  { %289 = shalt.err (!%p286_p7)
}
  0x12   :  { %s364_s24 = smov 64   ;;  %s365_s25 = smov 4  }
  0x13   :  { %34 = dma.hbm_to_vmem [thread:$0]  %s455_s1, 1024, %s29_s13, [#allocation6], %s364_s24, %s364_s24, %s365_s25  }
  0x14   :  { %s290_s30 = scalar_lea.hbm %s454_s0, 128 }
  0x15   :  { %p291_p8 = scmp.ne.s32.totalorder %s454_s0, %s290_s30  ;;  %p294_p9 = scmp.lt.u32.totalorder %s290_s30, %s454_s0 }
  0x17   :  { %p296_p10 = pnand %p294_p9, %p291_p8 }
  0x19   :  { %299 = shalt.err (!%p296_p10)
}
  0x1a   :  { %s300_s8 = scalar_lea.vmem %s390_s15, 128  ;;  %p305_p12 = scmp.lt.s32.totalorder %s390_s15, %s390_s15 }
  0x1b   :  { %p301_p11 = scmp.ne.s32.totalorder %s390_s15, %s300_s8  ;;  %p306_p13 = scmp.lt.s32.totalorder %s300_s8, %s300_s8 }
  0x1d   :  { %p307_p0 = por %p306_p13, %p305_p12 }
  0x1f   :  { %p308_p1 = pnand %p307_p0, %p301_p11 }
  0x21   :  { %311 = shalt.err (!%p308_p1)
}
  0x22   :  { %22 = dma.hbm_to_vmem [thread:$0]  %s454_s0, 128, %s390_s15, [#allocation3], %s364_s24, %s364_s24, %s365_s25  }
  0x23   :  { %s366_s10 = smov [#allocation7]   ;;  %s312_s14 = scalar_lea.hbm %s456_s2, 16 }
  0x24   :  { %s41_s11 = sshll.u32 %s366_s10, 4  ;;  %p313_p2 = scmp.ne.s32.totalorder %s456_s2, %s312_s14  ;;  %s42_s11 = int_to_ptr.vmem [resolvable:$true] %s41_s11 }
  0x25   :  { %p316_p3 = scmp.lt.u32.totalorder %s312_s14, %s456_s2 }
  0x27   :  { %p318_p4 = pnand %p316_p3, %p313_p2 }
  0x29   :  { %321 = shalt.err (!%p318_p4)
}
  0x2a   :  { %s322_s20 = scalar_lea.vmem %s42_s11, 16  ;;  %s326_s0 = scalar_lea.vmem %s42_s11, 32 }
  0x2b   :  { %p323_p5 = scmp.ne.s32.totalorder %s42_s11, %s322_s20  ;;  %p327_p6 = scmp.lt.s32.totalorder %s42_s11, %s42_s11 }
  0x2c   :  { %p328_p7 = scmp.lt.s32.totalorder %s326_s0, %s322_s20 }
  0x2e   :  { %p329_p8 = por %p328_p7, %p327_p6 }
  0x30   :  { %p330_p9 = pnand %p329_p8, %p323_p5 }
  0x32   :  { %333 = shalt.err (!%p330_p9)
}
  0x33   :  { %44 = dma.hbm_to_vmem [thread:$0]  %s456_s2, 16, %s42_s11, [#allocation6]  }
  0x34   :  { %356 = dma.done.wait [#allocation3], 128  }
  0x35   :  { %357 = vsyncadd [#allocation3], 4294967168 }
  0x36   :  { %358 = dma.done.wait [#allocation6], 1040  }
  0x37   :  { %359 = vsyncadd [#allocation6], 4294966256  ;;  %v367_v0 = vmov 0.0   ;;  %vm368_vm0 = vmmov 0   ;;  %v259_v1 = vld [vmem:[#allocation5] sm:$0xff]   ;;  %v260_v2 = vld [vmem:[#allocation5 + $0x8] sm:$0xff]  }
  0x38   :  { %231 = vmatprep.subr.bf16.mxu0 %v367_v0  ;;  %247 = vmatprep.mubr.msk.bf16.mxu0 %vm368_vm0, %v367_v0  ;;  %v261_v3 = vld [vmem:[#allocation5 + $0x10] sm:$0xff]   ;;  %v262_v4 = vld [vmem:[#allocation5 + $0x18] sm:$0xff]   ;;  %v263_v5 = vld [vmem:[#allocation5 + $0x20] sm:$0xff]   ;;  %s369_s2 = smov [#allocation8]  }
  0x39   :  { %232 = vmatpush3.bf16.msra.mxu0 %v259_v1  ;;  %v264_v6 = vld [vmem:[#allocation5 + $0x28] sm:$0xff]   ;;  %v265_v7 = vld [vmem:[#allocation5 + $0x30] sm:$0xff]   ;;  %v266_v8 = vld [vmem:[#allocation5 + $0x38] sm:$0xff]   ;;  %s190_s22 = sshll.u32 %s369_s2, 4  ;;  %s191_s22 = int_to_ptr.vmem [resolvable:$true] %s190_s22 }
  0x3a   :  { %233 = vmatprep.subr.bf16.mxu0 %v367_v0  ;;  %v267_v9 = vld [vmem:[#allocation2] sm:$0xff]   ;;  %v203_v10 = vld [vmem:[#allocation7] ss:$0 sm:$0xff]  ;;  %s334_s23 = scalar_lea.vmem %s191_s22, 128  ;;  %p339_p11 = scmp.lt.s32.totalorder %s191_s22, %s191_s22 }
  0x3b   :  { %p335_p10 = scmp.ne.s32.totalorder %s191_s22, %s334_s23  ;;  %p340_p12 = scmp.lt.s32.totalorder %s334_s23, %s334_s23 }
  0x3d   :  { %234 = vmatpush3.bf16.msra.mxu0 %v260_v2  ;;  %p341_p13 = por %p340_p12, %p339_p11 }
  0x3e   :  { %235 = vmatprep.subr.bf16.mxu0 %v367_v0 }
  0x3f   :  { %p342_p0 = pnand %p341_p13, %p335_p10 }
  0x41   :  { %236 = vmatpush3.bf16.msra.mxu0 %v261_v3 }
  0x42   :  { %237 = vmatprep.subr.bf16.mxu0 %v367_v0 }
  0x45   :  { %238 = vmatpush3.bf16.msra.mxu0 %v262_v4 }
  0x46   :  { %239 = vmatprep.subr.bf16.mxu0 %v367_v0 }
  0x49   :  { %240 = vmatpush3.bf16.msra.mxu0 %v263_v5 }
  0x4a   :  { %241 = vmatprep.subr.bf16.mxu0 %v367_v0 }
  0x4d   :  { %242 = vmatpush3.bf16.msra.mxu0 %v264_v6 }
  0x4e   :  { %243 = vmatprep.subr.bf16.mxu0 %v367_v0 }
  0x51   :  { %244 = vmatpush3.bf16.msra.mxu0 %v265_v7 }
  0x52   :  { %245 = vmatprep.subr.bf16.mxu0 %v367_v0 }
  0x55   :  { %246 = vmatpush3.bf16.msra.mxu0 %v266_v8 }
  0x58   :  { %248 = vmatmul.mubr.bf16.vlgmr.msra.gmra.mrb[0].mxu0 %v267_v9 }
 0x12b   :  { %v168_v11 = vpop.f32.mrb[0].mxu0 }
 0x12c   :  { %v249_v12 = vpop.f32.mrb[1].mxu0  ;;  %v169_v14 = vadd.f32 %v203_v10, %v168_v11 }
 0x12d   :  { %v171_v13 = vpop.f32.mrb[2].mxu0 }
 0x12e   :  { %v172_v15 = vadd.f32 %v203_v10, %v171_v13  ;;  %v250_v16 = vpop.f32.mrb[3].mxu0 }
 0x130   :  { %v220_v17 = vpack.c.bf16 %v172_v15, %v169_v14 }
 0x132   :  { %221 = vst [vmem:[#allocation8] sm:$0xff] %v220_v17  }
 0x133   :  { %345 = shalt.err (!%p342_p0)
}
 0x134   :  { %s346_s28 = scalar_lea.hbm %s457_s3, 128 }
 0x135   :  { %p347_p1 = scmp.ne.s32.totalorder %s457_s3, %s346_s28  ;;  %p350_p2 = scmp.lt.u32.totalorder %s346_s28, %s457_s3 }
 0x137   :  { %p352_p3 = pnand %p350_p2, %p347_p1 }
 0x139   :  { %355 = shalt.err (!%p352_p3)
}
 0x13a   :  { %196 = dma.vmem_to_hbm [thread:$0]  %s191_s22, 128, %s457_s3, [#allocation4], %s364_s24, %s364_s24, %s365_s25  }
 0x13b   :  { %360 = dma.done.wait [#allocation4], 128  }
 0x13c   :  { %361 = vsyncadd [#allocation4], 4294967168 }
 0x13d   :  { %200 = vsyncpa [#allocation3], 1 }
 0x13e   :  { %201 = vsyncpa [#allocation6], 1 }
 0x13f   :  { %202 = vsyncpa [#allocation4], 1 }

// kernel: vdnet_forward.15
= control target key start
LH: loop header
LB: loop body
LE: loop exit
PB: predicated region body
PF: predicated region fallthrough
CT: control target
= control target key end

     0   :  { %8 = vsyncpa [#allocation3], 0  ;;  %s708_s0 = inlined_call_operand.hbm [shape: bf16[32,128], index: 0, kind: input, shape index: {}]   ;;  %s709_s1 = inlined_call_operand.hbm [shape: bf16[128,384], index: 1, kind: input, shape index: {}]   ;;  %s710_s2 = inlined_call_operand.hbm [shape: f32[1,384], index: 2, kind: input, shape index: {}]   ;;  %s711_s3 = inlined_call_operand.hbm [shape: bf16[32,384], index: 3, kind: output, shape index: {}]  }
   0x1   :  { %9 = vsyncpa [#allocation6], 0 }
   0x2   :  { %10 = vsyncpa [#allocation4], 0  ;;  %s625_s12 = smov [#allocation5]   ;;  %s531_s16 = scalar_lea.hbm %s709_s1, 3072 }
   0x3   :  { %s28_s13 = sshll.u32 %s625_s12, 4  ;;  %p532_p0 = scmp.ne.s32.totalorder %s709_s1, %s531_s16  ;;  %s29_s13 = int_to_ptr.vmem [resolvable:$true] %s28_s13 }
   0x4   :  { %p535_p1 = scmp.lt.u32.totalorder %s531_s16, %s709_s1 }
   0x6   :  { %p537_p2 = pnand %p535_p1, %p532_p0 }
   0x8   :  { %540 = shalt.err (!%p537_p2)
}
   0x9   :  { %s541_s21 = scalar_lea.vmem %s29_s13, 3072  ;;  %p546_p4 = scmp.lt.s32.totalorder %s29_s13, %s29_s13 }
   0xa   :  { %p542_p3 = scmp.ne.s32.totalorder %s29_s13, %s541_s21  ;;  %p547_p5 = scmp.lt.s32.totalorder %s541_s21, %s541_s21 }
   0xc   :  { %p548_p6 = por %p547_p5, %p546_p4 }
   0xe   :  { %p549_p7 = pnand %p548_p6, %p542_p3 }
  0x10   :  { %552 = shalt.err (!%p549_p7)
}
  0x11   :  { %s626_s22 = smov 192   ;;  %s627_s23 = smov 12  }
  0x12   :  { %34 = dma.hbm_to_vmem [thread:$0]  %s709_s1, 3072, %s29_s13, [#allocation6], %s626_s22, %s626_s22, %s627_s23  }
  0x13   :  { %s628_s26 = smov [#allocation2]   ;;  %s553_s30 = scalar_lea.hbm %s708_s0, 256 }
  0x14   :  { %s16_s27 = sshll.u32 %s628_s26, 4  ;;  %p554_p8 = scmp.ne.s32.totalorder %s708_s0, %s553_s30  ;;  %s17_s27 = int_to_ptr.vmem [resolvable:$true] %s16_s27 }
  0x15   :  { %p557_p9 = scmp.lt.u32.totalorder %s553_s30, %s708_s0 }
  0x17   :  { %p559_p10 = pnand %p557_p9, %p554_p8 }
  0x19   :  { %562 = shalt.err (!%p559_p10)
}
  0x1a   :  { %s563_s8 = scalar_lea.vmem %s17_s27, 256  ;;  %p568_p12 = scmp.lt.s32.totalorder %s17_s27, %s17_s27 }
  0x1b   :  { %p564_p11 = scmp.ne.s32.totalorder %s17_s27, %s563_s8  ;;  %p569_p13 = scmp.lt.s32.totalorder %s563_s8, %s563_s8 }
  0x1d   :  { %p570_p0 = por %p569_p13, %p568_p12 }
  0x1f   :  { %p571_p1 = pnand %p570_p0, %p564_p11 }
  0x21   :  { %574 = shalt.err (!%p571_p1)
}
  0x22   :  { %s629_s1 = smov 64   ;;  %s630_s9 = smov 4  }
  0x23   :  { %22 = dma.hbm_to_vmem [thread:$0]  %s708_s0, 256, %s17_s27, [#allocation3], %s629_s1, %s629_s1, %s630_s9  }
  0x24   :  { %s631_s12 = smov [#allocation7]   ;;  %s575_s16 = scalar_lea.hbm %s710_s2, 48 }
  0x25   :  { %s41_s13 = sshll.u32 %s631_s12, 4  ;;  %p576_p2 = scmp.ne.s32.totalorder %s710_s2, %s575_s16  ;;  %s42_s13 = int_to_ptr.vmem [resolvable:$true] %s41_s13 }
  0x26   :  { %p579_p3 = scmp.lt.u32.totalorder %s575_s16, %s710_s2 }
  0x28   :  { %p581_p4 = pnand %p579_p3, %p576_p2 }
  0x2a   :  { %584 = shalt.err (!%p581_p4)
}
  0x2b   :  { %s585_s21 = scalar_lea.vmem %s42_s13, 48  ;;  %s589_s0 = scalar_lea.vmem %s42_s13, 64 }
  0x2c   :  { %p586_p5 = scmp.ne.s32.totalorder %s42_s13, %s585_s21  ;;  %p590_p6 = scmp.lt.s32.totalorder %s42_s13, %s42_s13 }
  0x2d   :  { %p591_p7 = scmp.lt.s32.totalorder %s589_s0, %s585_s21 }
  0x2f   :  { %p592_p8 = por %p591_p7, %p590_p6 }
  0x31   :  { %p593_p9 = pnand %p592_p8, %p586_p5 }
  0x33   :  { %596 = shalt.err (!%p593_p9)
}
  0x34   :  { %44 = dma.hbm_to_vmem [thread:$0]  %s710_s2, 48, %s42_s13, [#allocation6]  }
  0x35   :  { %619 = dma.done.wait [#allocation3], 256  }
  0x36   :  { %620 = vsyncadd [#allocation3], 4294967040 }
  0x37   :  { %621 = dma.done.wait [#allocation6], 3120  }
  0x38   :  { %622 = vsyncadd [#allocation6], 4294964176  ;;  %v632_v0 = vmov 0   ;;  %v497_v1 = vld [vmem:[#allocation5 + $0x4] ss:$12 sps:$4 sm:$0xff]   ;;  %v530_v26 = vld [vmem:[#allocation2 + $0x8] sm:$0xff]   ;;  %v93_v27 = vlaneseq }
  0x39   :  { %280 = vmatprep.mubr.bf16.mxu0 %v632_v0  ;;  %v499_v2 = vld [vmem:[#allocation5] ss:$12 sps:$4 sm:$0xff]   ;;  %248 = vmatprep.subr.bf16.mxu0 %v497_v1  ;;  %v500_v3 = vld [vmem:[#allocation5 + $0x1c] ss:$12 sps:$4 sm:$0xff]   ;;  %v502_v4 = vld [vmem:[#allocation5 + $0x18] ss:$12 sps:$4 sm:$0xff]  }
  0x3a   :  { %249 = vmatpush1.bf16.msra.mxu0 %v499_v2  ;;  %v503_v5 = vld [vmem:[#allocation5 + $0x8] ss:$12 sps:$4 sm:$0xff]   ;;  %v507_v7 = vld [vmem:[#allocation5 + $0x20] ss:$12 sps:$4 sm:$0xff]   ;;  %v506_v8 = vld [vmem:[#allocation5 + $0x30] ss:$12 sps:$4 sm:$0xff]  }
  0x3b   :  { %250 = vmatprep.subr.bf16.mxu0 %v500_v3  ;;  %v504_v6 = vld [vmem:[#allocation5 + $0x34] ss:$12 sps:$4 sm:$0xff]   ;;  %468 = vmatprep.subr.bf16.mxu1 %v503_v5  ;;  %v508_v9 = vld [vmem:[#allocation5 + $0x4c] ss:$12 sps:$4 sm:$0xff]   ;;  %v515_v12 = vld [vmem:[#allocation5 + $0x50] ss:$12 sps:$4 sm:$0xff]  }
  0x3c   :  { %469 = vmatpush3.bf16.msra.mxu1 %v503_v5  ;;  %v511_v10 = vld [vmem:[#allocation5 + $0x38] ss:$12 sps:$4 sm:$0xff]   ;;  %v510_v11 = vld [vmem:[#allocation5 + $0x48] ss:$12 sps:$4 sm:$0xff]   ;;  %v514_v14 = vld [vmem:[#allocation5 + $0x60] ss:$12 sps:$4 sm:$0xff]  }
  0x3d   :  { %470 = vmatprep.subr.bf16.mxu1 %v507_v7  ;;  %v512_v13 = vld [vmem:[#allocation5 + $0x64] ss:$12 sps:$4 sm:$0xff]   ;;  %v519_v15 = vld [vmem:[#allocation5 + $0x68] ss:$12 sps:$4 sm:$0xff]   ;;  %v523_v19 = vld [vmem:[#allocation5 + $0x80] ss:$12 sps:$4 sm:$0xff]  }
  0x3e   :  { %251 = vmatpush1.bf16.msra.mxu0 %v502_v4  ;;  %v516_v16 = vld [vmem:[#allocation5 + $0x7c] ss:$12 sps:$4 sm:$0xff]   ;;  %v518_v17 = vld [vmem:[#allocation5 + $0x78] ss:$12 sps:$4 sm:$0xff]   ;;  %v528_v18 = vld [vmem:[#allocation2] sm:$0xff]   ;;  %v94_v28 = vshrl.u32 %v93_v27, 7 }
  0x3f   :  { %252 = vmatprep.subr.bf16.mxu0 %v504_v6  ;;  %v520_v20 = vld [vmem:[#allocation5 + $0x94] ss:$12 sps:$4 sm:$0xff]   ;;  %484 = vmatprep.mubr.bf16.mxu1 %v528_v18  ;;  %v522_v21 = vld [vmem:[#allocation5 + $0x90] ss:$12 sps:$4 sm:$0xff]   ;;  %v527_v22 = vld [vmem:[#allocation5 + $0x98] ss:$12 sps:$4 sm:$0xff]  }
  0x40   :  { %471 = vmatpush3.bf16.msra.mxu1 %v507_v7  ;;  %v524_v23 = vld [vmem:[#allocation5 + $0xac] ss:$12 sps:$4 sm:$0xff]   ;;  %v526_v24 = vld [vmem:[#allocation5 + $0xa8] ss:$12 sps:$4 sm:$0xff]   ;;  %v529_v25 = vld [vmem:[#allocation5 + $0xb0] ss:$12 sps:$4 sm:$0xff]  }
  0x41   :  { %472 = vmatprep.subr.bf16.mxu1 %v511_v10  ;;  %v95_v29 = vsub.s32 0, %v94_v28  ;;  %v91_v30 = vld [vmem:[#allocation7] sm:$0x7]  ;;  %v99_v31 = vsub.s32 1, %v94_v28  ;;  %v103_v32 = vsub.s32 2, %v94_v28  ;;  %s633_s2 = smov [#allocation8]  }
  0x42   :  { %253 = vmatpush1.bf16.msra.mxu0 %v506_v8  ;;  %s403_s26 = sshll.u32 %s633_s2, 4  ;;  %s404_s26 = int_to_ptr.vmem [resolvable:$true] %s403_s26 }
  0x43   :  { %254 = vmatprep.subr.bf16.mxu0 %v508_v9  ;;  %v96_v33 = vrot.slane %v91_v30, %v95_v29  ;;  %v100_v34 = vrot.slane %v91_v30, %v99_v31  ;;  %v104_v36 = vrot.slane %v91_v30, %v103_v32  ;;  %s597_s27 = scalar_lea.vmem %s404_s26, 768  ;;  %p602_p11 = scmp.lt.s32.totalorder %s404_s26, %s404_s26 }
  0x44   :  { %473 = vmatpush3.bf16.msra.mxu1 %v511_v10  ;;  %p598_p10 = scmp.ne.s32.totalorder %s404_s26, %s597_s27  ;;  %p603_p12 = scmp.lt.s32.totalorder %s597_s27, %s597_s27 }
  0x45   :  { %474 = vmatprep.subr.bf16.mxu1 %v515_v12 }
  0x46   :  { %255 = vmatpush1.bf16.msra.mxu0 %v510_v11  ;;  %p604_p13 = por %p603_p12, %p602_p11 }
  0x47   :  { %256 = vmatprep.subr.bf16.mxu0 %v512_v13 }
  0x48   :  { %475 = vmatpush3.bf16.msra.mxu1 %v515_v12  ;;  %p605_p0 = pnand %p604_p13, %p598_p10 }
  0x49   :  { %476 = vmatprep.subr.bf16.mxu1 %v519_v15 }
  0x4a   :  { %257 = vmatpush1.bf16.msra.mxu0 %v514_v14 }
  0x4b   :  { %258 = vmatprep.subr.bf16.mxu0 %v516_v16 }
  0x4c   :  { %477 = vmatpush3.bf16.msra.mxu1 %v519_v15 }
  0x4d   :  { %478 = vmatprep.subr.bf16.mxu1 %v523_v19 }
  0x4e   :  { %259 = vmatpush1.bf16.msra.mxu0 %v518_v17 }
  0x4f   :  { %260 = vmatprep.subr.bf16.mxu0 %v520_v20 }
  0x50   :  { %479 = vmatpush3.bf16.msra.mxu1 %v523_v19 }
  0x51   :  { %480 = vmatprep.subr.bf16.mxu1 %v527_v22 }
  0x52   :  { %261 = vmatpush1.bf16.msra.mxu0 %v522_v21 }
  0x53   :  { %262 = vmatprep.subr.bf16.mxu0 %v524_v23 }
  0x54   :  { %481 = vmatpush3.bf16.msra.mxu1 %v527_v22 }
  0x55   :  { %482 = vmatprep.subr.bf16.mxu1 %v529_v25 }
  0x56   :  { %263 = vmatpush1.bf16.msra.mxu0 %v526_v24 }
  0x58   :  { %483 = vmatpush3.bf16.msra.mxu1 %v529_v25 }
  0x59   :  { %281 = vmatmul.mubr.bf16.vlgmr.msra.gmra.mrb[0].mxu0 %v528_v18 }
  0x5a   :  { %290 = vmatprep.mubr.bf16.mxu0 %v632_v0 }
  0x5b   :  { %485 = vmatmul.mubr.bf16.vlgmr.msra.gmra.mrb[0].mxu1 %v530_v26 }
  0x61   :  { %291 = vmatmul.mubr.bf16.gmra.mrb[4].mxu0 %v530_v26 }
 0x12c   :  { %v282_v35 = vpop.f32.mrb[0].mxu0 }
 0x12d   :  { %v283_v37 = vadd.f32 %v282_v35, %v96_v33  ;;  %v284_v38 = vpop.f32.mrb[1].mxu0 }
 0x12e   :  { %v285_v39 = vadd.f32 %v284_v38, %v100_v34  ;;  %v286_v40 = vpop.f32.mrb[2].mxu0  ;;  %v486_v43 = vpop.f32.mrb[0].mxu1 }
 0x12f   :  { %v287_v41 = vadd.f32 %v286_v40, %v96_v33  ;;  %v288_v42 = vpop.f32.mrb[3].mxu0  ;;  %v344_v46 = vadd.f32 %v486_v43, %v104_v36  ;;  %v335_v47 = vpop.f32.mrb[1].mxu1 }
 0x130   :  { %v450_v44 = vpack.c.bf16 %v285_v39, %v283_v37  ;;  %v289_v45 = vadd.f32 %v288_v42, %v100_v34  ;;  %v336_v48 = vadd.f32 %v335_v47, %v104_v36  ;;  %v487_v49 = vpop.f32.mrb[2].mxu1 }
 0x131   :  { %v455_v51 = vpack.c.bf16 %v344_v46, %v344_v46  ;;  %v347_v52 = vadd.f32 %v487_v49, %v104_v36  ;;  %v338_v53 = vpop.f32.mrb[3].mxu1 }
 0x132   :  { %390 = vst [vmem:[#allocation8] sm:$0xff] %v450_v44  ;;  %v452_v50 = vpack.c.bf16 %v289_v45, %v287_v41  ;;  %v451_v54 = vpack.c.bf16 %v336_v48, %v336_v48  ;;  %v339_v55 = vadd.f32 %v338_v53, %v104_v36 }
 0x133   :  { %395 = vst [vmem:[#allocation8 + $0x20] sm:$0xf] %v455_v51  ;;  %v457_v56 = vpack.c.bf16 %v347_v52, %v347_v52 }
 0x134   :  { %392 = vst [vmem:[#allocation8 + $0xc] sm:$0xff] %v452_v50  ;;  %v292_v57 = vpop.f32.mrb[4].mxu0  ;;  %391 = vst [vmem:[#allocation8 + $0x8] sm:$0xf] %v451_v54  ;;  %v453_v59 = vpack.c.bf16 %v339_v55, %v339_v55 }
 0x135   :  { %v293_v58 = vadd.f32 %v292_v57, %v96_v33  ;;  %v294_v60 = vpop.f32.mrb[5].mxu0  ;;  %397 = vst [vmem:[#allocation8 + $0x2c] sm:$0xf] %v457_v56 }
 0x136   :  { %v295_v61 = vadd.f32 %v294_v60, %v100_v34  ;;  %v296_v62 = vpop.f32.mrb[6].mxu0  ;;  %393 = vst [vmem:[#allocation8 + $0x14] sm:$0xf] %v453_v59 }
 0x137   :  { %v297_v63 = vadd.f32 %v296_v62, %v96_v33  ;;  %v298_v0 = vpop.f32.mrb[7].mxu0 }
 0x138   :  { %v454_v1 = vpack.c.bf16 %v295_v61, %v293_v58  ;;  %v299_v2 = vadd.f32 %v298_v0, %v100_v34 }
 0x13a   :  { %394 = vst [vmem:[#allocation8 + $0x18] sm:$0xff] %v454_v1  ;;  %v456_v3 = vpack.c.bf16 %v299_v2, %v297_v63 }
 0x13c   :  { %396 = vst [vmem:[#allocation8 + $0x24] sm:$0xff] %v456_v3 }
 0x13d   :  { %608 = shalt.err (!%p605_p0)
}
 0x13e   :  { %s609_s30 = scalar_lea.hbm %s711_s3, 768 }
 0x13f   :  { %p610_p1 = scmp.ne.s32.totalorder %s711_s3, %s609_s30  ;;  %p613_p2 = scmp.lt.u32.totalorder %s609_s30, %s711_s3 }
 0x141   :  { %p615_p3 = pnand %p613_p2, %p610_p1 }
 0x143   :  { %618 = shalt.err (!%p615_p3)
}
 0x144   :  { %409 = dma.vmem_to_hbm [thread:$0]  %s404_s26, 768, %s711_s3, [#allocation4], %s626_s22, %s626_s22, %s627_s23  }
 0x145   :  { %623 = dma.done.wait [#allocation4], 768  }
 0x146   :  { %624 = vsyncadd [#allocation4], 4294966528 }
 0x147   :  { %413 = vsyncpa [#allocation3], 1 }
 0x148   :  { %414 = vsyncpa [#allocation6], 1 }
 0x149   :  { %415 = vsyncpa [#allocation4], 1 }

// kernel: vdnet_forward.16
= control target key start
LH: loop header
LB: loop body
LE: loop exit
PB: predicated region body
PF: predicated region fallthrough
CT: control target
= control target key end

     0   :  { %7 = vsyncpa [#allocation3], 0  ;;  %s1513_s0 = inlined_call_operand.hbm [shape: bf16[2,16,384], index: 0, kind: input, shape index: {}]   ;;  %s1514_s1 = inlined_call_operand.hbm [shape: f32[2,1,16], index: 1, kind: input, shape index: {}]   ;;  %s1515_s2 = inlined_call_operand.hbm [shape: bf16[2,16,128], index: 2, kind: output, shape index: {}]  }
   0x1   :  { %9 = vsyncpa [#allocation3 + $0x1], 0 }
   0x2   :  { %10 = vsyncpa [#allocation6], 0 }
   0x3   :  { %12 = vsyncpa [#allocation6 + $0x1], 0 }
   0x4   :  { %13 = vsyncpa [#allocation4], 0 }
   0x5   :  { %15 = vsyncpa [#allocation4 + $0x1], 0  ;;  %s1219_s9 = smov 0   ;;  %s1221_s10 = smov 0  }
   0x6   :  { %s1223_s11 = smov 0   ;;  %s1225_s12 = smov 0  }
   0x7 LB: > { %s1240_s13 = sadd.s32 4294967295, %s1191_s12   ;;  %s850_s14 = sadd.s32 4294967294, %s1191_s12   ;;  %s1191_s12 = sphi %s1225_s12, %s1531_s12   ;;  %s1187_s11 = sphi %s1223_s11, %s1530_s11   ;;  %s1183_s10 = sphi %s1221_s10, %s1529_s10   ;;  %s1179_s9 = sphi %s1219_s9, %s1528_s9  }
   0x8   : > { %s1244_s15 = sadd.s32 1, %s1191_s12   ;;  %s28_s16 = sadd.s32 1, %s1187_s11 }
   0x9   : > { %s25_s17 = ssub.s32 %s1191_s12, %s1244_s15  ;;  %p35_p0 = scmp.ne.s32.totalorder %s1187_s11, %s1183_s10 }
   0xa   : > { %p26_p1 = scmp.eq.s32.totalorder %s25_s17, 0  ;;  %p36_p2 = scmp.eq.s32.totalorder %s1191_s12, 0 }
   0xb   : > { %p41_p3 = scmp.ne.s32.totalorder %s1183_s10, %s1179_s9  ;;  %p42_p4 = scmp.eq.s32.totalorder %s1240_s13, 0 }
   0xc   : > { %s1256_s18 = scalar_select %p26_p1, %s1187_s11, %s28_s16  }
   0xd   : > { %p37_p5 = por %p36_p2, %p35_p0  ;;  %p1258_p6 = por %p42_p4, %p41_p3 }
   0xe   : > { %p91_p7 = scmp.eq.s32.totalorder %s1240_s13, 1  ;;  %p97_p8 = scmp.eq.s32.totalorder %s850_s14, 1 }
   0xf   : > { %s1518_s19 = scalar_select %p1258_p6, 1, 0 }
  0x10   : > { %p968_p10 = scmp.lt.s32.totalorder %s1191_s12, 2  ;;  %p1265_p11 = por %p91_p7, %p35_p0 }
  0x11   : > { %p1269_p12 = por %p97_p8, %p41_p3  ;;  %s1274_s22 = sand.u32 1, %s1187_s11  }
  0x12   : > { %s1519_s20 = scalar_select %p1265_p11, 1, 0 }
  0x13   : > { %s1520_s21 = scalar_select %p1269_p12, 1, 0 }
  0x14   : > { %s949_s23 = smul.u32 384, %s1191_s12  ;;  %p1283_p13 = pnand %p968_p10, %p37_p5 }
  0x15   : > { %s948_s24 = smul.u32 24, %s1274_s22  ;;  %s118_s3 = scalar_lea.sflag [#allocation3], %s1274_s22 }
  0x16   : > { %s1281_s27 = scalar_lea.hbm %s1513_s0, %s949_s23  ;;  %p1063_p1 = pneg %p1283_p13 }
  0x17   : > { %s121_s29 = scalar_lea.vmem [#allocation2], %s948_s24  ;;  %s1061_s4 = scalar_lea.hbm %s1281_s27, 384 }
  0x18   : > { %s128_s30 = sshll.u32 %s121_s29, 4  ;;  %p1062_p0 = scmp.ne.s32.totalorder %s1281_s27, %s1061_s4  ;;  %s1287_s30 = int_to_ptr.vmem [resolvable:$true] %s128_s30 }
  0x19   : > { %s1066_s7 = scalar_lea.hbm %s1513_s0, 768  ;;  %p1067_p4 = scmp.lt.u32.totalorder %s1281_s27, %s1513_s0 }
  0x1a   : > { %p1064_p2 = pnand %p1063_p1, %p1062_p0  ;;  %p1068_p5 = scmp.lt.u32.totalorder %s1066_s7, %s1061_s4 }
  0x1b   : > { %p1070_p8 = scmp.lt.u32.totalorder %s1061_s4, %s1281_s27 }
  0x1c   : > { %p1065_p3 = pneg %p1064_p2  ;;  %p1069_p7 = por %p1068_p5, %p1067_p4 }
  0x1e   : > { %p1071_p10 = por %p1070_p8, %p1069_p7 }
  0x20   : > { %p1072_p9 = pnand %p1071_p10, %p1065_p3 }
  0x22   : > { %1075 = shalt.err (!%p1072_p9)
}
  0x23   : > { %s1076_s16 = scalar_lea.vmem %s1287_s30, 384  ;;  %s1193_s17 = smov [#allocation2]  }
  0x24   : > { %p1077_p0 = scmp.ne.s32.totalorder %s1287_s30, %s1076_s16  ;;  %s1081_s23 = sshll.u32 %s1193_s17, 4  ;;  %s1082_s23 = int_to_ptr.vmem [resolvable:$false] %s1081_s23 }
  0x25   : > { %s1083_s24 = scalar_lea.vmem %s1082_s23, 768  ;;  %p1084_p11 = scmp.lt.s32.totalorder %s1287_s30, %s1082_s23 }
  0x26   : > { %p1079_p2 = pnand %p1077_p0, %p1063_p1  ;;  %p1085_p4 = scmp.lt.s32.totalorder %s1083_s24, %s1076_s16 }
  0x28   : > { %p1080_p12 = pneg %p1079_p2  ;;  %p1086_p5 = por %p1085_p4, %p1084_p11 }
  0x2a   : > { %p1087_p7 = pnand %p1086_p5, %p1080_p12 }
  0x2c   : > { %1090 = shalt.err (!%p1087_p7)
}
  0x2d   : > { %s1194_s25 = smov 192   ;;  %s1195_s26 = smov 12  }
  0x2e   : > { %960 = dma.hbm_to_vmem [thread:$0]  (!%p1283_p13), %s1281_s27, 384, %s1287_s30, %s118_s3, %s1194_s25, %s1194_s25, %s1195_s26  }
  0x2f   : > { %p855_p9 = scmp.ge.s32.totalorder %s1191_s12, 1  ;;  %p153_p3 = scmp.lt.s32.totalorder %s1191_s12, 3 }
  0x30   : > { %s854_s4 = sshll.u32 %s1191_s12, 4  ;;  %s141_s8 = scalar_lea.vmem [#allocation5], %s1274_s22 }
  0x31   : > { %p1319_p11 = pnand %p855_p9, %p153_p3  ;;  %s1327_s7 = scalar_lea.hbm %s1514_s1, %s854_s4 }
  0x32   : > { %s148_s14 = sshll.u32 %s141_s8, 4  ;;  %s139_s27 = scalar_lea.sflag [#allocation6], %s1274_s22  ;;  %s149_s14 = int_to_ptr.vmem [resolvable:$true] %s148_s14 }
  0x33   : > { %s1522_s29 = scalar_select %p1319_p11, 1, 0 }
  0x34   : > { %s1091_s30 = scalar_lea.hbm %s1327_s7, 16  ;;  %s1096_s17 = scalar_lea.hbm %s1514_s1, 32 }
  0x35   : > { %p1092_p12 = scmp.ne.s32.totalorder %s1327_s7, %s1091_s30  ;;  %p1097_p0 = scmp.lt.u32.totalorder %s1327_s7, %s1514_s1 }
  0x36   : > { %p1098_p2 = scmp.lt.u32.totalorder %s1096_s17, %s1091_s30  ;;  %p1100_p5 = scmp.lt.u32.totalorder %s1091_s30, %s1327_s7 }
  0x37   : > { %p1094_p8 = pnand %p1092_p12, %p1063_p1 }
  0x38   : > { %p1099_p4 = por %p1098_p2, %p1097_p0 }
  0x39   : > { %p1095_p10 = pneg %p1094_p8 }
  0x3a   : > { %p1101_p7 = por %p1100_p5, %p1099_p4 }
  0x3c   : > { %p1102_p9 = pnand %p1101_p7, %p1095_p10 }
  0x3e   : > { %1105 = shalt.err (!%p1102_p9)
}
  0x3f   : > { %s1106_s22 = scalar_lea.vmem %s149_s14, 16  ;;  %s1196_s25 = smov [#allocation5]  }
  0x40   : > { %p1107_p3 = scmp.ne.s32.totalorder %s149_s14, %s1106_s22  ;;  %s1111_s26 = sshll.u32 %s1196_s25, 4  ;;  %s1112_s26 = int_to_ptr.vmem [resolvable:$false] %s1111_s26 }
  0x41   : > { %s1113_s4 = scalar_lea.vmem %s1112_s26, 32  ;;  %p1114_p6 = scmp.lt.s32.totalorder %s149_s14, %s1112_s26 }
  0x42   : > { %p1109_p12 = pnand %p1107_p3, %p1063_p1  ;;  %p1115_p11 = scmp.lt.s32.totalorder %s1113_s4, %s1106_s22 }
  0x44   : > { %p1110_p8 = pneg %p1109_p12  ;;  %p1116_p0 = por %p1115_p11, %p1114_p6 }
  0x46   : > { %p1117_p2 = pnand %p1116_p0, %p1110_p8 }
  0x48   : > { %1120 = shalt.err (!%p1117_p2)
}
  0x49   : > { %963 = dma.hbm_to_vmem [thread:$0]  (!%p1283_p13), %s1327_s7, 16, %s149_s14, %s139_s27  }
  0x4a   : > { %p1523_p10 = scmp.ne.s32.totalorder %s1522_s29, 0 }
  0x4b   : > { %s1353_s5 = sand.u32 (!%p1523_p10), 1, %s1183_s10   ;;  %p1524_p6 = scmp.ne.s32.totalorder (!%p1523_p10), %s1518_s19, 0 }
  0x4c   : > { %157 = sbr.rel (%p1523_p10) target bundleno = 1584 (0x630), region = 28  ;;  %s160_s8 = scalar_lea.sflag (!%p1523_p10), [#allocation3], %s1353_s5 }
  0x4d   : > { %s950_s6 = smul.u32 (!%p1523_p10), 24, %s1353_s5 }
  0x4f   : > { %s1357_s30 = scalar_lea.vmem (!%p1523_p10), [#allocation2], %s950_s6 }
  0x53   : > { %1166 = dma.done.wait (%p1524_p6), %s160_s8, 384  }
  0x54   : > { %1168 = vsyncadd (%p1524_p6), %s160_s8, 4294966912  ;;  %s169_s28 = scalar_lea.sflag [#allocation6], %s1353_s5  ;;  %s171_s29 = scalar_lea.vmem [#allocation5], %s1353_s5 }
  0x55   : > { %1170 = dma.done.wait (%p1524_p6), %s169_s28, 16  }
  0x56   : > { %1172 = vsyncadd (%p1524_p6), %s169_s28, 4294967280  ;;  %v1197_v0 = vmov 0.0   ;;  %vm1198_vm0 = vmmov 0   ;;  %vm216_vm1 = vcmask 261120   ;;  %v1025_v1 = vld [vmem:[%s1357_s30 + $0x4] ss:$12 sps:$4 sm:$0xff]  }
  0x57   : > { %900 = vmatprep.subr.bf16.mxu0 %v1197_v0  ;;  %902 = vmatprep.mubr.msk.bf16.mxu0 %vm1198_vm0, %v1197_v0  ;;  %v221_v2 = vsel %vm216_vm1, %v1025_v1, 0  ;;  %v1027_v3 = vld [vmem:[%s1357_s30] ss:$12 sps:$4 sm:$0xff]   ;;  %vm264_vm2 = vcmask 130048   ;;  %s1199_s19 = smov 96   ;;  %s1200_s7 = smov 32  }
  0x58   : > { %906 = vmatprep.subr.bf16.mxu1 %v1197_v0  ;;  %908 = vmatprep.mubr.msk.bf16.mxu1 %vm1198_vm0, %v1197_v0  ;;  %v1382_v4 = vld [vmem:[%s171_s29] ss:$0 sm:$0xff]  ;;  %s1201_s14 = smov 64   ;;  %s856_s27 = sshll.u32 %s1353_s5, 3  ;;  %vm727_vm3 = vcmask 523264   ;;  %vm730_vm4 = vcmask 785408  }
  0x59   : > { %901 = vmatpush3.bf16.xpose.msra.mxu0 %v221_v2  ;;  %v1393_v23 = vld [vmem:[%s1357_s30 + $0x8] ss:$12 sps:$4 sm:$0xff]   ;;  %s878_s3 = sshll.u32 %s1240_s13, 7  ;;  %s195_s16 = scalar_lea.vmem [#allocation7], %s856_s27 }
  0x5a   : > { %918 = vmatprep.subr.bf16.mxu0 %v1197_v0  ;;  %907 = vmatpush3.bf16.msra.mxu1 %v1393_v23  ;;  %s757_s17 = sshll.u32 %s195_s16, 4  ;;  %s1465_s22 = scalar_lea.hbm %s1515_s2, %s878_s3  ;;  %s1467_s17 = int_to_ptr.vmem [resolvable:$true] %s757_s17 }
  0x5b   : > { %912 = vmatprep.subr.bf16.mxu1 %v1197_v0  ;;  %s744_s13 = scalar_lea.sflag [#allocation4], %s1353_s5  ;;  %s1121_s25 = scalar_lea.vmem %s1467_s17, 128 }
  0x5c   : > { %p1122_p13 = scmp.ne.s32.totalorder %s1467_s17, %s1121_s25  ;;  %p1525_p1 = scmp.ne.s32.totalorder %s1519_s20, 0 }
  0x5d   : > { %s1202_s26 = smov [#allocation7]  }
  0x5e   : > { %p1123_p11 = pnand %p1122_p13, %p1525_p1  ;;  %s1125_s4 = sshll.u32 %s1202_s26, 4  ;;  %s1126_s4 = int_to_ptr.vmem [resolvable:$false] %s1125_s4 }
  0x5f   : > { %s1127_s6 = scalar_lea.vmem %s1126_s4, 256  ;;  %p1128_p5 = scmp.lt.s32.totalorder %s1467_s17, %s1126_s4 }
  0x60   : > { %903 = vmatmul.mubr.msk.bf16.vlgmr.msra.gmra.mrb[0].mxu0 %vm216_vm1, %v1027_v3  ;;  %p1124_p4 = pneg %p1123_p11  ;;  %p1129_p7 = scmp.lt.s32.totalorder %s1127_s6, %s1121_s25 }
  0x61   : > { %920 = vmatprep.mubr.msk.bf16.mxu0 %vm1198_vm0, %v1197_v0 }
  0x62   : > { %p1130_p9 = por %p1129_p7, %p1128_p5 }
  0x64   : > { %p1131_p3 = pnand %p1130_p9, %p1124_p4 }
 0x133   : > { %v257_v5 = vpop.f32.mrb[0].mxu0 }
 0x134   : > { %v258_v6 = vadd.f32 %v1382_v4, %v257_v5  ;;  %v904_v7 = vpop.f32.mrb[1].mxu0 }
 0x135   : > { %v260_v8 = vpop.f32.mrb[2].mxu0 }
 0x136   : > { %v261_v9 = vadd.f32 %v1382_v4, %v260_v8  ;;  %v905_v10 = vpop.f32.mrb[3].mxu0  ;;  %v265_v11 = vsel %vm264_vm2, %v258_v6, -inf }
 0x137   : > { %266 = vmax.xlane.f32.xlu0 %v265_v11 }
 0x138   : > { %v268_v12 = vsel %vm264_vm2, %v261_v9, -inf }
 0x13b   : > { %269 = vmax.xlane.f32.xlu0 %v268_v12 }
 0x151   : > { %340 = vrot.lane.b32.xlu0 %v1025_v1, %s1199_s19 }
 0x155   : > { %582 = vrot.lane.b32.xlu0 %v1025_v1, %s1200_s7 }
 0x1c4   : > { %v267_v13 = vpop.xlane.xlu0 %266 }
 0x1c5   : > { %v271_v14 = vsub.f32 %v258_v6, %v267_v13 }
 0x1c7   : > { %v273_v15 = vmul.f32 1.442695, %v271_v14 }
 0x1c8   : > { %v270_v16 = vpop.xlane.xlu0 %269 }
 0x1c9   : > { %1029 = vpow2.f32 %v273_v15  ;;  %v272_v17 = vsub.f32 %v261_v9, %v270_v16 }
 0x1cb   : > { %v275_v18 = vmul.f32 1.442695, %v272_v17 }
 0x1cc   : > { %v341_v28 = vpop.permute.xlu0 %340 }
 0x1cd   : > { %1031 = vpow2.f32 %v275_v18  ;;  %v346_v32 = vsel %vm216_vm1, %v341_v28, 0 }
 0x1d0   : > { %v583_v36 = vpop.permute.xlu0 %582 }
 0x1d1   : > { %v588_v38 = vsel %vm216_vm1, %v583_v36, 0 }
 0x1d3   : > { %v1030_v19 = vpop.eup %1029 }
 0x1d4   : > { %v277_v20 = vsel %vm264_vm2, %v1030_v19, 0.0 }
 0x1d5   : > { %278 = vadd.xlane.f32.xlu1 %v277_v20 }
 0x1d7   : > { %v1032_v21 = vpop.eup %1031 }
 0x1d8   : > { %v280_v22 = vsel %vm264_vm2, %v1032_v21, 0.0 }
 0x1d9   : > { %281 = vadd.xlane.f32.xlu1 %v280_v22 }
 0x1ea   : > { %338 = vrot.lane.b32.xlu1 %v1027_v3, %s1199_s19 }
 0x1ee   : > { %461 = vrot.lane.b32.xlu1 %v1025_v1, %s1201_s14 }
 0x1f2   : > { %459 = vrot.lane.b32.xlu1 %v1027_v3, %s1201_s14 }
 0x1f6   : > { %580 = vrot.lane.b32.xlu1 %v1027_v3, %s1200_s7 }
 0x262   : > { %v279_v24 = vpop.xlane.xlu1 %278 }
 0x263   : > { %1033 = vrcp.f32 %v279_v24 }
 0x266   : > { %v282_v25 = vpop.xlane.xlu1 %281 }
 0x267   : > { %1035 = vrcp.f32 %v282_v25 }
 0x26a   : > { %v339_v31 = vpop.permute.xlu1 %338 }
 0x26d   : > { %v1034_v26 = vpop.eup %1033 }
 0x26e   : > { %v285_v29 = vmul.f32 %v1034_v26, %v1030_v19  ;;  %v462_v34 = vpop.permute.xlu1 %461 }
 0x26f   : > { %v467_v35 = vsel %vm216_vm1, %v462_v34, 0 }
 0x271   : > { %v1036_v27 = vpop.eup %1035 }
 0x272   : > { %v286_v30 = vmul.f32 %v1036_v27, %v1032_v21  ;;  %v460_v37 = vpop.permute.xlu1 %459 }
 0x274   : > { %v287_v33 = vpack.c.bf16 %v286_v30, %v285_v29 }
 0x276   : > { %909 = vmatmul.mubr.msk.bf16.vlgmr.msra.gmra.mrb[0].mxu1 %vm264_vm2, %v287_v33  ;;  %v581_v39 = vpop.permute.xlu1 %580 }
 0x277   : > { %913 = vmatpush3.bf16.xpose.msra.mxu1 %v346_v32  ;;  %914 = vmatprep.mubr.msk.bf16.mxu1 %vm1198_vm0, %v1197_v0 }
 0x278   : > { %924 = vmatprep.subr.bf16.mxu1 %v1197_v0 }
 0x27e   : > { %915 = vmatmul.mubr.msk.bf16.vlgmr.msra.gmra.mrb[4].mxu1 %vm216_vm1, %v339_v31 }
 0x27f   : > { %925 = vmatpush3.bf16.xpose.msra.mxu1 %v467_v35  ;;  %926 = vmatprep.mubr.msk.bf16.mxu1 %vm1198_vm0, %v1197_v0 }
 0x280   : > { %936 = vmatprep.subr.bf16.mxu1 %v1197_v0 }
 0x286   : > { %927 = vmatmul.mubr.msk.bf16.vlgmr.msra.gmra.mrb[8].mxu1 %vm216_vm1, %v460_v37 }
 0x287   : > { %937 = vmatpush3.bf16.xpose.msra.mxu1 %v588_v38  ;;  %938 = vmatprep.mubr.msk.bf16.mxu1 %vm1198_vm0, %v1197_v0 }
 0x28e   : > { %939 = vmatmul.mubr.msk.bf16.vlgmr.msra.gmra.mrb[12].mxu1 %vm216_vm1, %v581_v39 }
 0x349   : > { %v1416_v40 = vpop.f32.mrb[0].mxu1 }
 0x34a   : > { %v910_v41 = vpop.f32.mrb[1].mxu1 }
 0x34b   : > { %v1418_v42 = vpop.f32.mrb[2].mxu1 }
 0x34c   : > { %v911_v43 = vpop.f32.mrb[3].mxu1 }
 0x351   : > { %v382_v44 = vpop.f32.mrb[4].mxu1 }
 0x352   : > { %v383_v45 = vadd.f32 %v1382_v4, %v382_v44  ;;  %v916_v46 = vpop.f32.mrb[5].mxu1 }
 0x353   : > { %v385_v47 = vpop.f32.mrb[6].mxu1 }
 0x354   : > { %v386_v48 = vadd.f32 %v1382_v4, %v385_v47  ;;  %v917_v49 = vpop.f32.mrb[7].mxu1  ;;  %v389_v50 = vsel %vm264_vm2, %v383_v45, -inf }
 0x355   : > { %390 = vmax.xlane.f32.xlu0 %v389_v50 }
 0x356   : > { %v392_v51 = vsel %vm264_vm2, %v386_v48, -inf }
 0x357   : > { %393 = vmax.xlane.f32.xlu1 %v392_v51 }
 0x359   : > { %v503_v52 = vpop.f32.mrb[8].mxu1 }
 0x35a   : > { %v504_v53 = vadd.f32 %v1382_v4, %v503_v52  ;;  %v928_v54 = vpop.f32.mrb[9].mxu1 }
 0x35b   : > { %v506_v55 = vpop.f32.mrb[10].mxu1 }
 0x35c   : > { %v507_v56 = vadd.f32 %v1382_v4, %v506_v55  ;;  %v929_v57 = vpop.f32.mrb[11].mxu1  ;;  %v510_v58 = vsel %vm264_vm2, %v504_v53, -inf }
 0x35d   : > { %511 = vmax.xlane.f32.xlu0 %v510_v58 }
 0x35e   : > { %v513_v59 = vsel %vm264_vm2, %v507_v56, -inf }
 0x361   : > { %514 = vmax.xlane.f32.xlu0 %v513_v59  ;;  %v624_v60 = vpop.f32.mrb[12].mxu1 }
 0x362   : > { %v625_v61 = vadd.f32 %v1382_v4, %v624_v60  ;;  %v940_v62 = vpop.f32.mrb[13].mxu1 }
 0x363   : > { %v627_v63 = vpop.f32.mrb[14].mxu1 }
 0x364   : > { %v628_v1 = vadd.f32 %v1382_v4, %v627_v63  ;;  %v631_v2 = vsel %vm264_vm2, %v625_v61, -inf  ;;  %v941_v3 = vpop.f32.mrb[15].mxu1 }
 0x365   : > { %632 = vmax.xlane.f32.xlu0 %v631_v2 }
 0x366   : > { %v634_v5 = vsel %vm264_vm2, %v628_v1, -inf }
 0x367   : > { %635 = vmax.xlane.f32.xlu1 %v634_v5 }
 0x3e2   : > { %v391_v6 = vpop.xlane.xlu0 %390 }
 0x3e3   : > { %v395_v7 = vsub.f32 %v383_v45, %v391_v6 }
 0x3e4   : > { %v394_v8 = vpop.xlane.xlu1 %393 }
 0x3e5   : > { %v397_v9 = vmul.f32 1.442695, %v395_v7  ;;  %v396_v10 = vsub.f32 %v386_v48, %v394_v8 }
 0x3e7   : > { %1037 = vpow2.f32 %v397_v9  ;;  %v399_v11 = vmul.f32 1.442695, %v396_v10 }
 0x3e9   : > { %1039 = vpow2.f32 %v399_v11 }
 0x3ea   : > { %v512_v12 = vpop.xlane.xlu0 %511 }
 0x3eb   : > { %v516_v13 = vsub.f32 %v504_v53, %v512_v12 }
 0x3ed   : > { %v518_v14 = vmul.f32 1.442695, %v516_v13 }
 0x3ee   : > { %v515_v15 = vpop.xlane.xlu0 %514 }
 0x3ef   : > { %1041 = vpow2.f32 %v518_v14  ;;  %v517_v4 = vsub.f32 %v507_v56, %v515_v15 }
 0x3f1   : > { %v1038_v16 = vpop.eup %1037  ;;  %v520_v17 = vmul.f32 1.442695, %v517_v4 }
 0x3f2   : > { %v633_v18 = vpop.xlane.xlu0 %632  ;;  %v401_v19 = vsel %vm264_vm2, %v1038_v16, 0.0 }
 0x3f3   : > { %v1040_v20 = vpop.eup %1039  ;;  %1043 = vpow2.f32 %v520_v17  ;;  %v637_v21 = vsub.f32 %v625_v61, %v633_v18  ;;  %402 = vadd.xlane.f32.xlu0 %v401_v19 }
 0x3f4   : > { %v404_v22 = vsel %vm264_vm2, %v1040_v20, 0.0  ;;  %v636_v31 = vpop.xlane.xlu1 %635 }
 0x3f5   : > { %v639_v24 = vmul.f32 1.442695, %v637_v21  ;;  %405 = vadd.xlane.f32.xlu1 %v404_v22  ;;  %v638_v32 = vsub.f32 %v628_v1, %v636_v31 }
 0x3f7   : > { %1045 = vpow2.f32 %v639_v24  ;;  %v641_v33 = vmul.f32 1.442695, %v638_v32 }
 0x3f9   : > { %v1042_v25 = vpop.eup %1041  ;;  %1047 = vpow2.f32 %v641_v33 }
 0x3fa   : > { %v522_v26 = vsel %vm264_vm2, %v1042_v25, 0.0 }
 0x3fb   : > { %523 = vadd.xlane.f32.xlu0 %v522_v26 }
 0x3fd   : > { %v1044_v27 = vpop.eup %1043 }
 0x3fe   : > { %v525_v28 = vsel %vm264_vm2, %v1044_v27, 0.0 }
 0x3ff   : > { %526 = vadd.xlane.f32.xlu1 %v525_v28 }
 0x401   : > { %v1046_v29 = vpop.eup %1045 }
 0x402   : > { %v643_v30 = vsel %vm264_vm2, %v1046_v29, 0.0 }
 0x403   : > { %644 = vadd.xlane.f32.xlu0 %v643_v30  ;;  %v1048_v34 = vpop.eup %1047 }
 0x404   : > { %v646_v35 = vsel %vm264_vm2, %v1048_v34, 0.0 }
 0x410   : > { %533 = vrot.lane.b32.xlu1 %v1393_v23, %s1201_s14 }
 0x419   : > { %412 = vrot.lane.b32.xlu0 %v1393_v23, %s1199_s19 }
 0x434   : > { %647 = vadd.xlane.f32.xlu1 %v646_v35 }
 0x445   : > { %654 = vrot.lane.b32.xlu1 %v1393_v23, %s1200_s7 }
 0x480   : > { %v403_v37 = vpop.xlane.xlu0 %402 }
 0x482   : > { %v406_v36 = vpop.xlane.xlu1 %405 }
 0x483   : > { %1049 = vrcp.f32 %v406_v36 }
 0x484   : > { %1051 = vrcp.f32 %v403_v37 }
 0x488   : > { %v524_v38 = vpop.xlane.xlu0 %523 }
 0x48c   : > { %v527_v39 = vpop.xlane.xlu1 %526 }
 0x48d   : > { %1053 = vrcp.f32 %v527_v39  ;;  %v1050_v41 = vpop.eup %1049 }
 0x48e   : > { %1055 = vrcp.f32 %v524_v38  ;;  %v1052_v44 = vpop.eup %1051  ;;  %v410_v45 = vmul.f32 %v1050_v41, %v1040_v20 }
 0x48f   : > { %v409_v46 = vmul.f32 %v1052_v44, %v1038_v16 }
 0x490   : > { %v645_v43 = vpop.xlane.xlu0 %644  ;;  %v534_v23 = vpop.permute.xlu1 %533 }
 0x491   : > { %v411_v48 = vpack.c.bf16 %v410_v45, %v409_v46  ;;  %1057 = vrcp.f32 %v645_v43 }
 0x494   : > { %v413_v47 = vpop.permute.xlu0 %412 }
 0x495   : > { %919 = vmatpush3.bf16.msra.mxu0 %v413_v47 }
 0x496   : > { %930 = vmatprep.subr.bf16.mxu0 %v1197_v0 }
 0x497   : > { %v1054_v49 = vpop.eup %1053 }
 0x498   : > { %921 = vmatmul.mubr.msk.bf16.vlgmr.msra.gmra.mrb[4].mxu0 %vm264_vm2, %v411_v48  ;;  %v1056_v50 = vpop.eup %1055  ;;  %v531_v51 = vmul.f32 %v1054_v49, %v1044_v27 }
 0x499   : > { %931 = vmatpush3.bf16.msra.mxu0 %v534_v23  ;;  %932 = vmatprep.mubr.msk.bf16.mxu0 %vm1198_vm0, %v1197_v0  ;;  %v530_v52 = vmul.f32 %v1056_v50, %v1042_v25 }
 0x49a   : > { %942 = vmatprep.subr.bf16.mxu0 %v1197_v0 }
 0x49b   : > { %v532_v53 = vpack.c.bf16 %v531_v51, %v530_v52  ;;  %v1058_v56 = vpop.eup %1057 }
 0x49c   : > { %v651_v58 = vmul.f32 %v1058_v56, %v1046_v29 }
 0x4a0   : > { %933 = vmatmul.mubr.msk.bf16.vlgmr.msra.gmra.mrb[8].mxu0 %vm264_vm2, %v532_v53 }
 0x4a1   : > { %944 = vmatprep.mubr.msk.bf16.mxu0 %vm1198_vm0, %v1197_v0 }
 0x4c1   : > { %v648_v54 = vpop.xlane.xlu1 %647 }
 0x4c2   : > { %1059 = vrcp.f32 %v648_v54 }
 0x4c5   : > { %v655_v55 = vpop.permute.xlu1 %654 }
 0x4c6   : > { %943 = vmatpush3.bf16.msra.mxu0 %v655_v55 }
 0x4cc   : > { %v1060_v57 = vpop.eup %1059 }
 0x4cd   : > { %v652_v59 = vmul.f32 %v1060_v57, %v1048_v34 }
 0x4cf   : > { %v653_v60 = vpack.c.bf16 %v652_v59, %v651_v58 }
 0x4d1   : > { %945 = vmatmul.mubr.msk.bf16.vlgmr.msra.gmra.mrb[12].mxu0 %vm264_vm2, %v653_v60 }
 0x56b   : > { %v452_v61 = vpop.f32.mrb[4].mxu0 }
 0x56c   : > { %v922_v62 = vpop.f32.mrb[5].mxu0 }
 0x56d   : > { %v455_v63 = vpop.f32.mrb[6].mxu0 }
 0x56e   : > { %v1010_v1 = vpack.i.bf16 %v455_v63, %v452_v61  ;;  %v923_v2 = vpop.f32.mrb[7].mxu0 }
 0x570   : > { %1011 = vrot.lane.b32.xlu1 %v1010_v1, %s1200_s7 }
 0x573   : > { %v573_v0 = vpop.f32.mrb[8].mxu0 }
 0x574   : > { %v934_v3 = vpop.f32.mrb[9].mxu0 }
 0x575   : > { %v576_v5 = vpop.f32.mrb[10].mxu0 }
 0x576   : > { %v1015_v6 = vpack.i.bf16 %v576_v5, %v573_v0  ;;  %v935_v7 = vpop.f32.mrb[11].mxu0 }
 0x578   : > { %1016 = vrot.lane.b32.xlu0 %v1015_v6, %s1201_s14 }
 0x5a4   : > { %v694_v8 = vpop.f32.mrb[12].mxu0 }
 0x5a5   : > { %v946_v9 = vpop.f32.mrb[13].mxu0 }
 0x5a6   : > { %v697_v10 = vpop.f32.mrb[14].mxu0 }
 0x5a7   : > { %v1020_v11 = vpack.i.bf16 %v697_v10, %v694_v8  ;;  %v947_v12 = vpop.f32.mrb[15].mxu0 }
 0x5a9   : > { %1021 = vrot.lane.b32.xlu1 %v1020_v11, %s1199_s19 }
 0x5e2   : > { %v1012_v13 = vpop.permute.xlu1 %1011 }
 0x5e3   : > { %v1014_v15 = vunpack.i.h.bf16 %v1012_v13  ;;  %v1013_v4 = vunpack.i.l.bf16 %v1012_v13 }
 0x5e5   : > { %v726_v19 = vsel %vm216_vm1, %v1418_v42, %v1014_v15  ;;  %v725_v20 = vsel %vm216_vm1, %v1416_v40, %v1013_v4 }
 0x5ea   : > { %v1017_v14 = vpop.permute.xlu0 %1016 }
 0x5eb   : > { %v1019_v16 = vunpack.i.h.bf16 %v1017_v14  ;;  %v1018_v17 = vunpack.i.l.bf16 %v1017_v14 }
 0x5ed   : > { %v729_v24 = vsel %vm727_vm3, %v726_v19, %v1019_v16  ;;  %v728_v25 = vsel %vm727_vm3, %v725_v20, %v1018_v17 }
 0x61b   : > { %v1022_v18 = vpop.permute.xlu1 %1021 }
 0x61c   : > { %v1024_v21 = vunpack.i.h.bf16 %v1022_v18  ;;  %v1023_v22 = vunpack.i.l.bf16 %v1022_v18 }
 0x61e   : > { %v732_v26 = vsel %vm730_vm4, %v729_v24, %v1024_v21  ;;  %v731_v27 = vsel %vm730_vm4, %v728_v25, %v1023_v22 }
 0x61f   : > { %v882_v28 = vpack.c.bf16 %v732_v26, %v731_v27 }
 0x621   : > { %883 = vst [vmem:[%s195_s16] sm:$0xff] %v882_v28  }
 0x622   : > { %1134 = shalt.err (!%p1131_p3)
}
 0x623   : > { %s1135_s8 = scalar_lea.hbm %s1465_s22, 128  ;;  %s1139_s29 = scalar_lea.hbm %s1515_s2, 256 }
 0x624   : > { %p1136_p12 = scmp.ne.s32.totalorder %s1465_s22, %s1135_s8  ;;  %p1140_p2 = scmp.lt.u32.totalorder %s1465_s22, %s1515_s2 }
 0x625   : > { %p1141_p10 = scmp.lt.u32.totalorder %s1139_s29, %s1135_s8  ;;  %p1143_p13 = scmp.lt.u32.totalorder %s1135_s8, %s1465_s22 }
 0x626   : > { %p1137_p8 = pnand %p1136_p12, %p1525_p1 }
 0x627   : > { %p1142_p6 = por %p1141_p10, %p1140_p2 }
 0x628   : > { %p1138_p0 = pneg %p1137_p8 }
 0x629   : > { %p1144_p11 = por %p1143_p13, %p1142_p6 }
 0x62b   : > { %p1145_p4 = pnand %p1144_p11, %p1138_p0 }
 0x62d   : > { %1148 = shalt.err (!%p1145_p4)
}
 0x62e   : > { %s1203_s27 = smov 4  }
 0x62f   : > { %955 = dma.vmem_to_hbm [thread:$0]  (%p1525_p1), %s1467_s17, 128, %s1465_s22, %s744_s13, %s1201_s14, %s1201_s14, %s1203_s27  }
 0x630 PF: > { %s772_s3 = sand.u32 1, %s1179_s9   ;;  %p1526_p5 = scmp.ne.s32.totalorder %s1520_s21, 0 }
 0x631   : > { %p1527_p7 = scmp.ge.s32.totalorder %s1191_s12, 2  ;;  %s773_s16 = scalar_lea.sflag [#allocation4], %s772_s3 }
 0x633   : > { %p965_p9 = pnand %p1527_p7, %p1526_p5 }
 0x635   : > { %1174 = dma.done.wait (!%p965_p9), %s773_s16, 128  }
 0x636   : > { %1176 = vsyncadd (!%p965_p9), %s773_s16, 4294967168  ;;  %p18_p3 = scmp.ge.s32.totalorder %s1244_s15, 4   ;;  %s1528_s9 = smov %s1183_s10 }
 0x637   : > { %s1529_s10 = smov %s1187_s11  ;;  %s1530_s11 = smov %s1256_s18 }
 0x638   : > { %s1531_s12 = smov %s1244_s15  ;;  %20 = sbr.rel (!%p18_p3) target bundleno = 7 (0x7), region = 86 }
 0x63f   :  { %778 = vsyncpa [#allocation3], 1 }
 0x640   :  { %780 = vsyncpa [#allocation3 + $0x1], 1 }
 0x641   :  { %781 = vsyncpa [#allocation6], 1 }
 0x642   :  { %783 = vsyncpa [#allocation6 + $0x1], 1 }
 0x643   :  { %784 = vsyncpa [#allocation4], 1 }
 0x644   :  { %786 = vsyncpa [#allocation4 + $0x1], 1 }

// kernel: vdnet_forward.18
= control target key start
LH: loop header
LB: loop body
LE: loop exit
PB: predicated region body
PF: predicated region fallthrough
CT: control target
= control target key end

     0   :  { %8 = vsyncpa [#allocation3], 0  ;;  %s676_s0 = inlined_call_operand.hbm [shape: bf16[32,128], index: 0, kind: input, shape index: {}]   ;;  %s677_s1 = inlined_call_operand.hbm [shape: bf16[128,256], index: 1, kind: input, shape index: {}]   ;;  %s678_s2 = inlined_call_operand.hbm [shape: f32[1,256], index: 2, kind: input, shape index: {}]   ;;  %s679_s3 = inlined_call_operand.hbm [shape: bf16[32,256], index: 3, kind: output, shape index: {}]  }
   0x1   :  { %9 = vsyncpa [#allocation6], 0 }
   0x2   :  { %10 = vsyncpa [#allocation4], 0  ;;  %s537_s12 = smov [#allocation5]   ;;  %s443_s16 = scalar_lea.hbm %s677_s1, 2048 }
   0x3   :  { %s28_s13 = sshll.u32 %s537_s12, 4  ;;  %p444_p0 = scmp.ne.s32.totalorder %s677_s1, %s443_s16  ;;  %s29_s13 = int_to_ptr.vmem [resolvable:$true] %s28_s13 }
   0x4   :  { %p447_p1 = scmp.lt.u32.totalorder %s443_s16, %s677_s1 }
   0x6   :  { %p449_p2 = pnand %p447_p1, %p444_p0 }
   0x8   :  { %452 = shalt.err (!%p449_p2)
}
   0x9   :  { %s453_s21 = scalar_lea.vmem %s29_s13, 2048  ;;  %p458_p4 = scmp.lt.s32.totalorder %s29_s13, %s29_s13 }
   0xa   :  { %p454_p3 = scmp.ne.s32.totalorder %s29_s13, %s453_s21  ;;  %p459_p5 = scmp.lt.s32.totalorder %s453_s21, %s453_s21 }
   0xc   :  { %p460_p6 = por %p459_p5, %p458_p4 }
   0xe   :  { %p461_p7 = pnand %p460_p6, %p454_p3 }
  0x10   :  { %464 = shalt.err (!%p461_p7)
}
  0x11   :  { %s538_s22 = smov 128   ;;  %s539_s23 = smov 8  }
  0x12   :  { %34 = dma.hbm_to_vmem [thread:$0]  %s677_s1, 2048, %s29_s13, [#allocation6], %s538_s22, %s538_s22, %s539_s23  }
  0x13   :  { %s540_s26 = smov [#allocation2]   ;;  %s465_s30 = scalar_lea.hbm %s676_s0, 256 }
  0x14   :  { %s16_s27 = sshll.u32 %s540_s26, 4  ;;  %p466_p8 = scmp.ne.s32.totalorder %s676_s0, %s465_s30  ;;  %s17_s27 = int_to_ptr.vmem [resolvable:$true] %s16_s27 }
  0x15   :  { %p469_p9 = scmp.lt.u32.totalorder %s465_s30, %s676_s0 }
  0x17   :  { %p471_p10 = pnand %p469_p9, %p466_p8 }
  0x19   :  { %474 = shalt.err (!%p471_p10)
}
  0x1a   :  { %s475_s8 = scalar_lea.vmem %s17_s27, 256  ;;  %p480_p12 = scmp.lt.s32.totalorder %s17_s27, %s17_s27 }
  0x1b   :  { %p476_p11 = scmp.ne.s32.totalorder %s17_s27, %s475_s8  ;;  %p481_p13 = scmp.lt.s32.totalorder %s475_s8, %s475_s8 }
  0x1d   :  { %p482_p0 = por %p481_p13, %p480_p12 }
  0x1f   :  { %p483_p1 = pnand %p482_p0, %p476_p11 }
  0x21   :  { %486 = shalt.err (!%p483_p1)
}
  0x22   :  { %s541_s1 = smov 64   ;;  %s542_s9 = smov 4  }
  0x23   :  { %22 = dma.hbm_to_vmem [thread:$0]  %s676_s0, 256, %s17_s27, [#allocation3], %s541_s1, %s541_s1, %s542_s9  }
  0x24   :  { %s543_s12 = smov [#allocation7]   ;;  %s487_s16 = scalar_lea.hbm %s678_s2, 32 }
  0x25   :  { %s41_s13 = sshll.u32 %s543_s12, 4  ;;  %p488_p2 = scmp.ne.s32.totalorder %s678_s2, %s487_s16  ;;  %s42_s13 = int_to_ptr.vmem [resolvable:$true] %s41_s13 }
  0x26   :  { %p491_p3 = scmp.lt.u32.totalorder %s487_s16, %s678_s2 }
  0x28   :  { %p493_p4 = pnand %p491_p3, %p488_p2 }
  0x2a   :  { %496 = shalt.err (!%p493_p4)
}
  0x2b   :  { %s497_s21 = scalar_lea.vmem %s42_s13, 32  ;;  %p502_p6 = scmp.lt.s32.totalorder %s42_s13, %s42_s13 }
  0x2c   :  { %p498_p5 = scmp.ne.s32.totalorder %s42_s13, %s497_s21  ;;  %p503_p7 = scmp.lt.s32.totalorder %s497_s21, %s497_s21 }
  0x2e   :  { %p504_p8 = por %p503_p7, %p502_p6 }
  0x30   :  { %p505_p9 = pnand %p504_p8, %p498_p5 }
  0x32   :  { %508 = shalt.err (!%p505_p9)
}
  0x33   :  { %44 = dma.hbm_to_vmem [thread:$0]  %s678_s2, 32, %s42_s13, [#allocation6]  }
  0x34   :  { %531 = dma.done.wait [#allocation3], 256  }
  0x35   :  { %532 = vsyncadd [#allocation3], 4294967040 }
  0x36   :  { %533 = dma.done.wait [#allocation6], 2080  }
  0x37   :  { %534 = vsyncadd [#allocation6], 4294965216  ;;  %v544_v0 = vmov 0   ;;  %v401_v1 = vld [vmem:[#allocation5 + $0x4] ss:$8 sps:$4 sm:$0xff]   ;;  %v425_v17 = vld [vmem:[#allocation2] sm:$0xff]   ;;  %v77_v19 = vlaneseq }
  0x38   :  { %211 = vmatprep.mubr.bf16.mxu0 %v544_v0  ;;  %221 = vmatprep.mubr.bf16.mxu1 %v544_v0  ;;  %v403_v2 = vld [vmem:[#allocation5] ss:$8 sps:$4 sm:$0xff]   ;;  %v404_v3 = vld [vmem:[#allocation5 + $0x14] ss:$8 sps:$4 sm:$0xff]   ;;  %v406_v4 = vld [vmem:[#allocation5 + $0x10] ss:$8 sps:$4 sm:$0xff]  }
  0x39   :  { %179 = vmatprep.subr.bf16.mxu0 %v401_v1  ;;  %376 = vmatprep.subr.bf16.mxu1 %v401_v1  ;;  %v407_v5 = vld [vmem:[#allocation5 + $0x24] ss:$8 sps:$4 sm:$0xff]   ;;  %v409_v6 = vld [vmem:[#allocation5 + $0x20] ss:$8 sps:$4 sm:$0xff]   ;;  %v410_v7 = vld [vmem:[#allocation5 + $0x34] ss:$8 sps:$4 sm:$0xff]  }
  0x3a   :  { %180 = vmatpush1.bf16.msra.mxu0 %v403_v2  ;;  %384 = vmatpush1.bf16.msra.mxu1 %v403_v2  ;;  %v412_v8 = vld [vmem:[#allocation5 + $0x30] ss:$8 sps:$4 sm:$0xff]   ;;  %v413_v9 = vld [vmem:[#allocation5 + $0x44] ss:$8 sps:$4 sm:$0xff]   ;;  %v415_v10 = vld [vmem:[#allocation5 + $0x40] ss:$8 sps:$4 sm:$0xff]  }
  0x3b   :  { %181 = vmatprep.subr.bf16.mxu0 %v404_v3  ;;  %377 = vmatprep.subr.bf16.mxu1 %v404_v3  ;;  %v416_v11 = vld [vmem:[#allocation5 + $0x54] ss:$8 sps:$4 sm:$0xff]   ;;  %v418_v12 = vld [vmem:[#allocation5 + $0x50] ss:$8 sps:$4 sm:$0xff]   ;;  %v419_v13 = vld [vmem:[#allocation5 + $0x64] ss:$8 sps:$4 sm:$0xff]  }
  0x3c   :  { %v421_v14 = vld [vmem:[#allocation5 + $0x60] ss:$8 sps:$4 sm:$0xff]   ;;  %v422_v15 = vld [vmem:[#allocation5 + $0x74] ss:$8 sps:$4 sm:$0xff]   ;;  %v424_v16 = vld [vmem:[#allocation5 + $0x70] ss:$8 sps:$4 sm:$0xff]  }
  0x3d   :  { %v426_v18 = vld [vmem:[#allocation2 + $0x8] sm:$0xff]   ;;  %v78_v20 = vshrl.u32 %v77_v19, 7  ;;  %v75_v22 = vld [vmem:[#allocation7] sm:$0x3]  ;;  %s545_s2 = smov [#allocation8]  }
  0x3e   :  { %182 = vmatpush1.bf16.msra.mxu0 %v406_v4  ;;  %385 = vmatpush1.bf16.msra.mxu1 %v406_v4  ;;  %s337_s25 = sshll.u32 %s545_s2, 4  ;;  %s338_s25 = int_to_ptr.vmem [resolvable:$true] %s337_s25 }
  0x3f   :  { %183 = vmatprep.subr.bf16.mxu0 %v407_v5  ;;  %378 = vmatprep.subr.bf16.mxu1 %v407_v5  ;;  %v79_v21 = vsub.s32 0, %v78_v20  ;;  %v83_v23 = vsub.s32 1, %v78_v20  ;;  %s509_s26 = scalar_lea.vmem %s338_s25, 512  ;;  %p514_p11 = scmp.lt.s32.totalorder %s338_s25, %s338_s25 }
  0x40   :  { %p510_p10 = scmp.ne.s32.totalorder %s338_s25, %s509_s26  ;;  %p515_p12 = scmp.lt.s32.totalorder %s509_s26, %s509_s26 }
  0x41   :  { %v80_v24 = vrot.slane %v75_v22, %v79_v21  ;;  %v84_v25 = vrot.slane %v75_v22, %v83_v23 }
  0x42   :  { %184 = vmatpush1.bf16.msra.mxu0 %v409_v6  ;;  %386 = vmatpush1.bf16.msra.mxu1 %v409_v6  ;;  %p516_p13 = por %p515_p12, %p514_p11 }
  0x43   :  { %185 = vmatprep.subr.bf16.mxu0 %v410_v7  ;;  %379 = vmatprep.subr.bf16.mxu1 %v410_v7 }
  0x44   :  { %p517_p0 = pnand %p516_p13, %p510_p10 }
  0x46   :  { %186 = vmatpush1.bf16.msra.mxu0 %v412_v8  ;;  %387 = vmatpush1.bf16.msra.mxu1 %v412_v8 }
  0x47   :  { %187 = vmatprep.subr.bf16.mxu0 %v413_v9  ;;  %380 = vmatprep.subr.bf16.mxu1 %v413_v9 }
  0x4a   :  { %188 = vmatpush1.bf16.msra.mxu0 %v415_v10  ;;  %388 = vmatpush1.bf16.msra.mxu1 %v415_v10 }
  0x4b   :  { %189 = vmatprep.subr.bf16.mxu0 %v416_v11  ;;  %381 = vmatprep.subr.bf16.mxu1 %v416_v11 }
  0x4e   :  { %190 = vmatpush1.bf16.msra.mxu0 %v418_v12  ;;  %389 = vmatpush1.bf16.msra.mxu1 %v418_v12 }
  0x4f   :  { %191 = vmatprep.subr.bf16.mxu0 %v419_v13  ;;  %382 = vmatprep.subr.bf16.mxu1 %v419_v13 }
  0x52   :  { %192 = vmatpush1.bf16.msra.mxu0 %v421_v14  ;;  %390 = vmatpush1.bf16.msra.mxu1 %v421_v14 }
  0x53   :  { %193 = vmatprep.subr.bf16.mxu0 %v422_v15  ;;  %383 = vmatprep.subr.bf16.mxu1 %v422_v15 }
  0x56   :  { %194 = vmatpush1.bf16.msra.mxu0 %v424_v16  ;;  %391 = vmatpush1.bf16.msra.mxu1 %v424_v16 }
  0x59   :  { %212 = vmatmul.mubr.bf16.vlgmr.msra.gmra.mrb[0].mxu0 %v425_v17  ;;  %222 = vmatmul.mubr.bf16.vlgmr.msra.gmra.mrb[0].mxu1 %v426_v18 }
 0x12c   :  { %v213_v26 = vpop.f32.mrb[0].mxu0  ;;  %v223_v27 = vpop.f32.mrb[0].mxu1 }
 0x12d   :  { %v605_v28 = vadd.f32 %v213_v26, %v80_v24  ;;  %v607_v29 = vadd.f32 %v223_v27, %v80_v24  ;;  %v215_v30 = vpop.f32.mrb[1].mxu0  ;;  %v225_v31 = vpop.f32.mrb[1].mxu1 }
 0x12e   :  { %v609_v32 = vadd.f32 %v215_v30, %v84_v25  ;;  %v611_v33 = vadd.f32 %v225_v31, %v84_v25  ;;  %v217_v34 = vpop.f32.mrb[2].mxu0  ;;  %v227_v35 = vpop.f32.mrb[2].mxu1 }
 0x12f   :  { %v240_v36 = vmul.f32 %v605_v28, %v605_v28  ;;  %v244_v37 = vmul.f32 %v607_v29, %v607_v29  ;;  %v219_v38 = vpop.f32.mrb[3].mxu0  ;;  %v229_v39 = vpop.f32.mrb[3].mxu1  ;;  %v623_v44 = vadd.f32 %v217_v34, %v80_v24  ;;  %v625_v45 = vadd.f32 %v227_v35, %v80_v24 }
 0x130   :  { %v241_v40 = vmul.f32 %v609_v32, %v609_v32  ;;  %v245_v41 = vmul.f32 %v611_v33, %v611_v33  ;;  %v629_v48 = vadd.f32 %v219_v38, %v84_v25  ;;  %v633_v52 = vadd.f32 %v229_v39, %v84_v25 }
 0x131   :  { %v248_v42 = vmul.f32 %v240_v36, %v605_v28  ;;  %v252_v43 = vmul.f32 %v244_v37, %v607_v29  ;;  %v242_v51 = vmul.f32 %v623_v44, %v623_v44  ;;  %v246_v55 = vmul.f32 %v625_v45, %v625_v45 }
 0x132   :  { %v249_v46 = vmul.f32 %v241_v40, %v609_v32  ;;  %v253_v47 = vmul.f32 %v245_v41, %v611_v33  ;;  %v243_v62 = vmul.f32 %v629_v48, %v629_v48  ;;  %v247_v2 = vmul.f32 %v633_v52, %v633_v52 }
 0x133   :  { %v256_v49 = vmul.f32 0.044715, %v248_v42  ;;  %v260_v50 = vmul.f32 0.044715, %v252_v43  ;;  %v250_v58 = vmul.f32 %v242_v51, %v623_v44  ;;  %v254_v61 = vmul.f32 %v246_v55, %v625_v45 }
 0x134   :  { %v257_v53 = vmul.f32 0.044715, %v249_v46  ;;  %v261_v54 = vmul.f32 0.044715, %v253_v47  ;;  %v251_v6 = vmul.f32 %v243_v62, %v629_v48  ;;  %v255_v8 = vmul.f32 %v247_v2, %v633_v52 }
 0x135   :  { %v264_v56 = vadd.f32 %v256_v49, %v605_v28  ;;  %v268_v57 = vadd.f32 %v260_v50, %v607_v29  ;;  %v258_v1 = vmul.f32 0.044715, %v250_v58  ;;  %v262_v5 = vmul.f32 0.044715, %v254_v61 }
 0x136   :  { %v265_v59 = vadd.f32 %v257_v53, %v609_v32  ;;  %v269_v60 = vadd.f32 %v261_v54, %v611_v33  ;;  %v259_v10 = vmul.f32 0.044715, %v251_v6  ;;  %v263_v12 = vmul.f32 0.044715, %v255_v8 }
 0x137   :  { %v272_v63 = vmul.f32 0.7978846, %v264_v56  ;;  %v276_v0 = vmul.f32 0.7978846, %v268_v57  ;;  %v266_v7 = vadd.f32 %v258_v1, %v623_v44  ;;  %v270_v9 = vadd.f32 %v262_v5, %v625_v45 }
 0x138   :  { %v273_v3 = vmul.f32 0.7978846, %v265_v59  ;;  %v277_v4 = vmul.f32 0.7978846, %v269_v60  ;;  %v267_v14 = vadd.f32 %v259_v10, %v629_v48  ;;  %v271_v15 = vadd.f32 %v263_v12, %v633_v52 }
 0x139   :  { %427 = vtanh.f32 %v272_v63  ;;  %v274_v11 = vmul.f32 0.7978846, %v266_v7  ;;  %v278_v13 = vmul.f32 0.7978846, %v270_v9  ;;  %v232_v20 = vmul.f32 0.5, %v605_v28 }
 0x13a   :  { %429 = vtanh.f32 %v276_v0  ;;  %v275_v16 = vmul.f32 0.7978846, %v267_v14  ;;  %v279_v17 = vmul.f32 0.7978846, %v271_v15  ;;  %v236_v23 = vmul.f32 0.5, %v607_v29 }
 0x13b   :  { %431 = vtanh.f32 %v273_v3  ;;  %v233_v27 = vmul.f32 0.5, %v609_v32  ;;  %v237_v35 = vmul.f32 0.5, %v611_v33  ;;  %v234_v28 = vmul.f32 0.5, %v623_v44 }
 0x13c   :  { %433 = vtanh.f32 %v277_v4  ;;  %v238_v29 = vmul.f32 0.5, %v625_v45  ;;  %v235_v32 = vmul.f32 0.5, %v629_v48  ;;  %v239_v33 = vmul.f32 0.5, %v633_v52 }
 0x13d   :  { %435 = vtanh.f32 %v274_v11 }
 0x13e   :  { %437 = vtanh.f32 %v278_v13 }
 0x13f   :  { %439 = vtanh.f32 %v275_v16 }
 0x140   :  { %441 = vtanh.f32 %v279_v17 }
 0x143   :  { %v428_v18 = vpop.eup %427 }
 0x144   :  { %v430_v19 = vpop.eup %429  ;;  %v288_v21 = vadd.f32 1.0, %v428_v18 }
 0x145   :  { %v432_v22 = vpop.eup %431  ;;  %v292_v24 = vadd.f32 1.0, %v430_v19 }
 0x146   :  { %v434_v25 = vpop.eup %433  ;;  %v296_v26 = vmul.f32 %v288_v21, %v232_v20  ;;  %v289_v30 = vadd.f32 1.0, %v432_v22 }
 0x147   :  { %v436_v31 = vpop.eup %435  ;;  %v300_v34 = vmul.f32 %v292_v24, %v236_v23  ;;  %v293_v36 = vadd.f32 1.0, %v434_v25 }
 0x148   :  { %v438_v37 = vpop.eup %437  ;;  %v297_v38 = vmul.f32 %v289_v30, %v233_v27  ;;  %v290_v39 = vadd.f32 1.0, %v436_v31 }
 0x149   :  { %v301_v40 = vmul.f32 %v293_v36, %v237_v35  ;;  %v294_v41 = vadd.f32 1.0, %v438_v37  ;;  %v440_v42 = vpop.eup %439 }
 0x14a   :  { %v372_v43 = vpack.c.bf16 %v297_v38, %v296_v26  ;;  %v442_v46 = vpop.eup %441  ;;  %v298_v47 = vmul.f32 %v290_v39, %v234_v28  ;;  %v291_v49 = vadd.f32 1.0, %v440_v42 }
 0x14b   :  { %v374_v50 = vpack.c.bf16 %v301_v40, %v300_v34  ;;  %v302_v51 = vmul.f32 %v294_v41, %v238_v29  ;;  %v295_v53 = vadd.f32 1.0, %v442_v46 }
 0x14c   :  { %328 = vst [vmem:[#allocation8] sm:$0xff] %v372_v43  ;;  %v299_v54 = vmul.f32 %v291_v49, %v235_v32 }
 0x14d   :  { %330 = vst [vmem:[#allocation8 + $0x10] sm:$0xff] %v374_v50  ;;  %v303_v44 = vmul.f32 %v295_v53, %v239_v33 }
 0x14e   :  { %v373_v55 = vpack.c.bf16 %v299_v54, %v298_v47 }
 0x14f   :  { %v375_v56 = vpack.c.bf16 %v303_v44, %v302_v51 }
 0x150   :  { %329 = vst [vmem:[#allocation8 + $0x8] sm:$0xff] %v373_v55 }
 0x151   :  { %331 = vst [vmem:[#allocation8 + $0x18] sm:$0xff] %v375_v56 }
 0x152   :  { %520 = shalt.err (!%p517_p0)
}
 0x153   :  { %s521_s29 = scalar_lea.hbm %s679_s3, 512 }
 0x154   :  { %p522_p1 = scmp.ne.s32.totalorder %s679_s3, %s521_s29  ;;  %p525_p2 = scmp.lt.u32.totalorder %s521_s29, %s679_s3 }
 0x156   :  { %p527_p3 = pnand %p525_p2, %p522_p1 }
 0x158   :  { %530 = shalt.err (!%p527_p3)
}
 0x159   :  { %343 = dma.vmem_to_hbm [thread:$0]  %s338_s25, 512, %s679_s3, [#allocation4], %s538_s22, %s538_s22, %s539_s23  }
 0x15a   :  { %535 = dma.done.wait [#allocation4], 512  }
 0x15b   :  { %536 = vsyncadd [#allocation4], 4294966784 }
 0x15c   :  { %347 = vsyncpa [#allocation3], 1 }
 0x15d   :  { %348 = vsyncpa [#allocation6], 1 }
 0x15e   :  { %349 = vsyncpa [#allocation4], 1 }

// kernel: vdnet_forward.17
= control target key start
LH: loop header
LB: loop body
LE: loop exit
PB: predicated region body
PF: predicated region fallthrough
CT: control target
= control target key end

     0   :  { %11 = vsyncpa [#allocation3], 0  ;;  %s789_s0 = inlined_call_operand.hbm [shape: bf16[32,128], index: 0, kind: input, shape index: {}]   ;;  %s790_s1 = inlined_call_operand.hbm [shape: bf16[128,128], index: 1, kind: input, shape index: {}]   ;;  %s791_s2 = inlined_call_operand.hbm [shape: f32[1,128], index: 2, kind: input, shape index: {}]   ;;  %s792_s3 = inlined_call_operand.hbm [shape: bf16[32,128], index: 3, kind: input, shape index: {}]   ;;  %s793_s4 = inlined_call_operand.hbm [shape: f32[1,128], index: 4, kind: input, shape index: {}]   ;;  %s794_s5 = inlined_call_operand.hbm [shape: f32[1,128], index: 5, kind: input, shape index: {}]   ;;  %s795_s6 = inlined_call_operand.hbm [shape: bf16[32,128], index: 6, kind: output, shape index: {}]  }
   0x1   :  { %12 = vsyncpa [#allocation6], 0 }
   0x2   :  { %13 = vsyncpa [#allocation9], 0 }
   0x3   :  { %14 = vsyncpa [#allocation12], 0 }
   0x4   :  { %15 = vsyncpa [#allocation4], 0  ;;  %s630_s21 = smov [#allocation5]   ;;  %s631_s23 = smov [#allocation8]  }
   0x5   :  { %s33_s22 = sshll.u32 %s630_s21, 4  ;;  %s55_s24 = sshll.u32 %s631_s23, 4  ;;  %s34_s22 = int_to_ptr.vmem [resolvable:$true] %s33_s22  ;;  %s674_s24 = int_to_ptr.vmem [resolvable:$true] %s55_s24 }
   0x6   :  { %s466_s27 = scalar_lea.hbm %s790_s1, 1024 }
   0x7   :  { %p467_p0 = scmp.ne.s32.totalorder %s790_s1, %s466_s27  ;;  %p470_p1 = scmp.lt.u32.totalorder %s466_s27, %s790_s1 }
   0x9   :  { %p472_p2 = pnand %p470_p1, %p467_p0 }
   0xb   :  { %475 = shalt.err (!%p472_p2)
}
   0xc   :  { %s476_s8 = scalar_lea.vmem %s34_s22, 1024  ;;  %p481_p4 = scmp.lt.s32.totalorder %s34_s22, %s34_s22 }
   0xd   :  { %p477_p3 = scmp.ne.s32.totalorder %s34_s22, %s476_s8  ;;  %p482_p5 = scmp.lt.s32.totalorder %s476_s8, %s476_s8 }
   0xf   :  { %p483_p6 = por %p482_p5, %p481_p4 }
  0x11   :  { %p484_p7 = pnand %p483_p6, %p477_p3 }
  0x13   :  { %487 = shalt.err (!%p484_p7)
}
  0x14   :  { %s632_s9 = smov 64   ;;  %s633_s10 = smov 4  }
  0x15   :  { %39 = dma.hbm_to_vmem [thread:$0]  %s790_s1, 1024, %s34_s22, [#allocation6], %s632_s9, %s632_s9, %s633_s10  }
  0x16   :  { %s488_s15 = scalar_lea.hbm %s792_s3, 256 }
  0x17   :  { %p489_p8 = scmp.ne.s32.totalorder %s792_s3, %s488_s15  ;;  %p492_p9 = scmp.lt.u32.totalorder %s488_s15, %s792_s3 }
  0x19   :  { %p494_p10 = pnand %p492_p9, %p489_p8 }
  0x1b   :  { %497 = shalt.err (!%p494_p10)
}
  0x1c   :  { %s498_s20 = scalar_lea.vmem %s674_s24, 256  ;;  %p503_p12 = scmp.lt.s32.totalorder %s674_s24, %s674_s24 }
  0x1d   :  { %p499_p11 = scmp.ne.s32.totalorder %s674_s24, %s498_s20  ;;  %p504_p13 = scmp.lt.s32.totalorder %s498_s20, %s498_s20 }
  0x1f   :  { %p505_p0 = por %p504_p13, %p503_p12 }
  0x21   :  { %p506_p1 = pnand %p505_p0, %p499_p11 }
  0x23   :  { %509 = shalt.err (!%p506_p1)
}
  0x24   :  { %61 = dma.hbm_to_vmem [thread:$0]  %s792_s3, 256, %s674_s24, [#allocation9], %s632_s9, %s632_s9, %s633_s10  }
  0x25   :  { %s634_s22 = smov [#allocation2]   ;;  %s635_s25 = smov [#allocation7]  }
  0x26   :  { %s21_s23 = sshll.u32 %s634_s22, 4  ;;  %s46_s26 = sshll.u32 %s635_s25, 4  ;;  %s22_s23 = int_to_ptr.vmem [resolvable:$true] %s21_s23  ;;  %s47_s26 = int_to_ptr.vmem [resolvable:$true] %s46_s26 }
  0x27   :  { %s510_s29 = scalar_lea.hbm %s789_s0, 256 }
  0x28   :  { %p511_p2 = scmp.ne.s32.totalorder %s789_s0, %s510_s29  ;;  %p514_p3 = scmp.lt.u32.totalorder %s510_s29, %s789_s0 }
  0x2a   :  { %p516_p4 = pnand %p514_p3, %p511_p2 }
  0x2c   :  { %519 = shalt.err (!%p516_p4)
}
  0x2d   :  { %s520_s3 = scalar_lea.vmem %s22_s23, 256  ;;  %p525_p6 = scmp.lt.s32.totalorder %s22_s23, %s22_s23 }
  0x2e   :  { %p521_p5 = scmp.ne.s32.totalorder %s22_s23, %s520_s3  ;;  %p526_p7 = scmp.lt.s32.totalorder %s520_s3, %s520_s3 }
  0x30   :  { %p527_p8 = por %p526_p7, %p525_p6 }
  0x32   :  { %p528_p9 = pnand %p527_p8, %p521_p5 }
  0x34   :  { %531 = shalt.err (!%p528_p9)
}
  0x35   :  { %27 = dma.hbm_to_vmem [thread:$0]  %s789_s0, 256, %s22_s23, [#allocation3], %s632_s9, %s632_s9, %s633_s10  }
  0x36   :  { %s532_s15 = scalar_lea.hbm %s791_s2, 16 }
  0x37   :  { %p533_p10 = scmp.ne.s32.totalorder %s791_s2, %s532_s15  ;;  %p536_p11 = scmp.lt.u32.totalorder %s532_s15, %s791_s2 }
  0x39   :  { %p538_p12 = pnand %p536_p11, %p533_p10 }
  0x3b   :  { %541 = shalt.err (!%p538_p12)
}
  0x3c   :  { %s542_s20 = scalar_lea.vmem %s47_s26, 16  ;;  %s546_s1 = scalar_lea.vmem %s47_s26, 32 }
  0x3d   :  { %p543_p13 = scmp.ne.s32.totalorder %s47_s26, %s542_s20  ;;  %p547_p0 = scmp.lt.s32.totalorder %s47_s26, %s47_s26 }
  0x3e   :  { %p548_p1 = scmp.lt.s32.totalorder %s546_s1, %s542_s20 }
  0x40   :  { %p549_p2 = por %p548_p1, %p547_p0 }
  0x42   :  { %p550_p3 = pnand %p549_p2, %p543_p13 }
  0x44   :  { %553 = shalt.err (!%p550_p3)
}
  0x45   :  { %49 = dma.hbm_to_vmem [thread:$0]  %s791_s2, 16, %s47_s26, [#allocation6]  }
  0x46   :  { %s636_s22 = smov [#allocation10]   ;;  %s637_s25 = smov [#allocation11]  }
  0x47   :  { %s68_s23 = sshll.u32 %s636_s22, 4  ;;  %s78_s27 = sshll.u32 %s637_s25, 4  ;;  %s69_s23 = int_to_ptr.vmem [resolvable:$true] %s68_s23  ;;  %s79_s27 = int_to_ptr.vmem [resolvable:$true] %s78_s27 }
  0x48   :  { %s554_s30 = scalar_lea.hbm %s793_s4, 16 }
  0x49   :  { %p555_p4 = scmp.ne.s32.totalorder %s793_s4, %s554_s30  ;;  %p558_p5 = scmp.lt.u32.totalorder %s554_s30, %s793_s4 }
  0x4b   :  { %p560_p6 = pnand %p558_p5, %p555_p4 }
  0x4d   :  { %563 = shalt.err (!%p560_p6)
}
  0x4e   :  { %s564_s2 = scalar_lea.vmem %s69_s23, 16  ;;  %s568_s26 = scalar_lea.vmem %s69_s23, 32 }
  0x4f   :  { %p565_p7 = scmp.ne.s32.totalorder %s69_s23, %s564_s2  ;;  %p569_p8 = scmp.lt.s32.totalorder %s69_s23, %s69_s23 }
  0x50   :  { %p570_p9 = scmp.lt.s32.totalorder %s568_s26, %s564_s2 }
  0x52   :  { %p571_p10 = por %p570_p9, %p569_p8 }
  0x54   :  { %p572_p11 = pnand %p571_p10, %p565_p7 }
  0x56   :  { %575 = shalt.err (!%p572_p11)
}
  0x57   :  { %71 = dma.hbm_to_vmem [thread:$0]  %s793_s4, 16, %s69_s23, [#allocation9]  }
  0x58   :  { %s576_s15 = scalar_lea.hbm %s794_s5, 16 }
  0x59   :  { %p577_p12 = scmp.ne.s32.totalorder %s794_s5, %s576_s15  ;;  %p580_p13 = scmp.lt.u32.totalorder %s576_s15, %s794_s5 }
  0x5b   :  { %p582_p0 = pnand %p580_p13, %p577_p12 }
  0x5d   :  { %585 = shalt.err (!%p582_p0)
}
  0x5e   :  { %s586_s20 = scalar_lea.vmem %s79_s27, 16  ;;  %s590_s1 = scalar_lea.vmem %s79_s27, 32 }
  0x5f   :  { %p587_p1 = scmp.ne.s32.totalorder %s79_s27, %s586_s20  ;;  %p591_p2 = scmp.lt.s32.totalorder %s79_s27, %s79_s27 }
  0x60   :  { %p592_p3 = scmp.lt.s32.totalorder %s590_s1, %s586_s20 }
  0x62   :  { %p593_p4 = por %p592_p3, %p591_p2 }
  0x64   :  { %p594_p5 = pnand %p593_p4, %p587_p1 }
  0x66   :  { %597 = shalt.err (!%p594_p5)
}
  0x67   :  { %81 = dma.hbm_to_vmem [thread:$0]  %s794_s5, 16, %s79_s27, [#allocation12]  }
  0x68   :  { %620 = dma.done.wait [#allocation3], 256  }
  0x69   :  { %621 = vsyncadd [#allocation3], 4294967040 }
  0x6a   :  { %622 = dma.done.wait [#allocation6], 1040  }
  0x6b   :  { %623 = vsyncadd [#allocation6], 4294966256 }
  0x6c   :  { %624 = dma.done.wait [#allocation9], 272  }
  0x6d   :  { %625 = vsyncadd [#allocation9], 4294967024 }
  0x6e   :  { %626 = dma.done.wait [#allocation12], 16  }
  0x6f   :  { %627 = vsyncadd [#allocation12], 4294967280  ;;  %v448_v0 = vld [vmem:[#allocation5] sm:$0xff]   ;;  %v449_v1 = vld [vmem:[#allocation5 + $0x8] sm:$0xff]   ;;  %s638_s5 = smov [#allocation13]  }
  0x70   :  { %419 = vmatprep.subr.bf16.mxu0 %v448_v0  ;;  %v450_v2 = vld [vmem:[#allocation5 + $0x10] sm:$0xff]   ;;  %v451_v3 = vld [vmem:[#allocation5 + $0x18] sm:$0xff]   ;;  %v452_v5 = vld [vmem:[#allocation5 + $0x20] sm:$0xff]   ;;  %s353_s21 = sshll.u32 %s638_s5, 4  ;;  %s354_s21 = int_to_ptr.vmem [resolvable:$true] %s353_s21 }
  0x71   :  { %420 = vmatpush3.bf16.msra.mxu0 %v448_v0  ;;  %v456_v4 = vld [vmem:[#allocation2] sm:$0xff]   ;;  %v453_v6 = vld [vmem:[#allocation5 + $0x28] sm:$0xff]   ;;  %v455_v8 = vld [vmem:[#allocation5 + $0x38] sm:$0xff]   ;;  %s598_s22 = scalar_lea.vmem %s354_s21, 256  ;;  %p603_p7 = scmp.lt.s32.totalorder %s354_s21, %s354_s21 }
  0x72   :  { %421 = vmatprep.subr.bf16.mxu0 %v449_v1  ;;  %435 = vmatprep.mubr.bf16.mxu0 %v456_v4  ;;  %v454_v7 = vld [vmem:[#allocation5 + $0x30] sm:$0xff]   ;;  %v457_v9 = vld [vmem:[#allocation2 + $0x8] sm:$0xff]   ;;  %v390_v11 = vld [vmem:[#allocation8] sm:$0xff]   ;;  %p599_p6 = scmp.ne.s32.totalorder %s354_s21, %s598_s22  ;;  %p604_p8 = scmp.lt.s32.totalorder %s598_s22, %s598_s22 }
  0x73   :  { %v407_v10 = vld [vmem:[#allocation8 + $0x8] sm:$0xff]   ;;  %v368_v12 = vld [vmem:[#allocation7] ss:$0 sm:$0xff]  ;;  %v391_v15 = vunpack.c.l.bf16 %v390_v11  ;;  %v392_v24 = vunpack.c.h.bf16 %v390_v11  ;;  %v379_v4 = vld [vmem:[#allocation10] ss:$0 sm:$0xff] }
  0x74   :  { %v395_v13 = vunpack.c.l.bf16 %v407_v10  ;;  %v396_v22 = vunpack.c.h.bf16 %v407_v10  ;;  %p605_p9 = por %p604_p8, %p603_p7 }
  0x75   :  { %422 = vmatpush3.bf16.msra.mxu0 %v449_v1 }
  0x76   :  { %423 = vmatprep.subr.bf16.mxu0 %v450_v2  ;;  %p606_p10 = pnand %p605_p9, %p599_p6 }
  0x79   :  { %424 = vmatpush3.bf16.msra.mxu0 %v450_v2 }
  0x7a   :  { %425 = vmatprep.subr.bf16.mxu0 %v451_v3 }
  0x7d   :  { %426 = vmatpush3.bf16.msra.mxu0 %v451_v3 }
  0x7e   :  { %427 = vmatprep.subr.bf16.mxu0 %v452_v5 }
  0x81   :  { %428 = vmatpush3.bf16.msra.mxu0 %v452_v5 }
  0x82   :  { %429 = vmatprep.subr.bf16.mxu0 %v453_v6 }
  0x85   :  { %430 = vmatpush3.bf16.msra.mxu0 %v453_v6 }
  0x86   :  { %431 = vmatprep.subr.bf16.mxu0 %v454_v7 }
  0x89   :  { %432 = vmatpush3.bf16.msra.mxu0 %v454_v7 }
  0x8a   :  { %433 = vmatprep.subr.bf16.mxu0 %v455_v8 }
  0x8d   :  { %434 = vmatpush3.bf16.msra.mxu0 %v455_v8  ;;  %v380_v8 = vld [vmem:[#allocation11] ss:$0 sm:$0xff] }
  0x90   :  { %436 = vmatmul.mubr.bf16.vlgmr.msra.gmra.mrb[0].mxu0 %v457_v9 }
 0x163   :  { %v437_v14 = vpop.f32.mrb[0].mxu0 }
 0x164   :  { %v231_v16 = vadd.f32 %v437_v14, %v368_v12  ;;  %v222_v17 = vpop.f32.mrb[1].mxu0 }
 0x165   :  { %v223_v18 = vadd.f32 %v368_v12, %v222_v17  ;;  %v438_v19 = vpop.f32.mrb[2].mxu0 }
 0x166   :  { %v762_v20 = vadd.f32 %v395_v13, %v231_v16  ;;  %v234_v21 = vadd.f32 %v438_v19, %v368_v12  ;;  %v225_v23 = vpop.f32.mrb[3].mxu0 }
 0x167   :  { %v245_v25 = vadd.f32 %v391_v15, %v223_v18  ;;  %v226_v26 = vadd.f32 %v368_v12, %v225_v23 }
 0x168   :  { %253 = vadd.xlane.f32.xlu1 %v762_v20  ;;  %v765_v27 = vadd.f32 %v396_v22, %v234_v21  ;;  %v264_v32 = vmul.f32 %v762_v20, %v762_v20 }
 0x169   :  { %249 = vadd.xlane.f32.xlu0 %v245_v25  ;;  %v246_v28 = vadd.f32 %v392_v24, %v226_v26  ;;  %v262_v30 = vmul.f32 %v245_v25, %v245_v25 }
 0x16a   :  { %v265_v31 = vmul.f32 %v765_v27, %v765_v27 }
 0x16b   :  { %v263_v29 = vmul.f32 %v246_v28, %v246_v28 }
 0x16c   :  { %255 = vadd.xlane.f32.xlu1 %v765_v27 }
 0x16d   :  { %251 = vadd.xlane.f32.xlu0 %v246_v28 }
 0x170   :  { %268 = vadd.xlane.f32.xlu1 %v263_v29 }
 0x171   :  { %266 = vadd.xlane.f32.xlu0 %v262_v30 }
 0x174   :  { %272 = vadd.xlane.f32.xlu1 %v265_v31 }
 0x175   :  { %270 = vadd.xlane.f32.xlu0 %v264_v32 }
 0x1f5   :  { %v254_v33 = vpop.xlane.xlu1 %253 }
 0x1f6   :  { %v250_v34 = vpop.xlane.xlu0 %249  ;;  %v260_v44 = vmul.f32 0.0078125, %v254_v33 }
 0x1f7   :  { %v258_v37 = vmul.f32 0.0078125, %v250_v34 }
 0x1f8   :  { %v280_v54 = vmul.f32 %v260_v44, %v260_v44  ;;  %v292_v12 = vsub.f32 %v762_v20, %v260_v44 }
 0x1f9   :  { %v256_v35 = vpop.xlane.xlu1 %255  ;;  %v278_v45 = vmul.f32 %v258_v37, %v258_v37  ;;  %v290_v3 = vsub.f32 %v245_v25, %v258_v37 }
 0x1fa   :  { %v252_v36 = vpop.xlane.xlu0 %251  ;;  %v261_v41 = vmul.f32 0.0078125, %v256_v35 }
 0x1fb   :  { %v259_v38 = vmul.f32 0.0078125, %v252_v36 }
 0x1fc   :  { %v281_v50 = vmul.f32 %v261_v41, %v261_v41  ;;  %v293_v9 = vsub.f32 %v765_v27, %v261_v41 }
 0x1fd   :  { %v279_v39 = vmul.f32 %v259_v38, %v259_v38  ;;  %v269_v40 = vpop.xlane.xlu1 %268  ;;  %v291_v1 = vsub.f32 %v246_v28, %v259_v38 }
 0x1fe   :  { %v275_v42 = vmul.f32 0.0078125, %v269_v40  ;;  %v267_v43 = vpop.xlane.xlu0 %266 }
 0x1ff   :  { %v274_v46 = vmul.f32 0.0078125, %v267_v43 }
 0x200   :  { %v283_v47 = vsub.f32 %v275_v42, %v279_v39 }
 0x201   :  { %v282_v48 = vsub.f32 %v274_v46, %v278_v45  ;;  %v273_v49 = vpop.xlane.xlu1 %272 }
 0x202   :  { %v287_v51 = vmax.f32 %v283_v47, 0.0  ;;  %v277_v52 = vmul.f32 0.0078125, %v273_v49  ;;  %v271_v53 = vpop.xlane.xlu0 %270 }
 0x203   :  { %v286_v55 = vmax.f32 %v282_v48, 0.0  ;;  %v276_v56 = vmul.f32 0.0078125, %v271_v53 }
 0x204   :  { %v295_v57 = vadd.f32 1e-12, %v287_v51  ;;  %v285_v58 = vsub.f32 %v277_v52, %v281_v50 }
 0x205   :  { %v294_v59 = vadd.f32 1e-12, %v286_v55  ;;  %v284_v60 = vsub.f32 %v276_v56, %v280_v54 }
 0x206   :  { %458 = vrsqrt.f32 %v295_v57  ;;  %v289_v61 = vmax.f32 %v285_v58, 0.0 }
 0x207   :  { %460 = vrsqrt.f32 %v294_v59  ;;  %v288_v62 = vmax.f32 %v284_v60, 0.0 }
 0x208   :  { %v297_v63 = vadd.f32 1e-12, %v289_v61 }
 0x209   :  { %v296_v0 = vadd.f32 1e-12, %v288_v62 }
 0x20a   :  { %462 = vrsqrt.f32 %v297_v63 }
 0x20b   :  { %464 = vrsqrt.f32 %v296_v0 }
 0x210   :  { %v459_v2 = vpop.eup %458 }
 0x211   :  { %v461_v5 = vpop.eup %460  ;;  %v303_v6 = vmul.f32 %v459_v2, %v291_v1 }
 0x212   :  { %v302_v7 = vmul.f32 %v461_v5, %v290_v3 }
 0x213   :  { %v314_v10 = vmul.f32 %v379_v4, %v303_v6 }
 0x214   :  { %v463_v11 = vpop.eup %462  ;;  %v313_v13 = vmul.f32 %v379_v4, %v302_v7 }
 0x215   :  { %v465_v14 = vpop.eup %464  ;;  %v305_v15 = vmul.f32 %v463_v11, %v293_v9  ;;  %v325_v16 = vadd.f32 %v380_v8, %v314_v10 }
 0x216   :  { %v304_v17 = vmul.f32 %v465_v14, %v292_v12  ;;  %v324_v18 = vadd.f32 %v380_v8, %v313_v13 }
 0x217   :  { %v316_v19 = vmul.f32 %v379_v4, %v305_v15 }
 0x218   :  { %v315_v21 = vmul.f32 %v379_v4, %v304_v17  ;;  %v400_v22 = vpack.c.bf16 %v325_v16, %v324_v18 }
 0x219   :  { %v327_v23 = vadd.f32 %v380_v8, %v316_v19 }
 0x21a   :  { %v326_v24 = vadd.f32 %v380_v8, %v315_v21  ;;  %401 = vst [vmem:[#allocation13] sm:$0xff] %v400_v22  }
 0x21c   :  { %v405_v25 = vpack.c.bf16 %v327_v23, %v326_v24 }
 0x21e   :  { %408 = vst [vmem:[#allocation13 + $0x8] sm:$0xff] %v405_v25  }
 0x21f   :  { %609 = shalt.err (!%p606_p10)
}
 0x220   :  { %s610_s27 = scalar_lea.hbm %s795_s6, 256 }
 0x221   :  { %p611_p11 = scmp.ne.s32.totalorder %s795_s6, %s610_s27  ;;  %p614_p12 = scmp.lt.u32.totalorder %s610_s27, %s795_s6 }
 0x223   :  { %p616_p13 = pnand %p614_p12, %p611_p11 }
 0x225   :  { %619 = shalt.err (!%p616_p13)
}
 0x226   :  { %359 = dma.vmem_to_hbm [thread:$0]  %s354_s21, 256, %s795_s6, [#allocation4], %s632_s9, %s632_s9, %s633_s10  }
 0x227   :  { %628 = dma.done.wait [#allocation4], 256  }
 0x228   :  { %629 = vsyncadd [#allocation4], 4294967040 }
 0x229   :  { %363 = vsyncpa [#allocation3], 1 }
 0x22a   :  { %364 = vsyncpa [#allocation6], 1 }
 0x22b   :  { %365 = vsyncpa [#allocation9], 1 }
 0x22c   :  { %366 = vsyncpa [#allocation12], 1 }
 0x22d   :  { %367 = vsyncpa [#allocation4], 1 }

// kernel: vdnet_forward.19
= control target key start
LH: loop header
LB: loop body
LE: loop exit
PB: predicated region body
PF: predicated region fallthrough
CT: control target
= control target key end

     0   :  { %11 = vsyncpa [#allocation3], 0  ;;  %s891_s0 = inlined_call_operand.hbm [shape: bf16[32,256], index: 0, kind: input, shape index: {}]   ;;  %s892_s1 = inlined_call_operand.hbm [shape: bf16[256,128], index: 1, kind: input, shape index: {}]   ;;  %s893_s2 = inlined_call_operand.hbm [shape: f32[1,128], index: 2, kind: input, shape index: {}]   ;;  %s894_s3 = inlined_call_operand.hbm [shape: bf16[32,128], index: 3, kind: input, shape index: {}]   ;;  %s895_s4 = inlined_call_operand.hbm [shape: f32[1,128], index: 4, kind: input, shape index: {}]   ;;  %s896_s5 = inlined_call_operand.hbm [shape: f32[1,128], index: 5, kind: input, shape index: {}]   ;;  %s897_s6 = inlined_call_operand.hbm [shape: bf16[32,128], index: 6, kind: output, shape index: {}]  }
   0x1   :  { %12 = vsyncpa [#allocation6], 0 }
   0x2   :  { %13 = vsyncpa [#allocation9], 0 }
   0x3   :  { %14 = vsyncpa [#allocation12], 0 }
   0x4   :  { %15 = vsyncpa [#allocation4], 0  ;;  %s740_s21 = smov [#allocation5]   ;;  %s576_s25 = scalar_lea.hbm %s892_s1, 2048 }
   0x5   :  { %s33_s22 = sshll.u32 %s740_s21, 4  ;;  %p577_p0 = scmp.ne.s32.totalorder %s892_s1, %s576_s25  ;;  %s34_s22 = int_to_ptr.vmem [resolvable:$true] %s33_s22 }
   0x6   :  { %p580_p1 = scmp.lt.u32.totalorder %s576_s25, %s892_s1 }
   0x8   :  { %p582_p2 = pnand %p580_p1, %p577_p0 }
   0xa   :  { %585 = shalt.err (!%p582_p2)
}
   0xb   :  { %s586_s30 = scalar_lea.vmem %s34_s22, 2048  ;;  %p591_p4 = scmp.lt.s32.totalorder %s34_s22, %s34_s22 }
   0xc   :  { %p587_p3 = scmp.ne.s32.totalorder %s34_s22, %s586_s30  ;;  %p592_p5 = scmp.lt.s32.totalorder %s586_s30, %s586_s30 }
   0xe   :  { %p593_p6 = por %p592_p5, %p591_p4 }
  0x10   :  { %p594_p7 = pnand %p593_p6, %p587_p3 }
  0x12   :  { %597 = shalt.err (!%p594_p7)
}
  0x13   :  { %s741_s7 = smov 64   ;;  %s742_s8 = smov 4  }
  0x14   :  { %39 = dma.hbm_to_vmem [thread:$0]  %s892_s1, 2048, %s34_s22, [#allocation6], %s741_s7, %s741_s7, %s742_s8  }
  0x15   :  { %s743_s11 = smov [#allocation8]   ;;  %s744_s13 = smov [#allocation2]  }
  0x16   :  { %s55_s12 = sshll.u32 %s743_s11, 4  ;;  %s21_s14 = sshll.u32 %s744_s13, 4  ;;  %s56_s12 = int_to_ptr.vmem [resolvable:$true] %s55_s12  ;;  %s22_s14 = int_to_ptr.vmem [resolvable:$true] %s21_s14 }
  0x17   :  { %s598_s17 = scalar_lea.hbm %s894_s3, 256 }
  0x18   :  { %p599_p8 = scmp.ne.s32.totalorder %s894_s3, %s598_s17  ;;  %p602_p9 = scmp.lt.u32.totalorder %s598_s17, %s894_s3 }
  0x1a   :  { %p604_p10 = pnand %p602_p9, %p599_p8 }
  0x1c   :  { %607 = shalt.err (!%p604_p10)
}
  0x1d   :  { %s608_s1 = scalar_lea.vmem %s56_s12, 256  ;;  %p613_p12 = scmp.lt.s32.totalorder %s56_s12, %s56_s12 }
  0x1e   :  { %p609_p11 = scmp.ne.s32.totalorder %s56_s12, %s608_s1  ;;  %p614_p13 = scmp.lt.s32.totalorder %s608_s1, %s608_s1 }
  0x20   :  { %p615_p0 = por %p614_p13, %p613_p12 }
  0x22   :  { %p616_p1 = pnand %p615_p0, %p609_p11 }
  0x24   :  { %619 = shalt.err (!%p616_p1)
}
  0x25   :  { %61 = dma.hbm_to_vmem [thread:$0]  %s894_s3, 256, %s56_s12, [#allocation9], %s741_s7, %s741_s7, %s742_s8  }
  0x26   :  { %s620_s26 = scalar_lea.hbm %s891_s0, 512 }
  0x27   :  { %p621_p2 = scmp.ne.s32.totalorder %s891_s0, %s620_s26  ;;  %p624_p3 = scmp.lt.u32.totalorder %s620_s26, %s891_s0 }
  0x29   :  { %p626_p4 = pnand %p624_p3, %p621_p2 }
  0x2b   :  { %629 = shalt.err (!%p626_p4)
}
  0x2c   :  { %s630_s9 = scalar_lea.vmem %s22_s14, 512  ;;  %p635_p6 = scmp.lt.s32.totalorder %s22_s14, %s22_s14 }
  0x2d   :  { %p631_p5 = scmp.ne.s32.totalorder %s22_s14, %s630_s9  ;;  %p636_p7 = scmp.lt.s32.totalorder %s630_s9, %s630_s9 }
  0x2f   :  { %p637_p8 = por %p636_p7, %p635_p6 }
  0x31   :  { %p638_p9 = pnand %p637_p8, %p631_p5 }
  0x33   :  { %641 = shalt.err (!%p638_p9)
}
  0x34   :  { %s745_s3 = smov 128   ;;  %s746_s10 = smov 8  }
  0x35   :  { %27 = dma.hbm_to_vmem [thread:$0]  %s891_s0, 512, %s22_s14, [#allocation3], %s745_s3, %s745_s3, %s746_s10  }
  0x36   :  { %s747_s13 = smov [#allocation7]   ;;  %s748_s16 = smov [#allocation10]  }
  0x37   :  { %s46_s15 = sshll.u32 %s747_s13, 4  ;;  %s68_s17 = sshll.u32 %s748_s16, 4  ;;  %s47_s15 = int_to_ptr.vmem [resolvable:$true] %s46_s15  ;;  %s69_s17 = int_to_ptr.vmem [resolvable:$true] %s68_s17 }
  0x38   :  { %s642_s20 = scalar_lea.hbm %s893_s2, 16 }
  0x39   :  { %p643_p10 = scmp.ne.s32.totalorder %s893_s2, %s642_s20  ;;  %p646_p11 = scmp.lt.u32.totalorder %s642_s20, %s893_s2 }
  0x3b   :  { %p648_p12 = pnand %p646_p11, %p643_p10 }
  0x3d   :  { %651 = shalt.err (!%p648_p12)
}
  0x3e   :  { %s652_s0 = scalar_lea.vmem %s47_s15, 16  ;;  %s656_s14 = scalar_lea.vmem %s47_s15, 32 }
  0x3f   :  { %p653_p13 = scmp.ne.s32.totalorder %s47_s15, %s652_s0  ;;  %p657_p0 = scmp.lt.s32.totalorder %s47_s15, %s47_s15 }
  0x40   :  { %p658_p1 = scmp.lt.s32.totalorder %s656_s14, %s652_s0 }
  0x42   :  { %p659_p2 = por %p658_p1, %p657_p0 }
  0x44   :  { %p660_p3 = pnand %p659_p2, %p653_p13 }
  0x46   :  { %663 = shalt.err (!%p660_p3)
}
  0x47   :  { %49 = dma.hbm_to_vmem [thread:$0]  %s893_s2, 16, %s47_s15, [#allocation6]  }
  0x48   :  { %s664_s28 = scalar_lea.hbm %s895_s4, 16 }
  0x49   :  { %p665_p4 = scmp.ne.s32.totalorder %s895_s4, %s664_s28  ;;  %p668_p5 = scmp.lt.u32.totalorder %s664_s28, %s895_s4 }
  0x4b   :  { %p670_p6 = pnand %p668_p5, %p665_p4 }
  0x4d   :  { %673 = shalt.err (!%p670_p6)
}
  0x4e   :  { %s674_s10 = scalar_lea.vmem %s69_s17, 16  ;;  %s678_s11 = scalar_lea.vmem %s69_s17, 32 }
  0x4f   :  { %p675_p7 = scmp.ne.s32.totalorder %s69_s17, %s674_s10  ;;  %p679_p8 = scmp.lt.s32.totalorder %s69_s17, %s69_s17 }
  0x50   :  { %p680_p9 = scmp.lt.s32.totalorder %s678_s11, %s674_s10 }
  0x52   :  { %p681_p10 = por %p680_p9, %p679_p8 }
  0x54   :  { %p682_p11 = pnand %p681_p10, %p675_p7 }
  0x56   :  { %685 = shalt.err (!%p682_p11)
}
  0x57   :  { %71 = dma.hbm_to_vmem [thread:$0]  %s895_s4, 16, %s69_s17, [#allocation9]  }
  0x58   :  { %s749_s13 = smov [#allocation11]   ;;  %s686_s19 = scalar_lea.hbm %s896_s5, 16 }
  0x59   :  { %s78_s15 = sshll.u32 %s749_s13, 4  ;;  %p687_p12 = scmp.ne.s32.totalorder %s896_s5, %s686_s19  ;;  %s79_s15 = int_to_ptr.vmem [resolvable:$true] %s78_s15 }
  0x5a   :  { %p690_p13 = scmp.lt.u32.totalorder %s686_s19, %s896_s5 }
  0x5c   :  { %p692_p0 = pnand %p690_p13, %p687_p12 }
  0x5e   :  { %695 = shalt.err (!%p692_p0)
}
  0x5f   :  { %s696_s23 = scalar_lea.vmem %s79_s15, 16  ;;  %s700_s4 = scalar_lea.vmem %s79_s15, 32 }
  0x60   :  { %p697_p1 = scmp.ne.s32.totalorder %s79_s15, %s696_s23  ;;  %p701_p2 = scmp.lt.s32.totalorder %s79_s15, %s79_s15 }
  0x61   :  { %p702_p3 = scmp.lt.s32.totalorder %s700_s4, %s696_s23 }
  0x63   :  { %p703_p4 = por %p702_p3, %p701_p2 }
  0x65   :  { %p704_p5 = pnand %p703_p4, %p697_p1 }
  0x67   :  { %707 = shalt.err (!%p704_p5)
}
  0x68   :  { %81 = dma.hbm_to_vmem [thread:$0]  %s896_s5, 16, %s79_s15, [#allocation12]  }
  0x69   :  { %730 = dma.done.wait [#allocation3], 512  }
  0x6a   :  { %731 = vsyncadd [#allocation3], 4294966784 }
  0x6b   :  { %732 = dma.done.wait [#allocation6], 2064  }
  0x6c   :  { %733 = vsyncadd [#allocation6], 4294965232 }
  0x6d   :  { %734 = dma.done.wait [#allocation9], 272  }
  0x6e   :  { %735 = vsyncadd [#allocation9], 4294967024 }
  0x6f   :  { %736 = dma.done.wait [#allocation12], 16  }
  0x70   :  { %737 = vsyncadd [#allocation12], 4294967280  ;;  %v546_v0 = vld [vmem:[#allocation5 + $0x40] sm:$0xff]   ;;  %v548_v2 = vld [vmem:[#allocation5 + $0x48] sm:$0xff]   ;;  %s750_s5 = smov [#allocation13]  }
  0x71   :  { %v547_v1 = vld [vmem:[#allocation5] sm:$0xff]   ;;  %491 = vmatprep.subr.bf16.mxu0 %v546_v0  ;;  %519 = vmatprep.subr.bf16.mxu1 %v546_v0  ;;  %v549_v3 = vld [vmem:[#allocation5 + $0x8] sm:$0xff]   ;;  %v550_v4 = vld [vmem:[#allocation5 + $0x50] sm:$0xff]   ;;  %s425_s14 = sshll.u32 %s750_s5, 4  ;;  %s426_s14 = int_to_ptr.vmem [resolvable:$true] %s425_s14 }
  0x72   :  { %492 = vmatpush3.bf16.msra.mxu0 %v547_v1  ;;  %527 = vmatpush3.bf16.msra.mxu1 %v547_v1  ;;  %v551_v5 = vld [vmem:[#allocation5 + $0x10] sm:$0xff]   ;;  %v552_v6 = vld [vmem:[#allocation5 + $0x58] sm:$0xff]   ;;  %v554_v8 = vld [vmem:[#allocation5 + $0x60] sm:$0xff]   ;;  %s708_s24 = scalar_lea.vmem %s426_s14, 256  ;;  %p713_p7 = scmp.lt.s32.totalorder %s426_s14, %s426_s14 }
  0x73   :  { %493 = vmatprep.subr.bf16.mxu0 %v548_v2  ;;  %520 = vmatprep.subr.bf16.mxu1 %v548_v2  ;;  %v553_v7 = vld [vmem:[#allocation5 + $0x18] sm:$0xff]   ;;  %v555_v9 = vld [vmem:[#allocation5 + $0x20] sm:$0xff]   ;;  %v556_v10 = vld [vmem:[#allocation5 + $0x68] sm:$0xff]   ;;  %p709_p6 = scmp.ne.s32.totalorder %s426_s14, %s708_s24  ;;  %p714_p8 = scmp.lt.s32.totalorder %s708_s24, %s708_s24 }
  0x74   :  { %v564_v11 = vld [vmem:[#allocation2 + $0x4] ss:$8 sps:$4 sm:$0xff]   ;;  %v567_v12 = vld [vmem:[#allocation2 + $0x14] ss:$8 sps:$4 sm:$0xff]   ;;  %v562_v18 = vld [vmem:[#allocation2] ss:$8 sps:$4 sm:$0xff]  }
  0x75   :  { %v557_v13 = vld [vmem:[#allocation5 + $0x28] sm:$0xff]   ;;  %v558_v14 = vld [vmem:[#allocation5 + $0x70] sm:$0xff]   ;;  %292 = vmatprep.mubr.bf16.mxu0 %v564_v11  ;;  %300 = vmatprep.mubr.bf16.mxu1 %v567_v12  ;;  %v560_v16 = vld [vmem:[#allocation5 + $0x78] sm:$0xff]   ;;  %p715_p9 = por %p714_p8, %p713_p7 }
  0x76   :  { %494 = vmatpush3.bf16.msra.mxu0 %v549_v3  ;;  %528 = vmatpush3.bf16.msra.mxu1 %v549_v3  ;;  %v559_v15 = vld [vmem:[#allocation5 + $0x30] sm:$0xff]   ;;  %v561_v17 = vld [vmem:[#allocation5 + $0x38] sm:$0xff]   ;;  %v472_v21 = vld [vmem:[#allocation8] sm:$0xff]  }
  0x77   :  { %495 = vmatprep.subr.bf16.mxu0 %v550_v4  ;;  %521 = vmatprep.subr.bf16.mxu1 %v550_v4  ;;  %v565_v19 = vld [vmem:[#allocation2 + $0x10] ss:$8 sps:$4 sm:$0xff]   ;;  %v440_v24 = vld [vmem:[#allocation7] ss:$0 sm:$0xff]  ;;  %v473_v32 = vunpack.c.l.bf16 %v472_v21  ;;  %v474_v40 = vunpack.c.h.bf16 %v472_v21  ;;  %p716_p10 = pnand %p715_p9, %p709_p6 }
  0x78   :  { %v489_v20 = vld [vmem:[#allocation8 + $0x8] sm:$0xff]  }
  0x79   :  { %v477_v31 = vunpack.c.l.bf16 %v489_v20  ;;  %v478_v39 = vunpack.c.h.bf16 %v489_v20 }
  0x7a   :  { %496 = vmatpush3.bf16.msra.mxu0 %v551_v5  ;;  %529 = vmatpush3.bf16.msra.mxu1 %v551_v5 }
  0x7b   :  { %497 = vmatprep.subr.bf16.mxu0 %v552_v6  ;;  %522 = vmatprep.subr.bf16.mxu1 %v552_v6 }
  0x7e   :  { %498 = vmatpush3.bf16.msra.mxu0 %v553_v7  ;;  %530 = vmatpush3.bf16.msra.mxu1 %v553_v7 }
  0x7f   :  { %499 = vmatprep.subr.bf16.mxu0 %v554_v8  ;;  %523 = vmatprep.subr.bf16.mxu1 %v554_v8 }
  0x82   :  { %500 = vmatpush3.bf16.msra.mxu0 %v555_v9  ;;  %531 = vmatpush3.bf16.msra.mxu1 %v555_v9 }
  0x83   :  { %501 = vmatprep.subr.bf16.mxu0 %v556_v10  ;;  %524 = vmatprep.subr.bf16.mxu1 %v556_v10 }
  0x86   :  { %502 = vmatpush3.bf16.msra.mxu0 %v557_v13  ;;  %532 = vmatpush3.bf16.msra.mxu1 %v557_v13 }
  0x87   :  { %503 = vmatprep.subr.bf16.mxu0 %v558_v14  ;;  %525 = vmatprep.subr.bf16.mxu1 %v558_v14 }
  0x8a   :  { %504 = vmatpush3.bf16.msra.mxu0 %v559_v15  ;;  %533 = vmatpush3.bf16.msra.mxu1 %v559_v15 }
  0x8b   :  { %505 = vmatprep.subr.bf16.mxu0 %v560_v16  ;;  %526 = vmatprep.subr.bf16.mxu1 %v560_v16 }
  0x8e   :  { %506 = vmatpush3.bf16.msra.mxu0 %v561_v17  ;;  %534 = vmatpush3.bf16.msra.mxu1 %v561_v17 }
  0x91   :  { %293 = vmatmul.mubr.bf16.vlgmr.msra.gmra.mrb[0].mxu0 %v562_v18  ;;  %301 = vmatmul.mubr.bf16.vlgmr.msra.gmra.mrb[0].mxu1 %v565_v19 }
 0x164   :  { %v507_v22 = vpop.f32.mrb[0].mxu0  ;;  %v513_v23 = vpop.f32.mrb[0].mxu1 }
 0x165   :  { %v508_v25 = vpop.f32.mrb[1].mxu0  ;;  %v514_v26 = vpop.f32.mrb[1].mxu1 }
 0x166   :  { %v509_v27 = vadd.f32 %v508_v25, %v507_v22  ;;  %v515_v28 = vadd.f32 %v514_v26, %v513_v23  ;;  %v510_v29 = vpop.f32.mrb[2].mxu0  ;;  %v516_v30 = vpop.f32.mrb[2].mxu1  ;;  %v461_v22 = vld [vmem:[#allocation10] ss:$0 sm:$0xff]  ;;  %v462_v26 = vld [vmem:[#allocation11] ss:$0 sm:$0xff] }
 0x167   :  { %v511_v33 = vpop.f32.mrb[3].mxu0  ;;  %v517_v34 = vpop.f32.mrb[3].mxu1 }
 0x168   :  { %v295_v35 = vadd.f32 %v509_v27, %v440_v24  ;;  %v303_v36 = vadd.f32 %v515_v28, %v440_v24  ;;  %v512_v37 = vadd.f32 %v511_v33, %v510_v29  ;;  %v518_v38 = vadd.f32 %v517_v34, %v516_v30 }
 0x16a   :  { %v298_v41 = vadd.f32 %v512_v37, %v440_v24  ;;  %v306_v42 = vadd.f32 %v518_v38, %v440_v24  ;;  %v864_v43 = vadd.f32 %v477_v31, %v303_v36  ;;  %v317_v44 = vadd.f32 %v473_v32, %v295_v35 }
 0x16c   :  { %325 = vadd.xlane.f32.xlu1 %v864_v43  ;;  %321 = vadd.xlane.f32.xlu0 %v317_v44  ;;  %v867_v45 = vadd.f32 %v478_v39, %v306_v42  ;;  %v318_v46 = vadd.f32 %v474_v40, %v298_v41  ;;  %v334_v48 = vmul.f32 %v317_v44, %v317_v44 }
 0x16d   :  { %v336_v50 = vmul.f32 %v864_v43, %v864_v43 }
 0x16e   :  { %v335_v47 = vmul.f32 %v318_v46, %v318_v46  ;;  %v337_v49 = vmul.f32 %v867_v45, %v867_v45 }
 0x170   :  { %327 = vadd.xlane.f32.xlu1 %v867_v45  ;;  %323 = vadd.xlane.f32.xlu0 %v318_v46 }
 0x174   :  { %340 = vadd.xlane.f32.xlu1 %v335_v47  ;;  %338 = vadd.xlane.f32.xlu0 %v334_v48 }
 0x178   :  { %344 = vadd.xlane.f32.xlu1 %v337_v49  ;;  %342 = vadd.xlane.f32.xlu0 %v336_v50 }
 0x1f9   :  { %v326_v51 = vpop.xlane.xlu1 %325  ;;  %v322_v52 = vpop.xlane.xlu0 %321 }
 0x1fa   :  { %v330_v55 = vmul.f32 0.0078125, %v322_v52  ;;  %v332_v57 = vmul.f32 0.0078125, %v326_v51 }
 0x1fc   :  { %v350_v61 = vmul.f32 %v330_v55, %v330_v55  ;;  %v352_v3 = vmul.f32 %v332_v57, %v332_v57  ;;  %v362_v21 = vsub.f32 %v317_v44, %v330_v55  ;;  %v364_v30 = vsub.f32 %v864_v43, %v332_v57 }
 0x1fd   :  { %v328_v53 = vpop.xlane.xlu1 %327  ;;  %v324_v54 = vpop.xlane.xlu0 %323 }
 0x1fe   :  { %v331_v56 = vmul.f32 0.0078125, %v324_v54  ;;  %v333_v58 = vmul.f32 0.0078125, %v328_v53 }
 0x200   :  { %v351_v62 = vmul.f32 %v331_v56, %v331_v56  ;;  %v353_v4 = vmul.f32 %v333_v58, %v333_v58  ;;  %v363_v19 = vsub.f32 %v318_v46, %v331_v56  ;;  %v365_v27 = vsub.f32 %v867_v45, %v333_v58 }
 0x201   :  { %v341_v59 = vpop.xlane.xlu1 %340  ;;  %v339_v60 = vpop.xlane.xlu0 %338 }
 0x202   :  { %v347_v63 = vmul.f32 0.0078125, %v341_v59  ;;  %v346_v0 = vmul.f32 0.0078125, %v339_v60 }
 0x204   :  { %v355_v1 = vsub.f32 %v347_v63, %v351_v62  ;;  %v354_v2 = vsub.f32 %v346_v0, %v350_v61 }
 0x205   :  { %v345_v5 = vpop.xlane.xlu1 %344  ;;  %v343_v6 = vpop.xlane.xlu0 %342 }
 0x206   :  { %v359_v7 = vmax.f32 %v355_v1, 0.0  ;;  %v358_v8 = vmax.f32 %v354_v2, 0.0  ;;  %v349_v9 = vmul.f32 0.0078125, %v345_v5  ;;  %v348_v10 = vmul.f32 0.0078125, %v343_v6 }
 0x208   :  { %v367_v11 = vadd.f32 1e-12, %v359_v7  ;;  %v366_v12 = vadd.f32 1e-12, %v358_v8  ;;  %v357_v13 = vsub.f32 %v349_v9, %v353_v4  ;;  %v356_v14 = vsub.f32 %v348_v10, %v352_v3 }
 0x20a   :  { %568 = vrsqrt.f32 %v367_v11  ;;  %v361_v15 = vmax.f32 %v357_v13, 0.0  ;;  %v360_v16 = vmax.f32 %v356_v14, 0.0 }
 0x20b   :  { %570 = vrsqrt.f32 %v366_v12 }
 0x20c   :  { %v369_v17 = vadd.f32 1e-12, %v361_v15  ;;  %v368_v18 = vadd.f32 1e-12, %v360_v16 }
 0x20e   :  { %572 = vrsqrt.f32 %v369_v17 }
 0x20f   :  { %574 = vrsqrt.f32 %v368_v18 }
 0x214   :  { %v569_v20 = vpop.eup %568 }
 0x215   :  { %v571_v23 = vpop.eup %570  ;;  %v375_v24 = vmul.f32 %v569_v20, %v363_v19 }
 0x216   :  { %v374_v25 = vmul.f32 %v571_v23, %v362_v21 }
 0x217   :  { %v386_v28 = vmul.f32 %v461_v22, %v375_v24 }
 0x218   :  { %v573_v29 = vpop.eup %572  ;;  %v385_v31 = vmul.f32 %v461_v22, %v374_v25 }
 0x219   :  { %v575_v32 = vpop.eup %574  ;;  %v377_v33 = vmul.f32 %v573_v29, %v365_v27  ;;  %v397_v34 = vadd.f32 %v462_v26, %v386_v28 }
 0x21a   :  { %v376_v35 = vmul.f32 %v575_v32, %v364_v30  ;;  %v396_v36 = vadd.f32 %v462_v26, %v385_v31 }
 0x21b   :  { %v388_v37 = vmul.f32 %v461_v22, %v377_v33 }
 0x21c   :  { %v387_v38 = vmul.f32 %v461_v22, %v376_v35  ;;  %v482_v39 = vpack.c.bf16 %v397_v34, %v396_v36 }
 0x21d   :  { %v399_v40 = vadd.f32 %v462_v26, %v388_v37 }
 0x21e   :  { %v398_v41 = vadd.f32 %v462_v26, %v387_v38  ;;  %483 = vst [vmem:[#allocation13] sm:$0xff] %v482_v39  }
 0x220   :  { %v487_v42 = vpack.c.bf16 %v399_v40, %v398_v41 }
 0x222   :  { %490 = vst [vmem:[#allocation13 + $0x8] sm:$0xff] %v487_v42  }
 0x223   :  { %719 = shalt.err (!%p716_p10)
}
 0x224   :  { %s720_s27 = scalar_lea.hbm %s897_s6, 256 }
 0x225   :  { %p721_p11 = scmp.ne.s32.totalorder %s897_s6, %s720_s27  ;;  %p724_p12 = scmp.lt.u32.totalorder %s720_s27, %s897_s6 }
 0x227   :  { %p726_p13 = pnand %p724_p12, %p721_p11 }
 0x229   :  { %729 = shalt.err (!%p726_p13)
}
 0x22a   :  { %431 = dma.vmem_to_hbm [thread:$0]  %s426_s14, 256, %s897_s6, [#allocation4], %s741_s7, %s741_s7, %s742_s8  }
 0x22b   :  { %738 = dma.done.wait [#allocation4], 256  }
 0x22c   :  { %739 = vsyncadd [#allocation4], 4294967040 }
 0x22d   :  { %435 = vsyncpa [#allocation3], 1 }
 0x22e   :  { %436 = vsyncpa [#allocation6], 1 }
 0x22f   :  { %437 = vsyncpa [#allocation9], 1 }
 0x230   :  { %438 = vsyncpa [#allocation12], 1 }
 0x231   :  { %439 = vsyncpa [#allocation4], 1 }

// kernel: vdnet_forward.25
= control target key start
LH: loop header
LB: loop body
LE: loop exit
PB: predicated region body
PF: predicated region fallthrough
CT: control target
= control target key end

     0   :  { %8 = vsyncpa [#allocation3], 0  ;;  %s501_s0 = inlined_call_operand.hbm [shape: bf16[32,128], index: 0, kind: input, shape index: {}]   ;;  %s502_s1 = inlined_call_operand.hbm [shape: bf16[128,128], index: 1, kind: input, shape index: {}]   ;;  %s503_s2 = inlined_call_operand.hbm [shape: f32[1,128], index: 2, kind: input, shape index: {}]   ;;  %s504_s3 = inlined_call_operand.hbm [shape: bf16[32,128], index: 3, kind: output, shape index: {}]  }
   0x1   :  { %9 = vsyncpa [#allocation6], 0 }
   0x2   :  { %10 = vsyncpa [#allocation4], 0  ;;  %s411_s12 = smov [#allocation5]   ;;  %s412_s14 = smov [#allocation2]  }
   0x3   :  { %s28_s13 = sshll.u32 %s411_s12, 4  ;;  %s16_s15 = sshll.u32 %s412_s14, 4  ;;  %s29_s13 = int_to_ptr.vmem [resolvable:$true] %s28_s13  ;;  %s437_s15 = int_to_ptr.vmem [resolvable:$true] %s16_s15 }
   0x4   :  { %s317_s18 = scalar_lea.hbm %s502_s1, 1024 }
   0x5   :  { %p318_p0 = scmp.ne.s32.totalorder %s502_s1, %s317_s18  ;;  %p321_p1 = scmp.lt.u32.totalorder %s317_s18, %s502_s1 }
   0x7   :  { %p323_p2 = pnand %p321_p1, %p318_p0 }
   0x9   :  { %326 = shalt.err (!%p323_p2)
}
   0xa   :  { %s327_s23 = scalar_lea.vmem %s29_s13, 1024  ;;  %p332_p4 = scmp.lt.s32.totalorder %s29_s13, %s29_s13 }
   0xb   :  { %p328_p3 = scmp.ne.s32.totalorder %s29_s13, %s327_s23  ;;  %p333_p5 = scmp.lt.s32.totalorder %s327_s23, %s327_s23 }
   0xd   :  { %p334_p6 = por %p333_p5, %p332_p4 }
   0xf   :  { %p335_p7 = pnand %p334_p6, %p328_p3 }
  0x11   :  { %338 = shalt.err (!%p335_p7)
}
  0x12   :  { %s413_s24 = smov 64   ;;  %s414_s25 = smov 4  }
  0x13   :  { %34 = dma.hbm_to_vmem [thread:$0]  %s502_s1, 1024, %s29_s13, [#allocation6], %s413_s24, %s413_s24, %s414_s25  }
  0x14   :  { %s339_s30 = scalar_lea.hbm %s501_s0, 256 }
  0x15   :  { %p340_p8 = scmp.ne.s32.totalorder %s501_s0, %s339_s30  ;;  %p343_p9 = scmp.lt.u32.totalorder %s339_s30, %s501_s0 }
  0x17   :  { %p345_p10 = pnand %p343_p9, %p340_p8 }
  0x19   :  { %348 = shalt.err (!%p345_p10)
}
  0x1a   :  { %s349_s8 = scalar_lea.vmem %s437_s15, 256  ;;  %p354_p12 = scmp.lt.s32.totalorder %s437_s15, %s437_s15 }
  0x1b   :  { %p350_p11 = scmp.ne.s32.totalorder %s437_s15, %s349_s8  ;;  %p355_p13 = scmp.lt.s32.totalorder %s349_s8, %s349_s8 }
  0x1d   :  { %p356_p0 = por %p355_p13, %p354_p12 }
  0x1f   :  { %p357_p1 = pnand %p356_p0, %p350_p11 }
  0x21   :  { %360 = shalt.err (!%p357_p1)
}
  0x22   :  { %22 = dma.hbm_to_vmem [thread:$0]  %s501_s0, 256, %s437_s15, [#allocation3], %s413_s24, %s413_s24, %s414_s25  }
  0x23   :  { %s415_s10 = smov [#allocation7]   ;;  %s361_s14 = scalar_lea.hbm %s503_s2, 16 }
  0x24   :  { %s41_s11 = sshll.u32 %s415_s10, 4  ;;  %p362_p2 = scmp.ne.s32.totalorder %s503_s2, %s361_s14  ;;  %s42_s11 = int_to_ptr.vmem [resolvable:$true] %s41_s11 }
  0x25   :  { %p365_p3 = scmp.lt.u32.totalorder %s361_s14, %s503_s2 }
  0x27   :  { %p367_p4 = pnand %p365_p3, %p362_p2 }
  0x29   :  { %370 = shalt.err (!%p367_p4)
}
  0x2a   :  { %s371_s20 = scalar_lea.vmem %s42_s11, 16  ;;  %s375_s0 = scalar_lea.vmem %s42_s11, 32 }
  0x2b   :  { %p372_p5 = scmp.ne.s32.totalorder %s42_s11, %s371_s20  ;;  %p376_p6 = scmp.lt.s32.totalorder %s42_s11, %s42_s11 }
  0x2c   :  { %p377_p7 = scmp.lt.s32.totalorder %s375_s0, %s371_s20 }
  0x2e   :  { %p378_p8 = por %p377_p7, %p376_p6 }
  0x30   :  { %p379_p9 = pnand %p378_p8, %p372_p5 }
  0x32   :  { %382 = shalt.err (!%p379_p9)
}
  0x33   :  { %44 = dma.hbm_to_vmem [thread:$0]  %s503_s2, 16, %s42_s11, [#allocation6]  }
  0x34   :  { %405 = dma.done.wait [#allocation3], 256  }
  0x35   :  { %406 = vsyncadd [#allocation3], 4294967040 }
  0x36   :  { %407 = dma.done.wait [#allocation6], 1040  }
  0x37   :  { %408 = vsyncadd [#allocation6], 4294966256  ;;  %v299_v0 = vld [vmem:[#allocation5] sm:$0xff]   ;;  %v300_v1 = vld [vmem:[#allocation5 + $0x8] sm:$0xff]   ;;  %s416_s2 = smov [#allocation8]  }
  0x38   :  { %273 = vmatprep.subr.bf16.mxu0 %v299_v0  ;;  %v301_v2 = vld [vmem:[#allocation5 + $0x10] sm:$0xff]   ;;  %v302_v3 = vld [vmem:[#allocation5 + $0x18] sm:$0xff]   ;;  %v303_v5 = vld [vmem:[#allocation5 + $0x20] sm:$0xff]   ;;  %s220_s22 = sshll.u32 %s416_s2, 4  ;;  %s221_s22 = int_to_ptr.vmem [resolvable:$true] %s220_s22 }
  0x39   :  { %274 = vmatpush3.bf16.msra.mxu0 %v299_v0  ;;  %v307_v4 = vld [vmem:[#allocation2] sm:$0xff]   ;;  %v304_v6 = vld [vmem:[#allocation5 + $0x28] sm:$0xff]   ;;  %v306_v8 = vld [vmem:[#allocation5 + $0x38] sm:$0xff]   ;;  %s383_s23 = scalar_lea.vmem %s221_s22, 256  ;;  %p388_p11 = scmp.lt.s32.totalorder %s221_s22, %s221_s22 }
  0x3a   :  { %275 = vmatprep.subr.bf16.mxu0 %v300_v1  ;;  %289 = vmatprep.mubr.bf16.mxu0 %v307_v4  ;;  %v305_v7 = vld [vmem:[#allocation5 + $0x30] sm:$0xff]   ;;  %v308_v9 = vld [vmem:[#allocation2 + $0x8] sm:$0xff]   ;;  %v233_v10 = vld [vmem:[#allocation7] ss:$0 sm:$0xff]  ;;  %p384_p10 = scmp.ne.s32.totalorder %s221_s22, %s383_s23  ;;  %p389_p12 = scmp.lt.s32.totalorder %s383_s23, %s383_s23 }
  0x3c   :  { %p390_p13 = por %p389_p12, %p388_p11 }
  0x3d   :  { %276 = vmatpush3.bf16.msra.mxu0 %v300_v1 }
  0x3e   :  { %277 = vmatprep.subr.bf16.mxu0 %v301_v2  ;;  %p391_p0 = pnand %p390_p13, %p384_p10 }
  0x41   :  { %278 = vmatpush3.bf16.msra.mxu0 %v301_v2 }
  0x42   :  { %279 = vmatprep.subr.bf16.mxu0 %v302_v3 }
  0x45   :  { %280 = vmatpush3.bf16.msra.mxu0 %v302_v3 }
  0x46   :  { %281 = vmatprep.subr.bf16.mxu0 %v303_v5 }
  0x49   :  { %282 = vmatpush3.bf16.msra.mxu0 %v303_v5 }
  0x4a   :  { %283 = vmatprep.subr.bf16.mxu0 %v304_v6 }
  0x4d   :  { %284 = vmatpush3.bf16.msra.mxu0 %v304_v6 }
  0x4e   :  { %285 = vmatprep.subr.bf16.mxu0 %v305_v7 }
  0x51   :  { %286 = vmatpush3.bf16.msra.mxu0 %v305_v7 }
  0x52   :  { %287 = vmatprep.subr.bf16.mxu0 %v306_v8 }
  0x55   :  { %288 = vmatpush3.bf16.msra.mxu0 %v306_v8 }
  0x58   :  { %290 = vmatmul.mubr.bf16.vlgmr.msra.gmra.mrb[0].mxu0 %v308_v9 }
 0x12b   :  { %v291_v11 = vpop.f32.mrb[0].mxu0 }
 0x12c   :  { %v185_v12 = vadd.f32 %v291_v11, %v233_v10  ;;  %v176_v13 = vpop.f32.mrb[1].mxu0 }
 0x12d   :  { %v177_v14 = vadd.f32 %v233_v10, %v176_v13  ;;  %v292_v15 = vpop.f32.mrb[2].mxu0 }
 0x12e   :  { %309 = vtanh.f32 %v185_v12  ;;  %v188_v16 = vadd.f32 %v292_v15, %v233_v10  ;;  %v179_v17 = vpop.f32.mrb[3].mxu0 }
 0x12f   :  { %311 = vtanh.f32 %v177_v14  ;;  %v180_v18 = vadd.f32 %v233_v10, %v179_v17 }
 0x130   :  { %313 = vtanh.f32 %v188_v16 }
 0x131   :  { %315 = vtanh.f32 %v180_v18 }
 0x138   :  { %v310_v19 = vpop.eup %309 }
 0x139   :  { %v312_v20 = vpop.eup %311 }
 0x13a   :  { %v314_v21 = vpop.eup %313 }
 0x13b   :  { %v316_v22 = vpop.eup %315  ;;  %v260_v23 = vpack.c.bf16 %v314_v21, %v310_v19 }
 0x13c   :  { %v255_v24 = vpack.c.bf16 %v316_v22, %v312_v20 }
 0x13d   :  { %262 = vst [vmem:[#allocation8 + $0x8] sm:$0xff] %v260_v23  }
 0x13e   :  { %256 = vst [vmem:[#allocation8] sm:$0xff] %v255_v24  }
 0x13f   :  { %394 = shalt.err (!%p391_p0)
}
 0x140   :  { %s395_s28 = scalar_lea.hbm %s504_s3, 256 }
 0x141   :  { %p396_p1 = scmp.ne.s32.totalorder %s504_s3, %s395_s28  ;;  %p399_p2 = scmp.lt.u32.totalorder %s395_s28, %s504_s3 }
 0x143   :  { %p401_p3 = pnand %p399_p2, %p396_p1 }
 0x145   :  { %404 = shalt.err (!%p401_p3)
}
 0x146   :  { %226 = dma.vmem_to_hbm [thread:$0]  %s221_s22, 256, %s504_s3, [#allocation4], %s413_s24, %s413_s24, %s414_s25  }
 0x147   :  { %409 = dma.done.wait [#allocation4], 256  }
 0x148   :  { %410 = vsyncadd [#allocation4], 4294967040 }
 0x149   :  { %230 = vsyncpa [#allocation3], 1 }
 0x14a   :  { %231 = vsyncpa [#allocation6], 1 }
 0x14b   :  { %232 = vsyncpa [#allocation4], 1 }

</bundles_post_ra>
